<compile_context>
chip_gen: v7x
topology: tpu7x:2x2x1
jax: 0.10.0
libtpu: 0.0.40
codegen_flags: <defaults>
</compile_context>

<pallas_src>
import functools

import numpy as np

import jax
import jax.numpy as jnp
from jax.experimental import pallas as pl
from jax.experimental.pallas import tpu as pltpu


def _softplus(x):
    # torch.nn.Softplus(beta=1, threshold=20); guarded log(1+exp) (deviation from the
    # log1p form < 1.2e-7 absolute, only for x << 0).
    return jnp.where(x > 20.0, x, jnp.log(1.0 + jnp.exp(jnp.minimum(x, 20.0))))


# -----------------------------------------------------------------------------
# Kernel
# -----------------------------------------------------------------------------
def gin_flow_decoder_kernel(
    z_ref,
    nf_w0, nf_b0, nf_w1, nf_b1, nf_w2, nf_b2,
    cw0, cb0, cw1, cb1, cw2, cb2,
    out_ref,
    *, x_dim, n_layers, compute_dtype,
):
    f32 = jnp.float32

    def mm(a, w):
        # MXU matmul, f32 accumulation. compute_dtype may be bf16 on all generations.
        return jnp.dot(a.astype(compute_dtype), w, preferred_element_type=f32)

    z = z_ref[...]                                            # (bm, z_pad) f32

    # ---- NFlowLayer (concat + z-passthrough folded into an augmented ReLU MLP) ----
    h = jnp.maximum(mm(z, nf_w0[...]) + nf_b0[...], 0.0)
    h = jnp.maximum(mm(h, nf_w1[...]) + nf_b1[...], 0.0)
    x = mm(h, nf_w2[...]) + nf_b2[...]                        # (bm, x_dim), physical frame

    # ---- GIN blocks: every permutation / half-swap folded into the host-side weight
    # layout, so each coupling layer is 3 matmuls + 1 FMA(+exp) on lane-dense tiles.
    for l in range(n_layers):
        hh = jnp.maximum(mm(x, cw0[l]) + cb0[l], 0.0)
        hh = jnp.maximum(mm(hh, cw1[l]) + cb1[l], 0.0)
        # One lane-dense matmul emits [shift(x_dim) | log-scale(x_dim)] straight in the
        # physical lane frame (zeros over the pass-through x1 lanes; GIN "-sum(s)"
        # column folded on host).
        ts = mm(hh, cw2[l]) + cb2[l]                          # (bm, 2*x_dim)
        x = x * jnp.exp(ts[:, x_dim:]) + ts[:, :x_dim]

    # The physical frame was chosen so that here it equals the logical output order.
    out_ref[...] = _softplus(x)


# -----------------------------------------------------------------------------
# Wrapper
# -----------------------------------------------------------------------------
def _pick_bm(B):
    # Largest batch tile (up to 1024 rows) that divides B while keeping the grid
    # length >= 2: the single grid axis is "parallel", so >= 2 steps feed both v7x
    # TensorCores; on v5e/v6e (one TC) the short grid minimizes per-step overhead.
    for bm in (1024, 512, 256, 128):
        if B % bm == 0 and B // bm >= 2:
            return bm
    return B


def gin_flow_decoder(z, kp, *, bm=None):
    B = z.shape[0]
    x_dim = kp["nf_w2"].shape[-1]
    n_layers = kp["cw0"].shape[0]
    compute_dtype = kp["cw0"].dtype
    z_pad = kp["nf_w0"].shape[0]

    if z.shape[1] != z_pad:                       # zero-pad z features to a multiple of 8
        z = jnp.concatenate([z, jnp.zeros((B, z_pad - z.shape[1]), z.dtype)], axis=1)

    if bm is None:
        bm = _pick_bm(B)
    assert B % bm == 0

    flat = [kp[k] for k in ("nf_w0", "nf_b0", "nf_w1", "nf_b1", "nf_w2", "nf_b2",
                            "cw0", "cb0", "cw1", "cb1", "cw2", "cb2")]

    def full_spec(a):
        nd = a.ndim
        return pl.BlockSpec(a.shape, lambda i, _nd=nd: (0,) * _nd)

    in_specs = [pl.BlockSpec((bm, z_pad), lambda i: (i, 0))] + [full_spec(a) for a in flat]
    out_specs = pl.BlockSpec((bm, x_dim), lambda i: (i, 0))

    kernel = functools.partial(
        gin_flow_decoder_kernel,
        x_dim=x_dim, n_layers=n_layers, compute_dtype=compute_dtype,
    )

    return pl.pallas_call(
        kernel,
        out_shape=jax.ShapeDtypeStruct((B, x_dim), jnp.float32),
        grid=(B // bm,),
        in_specs=in_specs,
        out_specs=out_specs,
        compiler_params=pltpu.CompilerParams(dimension_semantics=("parallel",)),
    )(z, *flat)


# -----------------------------------------------------------------------------
# Host-side parameter preparation (exact re-padding / permutation folding)
# -----------------------------------------------------------------------------
def prepare_params(raw, *, x_dim, z_dim, slice_dim, n_gin_blocks, gin_block_depth,
                   compute_dtype=jnp.bfloat16):
    """Exactly re-fold the raw GINFlowDecoder weights for the lane-dense kernel.

    * All PermutationLayers and coupling half-swaps are folded into host-side
      permutations of cw0 rows / cw2(cb2) columns and of the NFlow output columns;
      the initial physical lane frame is chosen so the final frame is the identity.
    * The NFlow concat([z, MLP(z)]) is folded into an augmented ReLU MLP
      (relu(z) - relu(-z) == z), so no selector matmul is needed.
    * The GIN "-sum(s)" log-scale column is folded into cw2 (exact in f32).
    * Matmul weights go to compute_dtype (bf16 by default); biases stay f32.
    """
    n_keep = x_dim - slice_dim
    L = n_gin_blocks * gin_block_depth
    h_a = raw["cw1"].shape[-1]
    h_n = raw["nf_w0"].shape[-1]
    f32 = jnp.float32
    cdt = compute_dtype

    perm_idx = np.asarray(raw["perm_idx"])

    # -- Composite permutation bookkeeping (pure host, numpy) --------------------
    # loc[j] = physical lane holding logical feature j. Data never moves inside the
    # kernel's GIN part, so loc is only relabeled:
    #   PermutationLayer p:    loc <- loc[p]
    #   AffineCouplingLayer:   loc <- concat(loc[slice_dim:], loc[:slice_dim])
    # Choose the initial frame loc0 so that the FINAL loc is the identity.
    half_swap = np.concatenate([np.arange(slice_dim, x_dim), np.arange(slice_dim)])
    sim = np.arange(x_dim)
    sims = []                                   # sim before each coupling layer
    for blk in range(n_gin_blocks):
        sim = sim[perm_idx[blk]]
        for _ in range(gin_block_depth):
            sims.append(sim.copy())
            sim = sim[half_swap]
    loc0 = np.empty(x_dim, dtype=np.int64)
    loc0[sim] = np.arange(x_dim)                # => final loc == identity
    locs = [loc0[s] for s in sims]              # physical frame before each coupling layer

    # -- NFlow: augmented MLP with exact z passthrough, output in frame loc0 -----
    z_pad = ((z_dim + 7) // 8) * 8
    h_aug = h_n + 2 * z_dim
    h_augp = ((h_aug + 7) // 8) * 8
    eye_z = jnp.eye(z_dim, dtype=f32)

    w0 = jnp.zeros((z_pad, h_augp), f32)
    w0 = w0.at[:z_dim, :h_n].set(raw["nf_w0"])
    w0 = w0.at[:z_dim, h_n:h_n + z_dim].set(eye_z)
    w0 = w0.at[:z_dim, h_n + z_dim:h_aug].set(-eye_z)
    b0 = jnp.zeros((1, h_augp), f32).at[:, :h_n].set(raw["nf_b0"])

    w1 = jnp.zeros((h_augp, h_augp), f32)
    w1 = w1.at[:h_n, :h_n].set(raw["nf_w1"])
    w1 = w1.at[h_n:h_aug, h_n:h_aug].set(jnp.eye(2 * z_dim, dtype=f32))
    b1 = jnp.zeros((1, h_augp), f32).at[:, :h_n].set(raw["nf_b1"])

    # Logical layout of the NFlow output is [z | MLP(z)]; then permute columns into
    # the chosen initial physical frame loc0 (phys[:, loc0[j]] = logical[:, j]).
    w2_log = jnp.zeros((h_augp, x_dim), f32)
    w2_log = w2_log.at[:h_n, z_dim:].set(raw["nf_w2"])
    w2_log = w2_log.at[h_n:h_n + z_dim, :z_dim].set(eye_z)
    w2_log = w2_log.at[h_n + z_dim:h_aug, :z_dim].set(-eye_z)
    b2_log = jnp.zeros((1, x_dim), f32).at[:, z_dim:].set(raw["nf_b2"])
    loc0_j = jnp.asarray(loc0)
    w2 = jnp.zeros_like(w2_log).at[:, loc0_j].set(w2_log)
    b2 = jnp.zeros_like(b2_log).at[:, loc0_j].set(b2_log)

    # -- Coupling layers: scatter cw0 rows / cw2 columns into the per-layer frame --
    cw0_l, cw2_l, cb2_l = [], [], []
    for l in range(L):
        loc = jnp.asarray(locs[l])
        rw0 = raw["cw0"][l]                     # (slice_dim, h_a)
        rw2 = raw["cw2"][l]                     # (h_a, 2*n_keep - 1)
        rb2 = raw["cb2"][l]                     # (1,  2*n_keep - 1)

        # x1 half -> full-x matmul: rows scattered to the physical lanes holding x1.
        w0p = jnp.zeros((x_dim, h_a), f32).at[loc[:slice_dim], :].set(rw0)

        # shift / log-scale emitted straight into physical lanes; GIN column folded.
        wt, ws = rw2[:, :n_keep], rw2[:, n_keep:]
        bt, bs = rb2[:, :n_keep], rb2[:, n_keep:]
        ws_full = jnp.concatenate([ws, -jnp.sum(ws, axis=-1, keepdims=True)], axis=-1)
        bs_full = jnp.concatenate([bs, -jnp.sum(bs, axis=-1, keepdims=True)], axis=-1)
        x2_loc = loc[slice_dim:]                # physical lanes holding the x2 half
        w2p = (jnp.zeros((h_a, 2 * x_dim), f32)
               .at[:, x2_loc].set(wt)
               .at[:, x_dim + x2_loc].set(ws_full))
        b2p = (jnp.zeros((1, 2 * x_dim), f32)
               .at[:, x2_loc].set(bt)
               .at[:, x_dim + x2_loc].set(bs_full))

        cw0_l.append(w0p); cw2_l.append(w2p); cb2_l.append(b2p)

    return dict(
        nf_w0=w0.astype(cdt), nf_b0=b0,
        nf_w1=w1.astype(cdt), nf_b1=b1,
        nf_w2=w2.astype(cdt), nf_b2=b2,
        cw0=jnp.stack(cw0_l).astype(cdt), cb0=raw["cb0"],
        cw1=raw["cw1"].astype(cdt),       cb1=raw["cb1"],
        cw2=jnp.stack(cw2_l).astype(cdt), cb2=jnp.stack(cb2_l),
    )


# -----------------------------------------------------------------------------
# Deterministic parameter construction (torch.nn.Linear-style uniform init)
# -----------------------------------------------------------------------------
def _linear(key, fan_in, fan_out):
    kw, kb = jax.random.split(key)
    bound = 1.0 / (fan_in ** 0.5)
    w = jax.random.uniform(kw, (fan_in, fan_out), jnp.float32, -bound, bound)
    b = jax.random.uniform(kb, (1, fan_out), jnp.float32, -bound, bound)
    return w, b


def init_params(key, *, x_dim, z_dim, n_gin_blocks, gin_block_depth, slice_dim=None):
    h_n = x_dim // 4                 # nflow_hidden_layer_dim default
    h_a = x_dim // 4                 # affine_hidden_layer_dim default
    if slice_dim is None:
        slice_dim = x_dim // 2       # affine_input_layer_slice_dim default
    st_out = 2 * (x_dim - slice_dim) - 1
    L = n_gin_blocks * gin_block_depth

    keys = jax.random.split(key, 3 + 3 * L + n_gin_blocks)
    ki = iter(keys)

    nf_w0, nf_b0 = _linear(next(ki), z_dim, h_n)
    nf_w1, nf_b1 = _linear(next(ki), h_n, h_n)
    nf_w2, nf_b2 = _linear(next(ki), h_n, x_dim - z_dim)

    cw0, cb0, cw1, cb1, cw2, cb2 = [], [], [], [], [], []
    for _ in range(L):
        w, b = _linear(next(ki), slice_dim, h_a); cw0.append(w); cb0.append(b)
        w, b = _linear(next(ki), h_a, h_a);       cw1.append(w); cb1.append(b)
        w, b = _linear(next(ki), h_a, st_out);    cw2.append(w); cb2.append(b)

    perm_idx = [jax.random.permutation(next(ki), x_dim) for _ in range(n_gin_blocks)]

    raw = dict(
        nf_w0=nf_w0, nf_b0=nf_b0, nf_w1=nf_w1, nf_b1=nf_b1, nf_w2=nf_w2, nf_b2=nf_b2,
        perm_idx=jnp.stack(perm_idx),
        cw0=jnp.stack(cw0), cb0=jnp.stack(cb0),
        cw1=jnp.stack(cw1), cb1=jnp.stack(cb1),
        cw2=jnp.stack(cw2), cb2=jnp.stack(cb2),
    )
    return raw, slice_dim


# -----------------------------------------------------------------------------
# Pure-JAX reference (original, unfolded formulation — correctness check only)
# -----------------------------------------------------------------------------
def reference(z, raw, *, x_dim, slice_dim, n_gin_blocks, gin_block_depth):
    h = jax.nn.relu(z @ raw["nf_w0"] + raw["nf_b0"])
    h = jax.nn.relu(h @ raw["nf_w1"] + raw["nf_b1"])
    t = h @ raw["nf_w2"] + raw["nf_b2"]
    x = jnp.concatenate([z, t], axis=-1)

    n_keep = x_dim - slice_dim
    layer = 0
    for blk in range(n_gin_blocks):
        x = x[:, raw["perm_idx"][blk]]
        for _ in range(gin_block_depth):
            x1, x2 = x[:, :slice_dim], x[:, slice_dim:]
            hh = jax.nn.relu(x1 @ raw["cw0"][layer] + raw["cb0"][layer])
            hh = jax.nn.relu(hh @ raw["cw1"][layer] + raw["cb1"][layer])
            st = hh @ raw["cw2"][layer] + raw["cb2"][layer]
            t_out, s_out = st[:, :n_keep], st[:, n_keep:]
            s_full = jnp.concatenate([s_out, -jnp.sum(s_out, -1, keepdims=True)], -1)
            x = jnp.concatenate([x2 * jnp.exp(s_full) + t_out, x1], -1)
            layer += 1
    return _softplus(x)


def _run_case(k_par, k_z, *, B, x_dim, z_dim, n_gin_blocks, gin_block_depth,
              slice_dim=None, check_bf16=False):
    raw, slice_dim = init_params(k_par, x_dim=x_dim, z_dim=z_dim,
                                 n_gin_blocks=n_gin_blocks,
                                 gin_block_depth=gin_block_depth,
                                 slice_dim=slice_dim)
    z = jax.random.normal(k_z, (B, z_dim), jnp.float32)

    with jax.default_matmul_precision("float32"):
        ref = reference(z, raw, x_dim=x_dim, slice_dim=slice_dim,
                        n_gin_blocks=n_gin_blocks, gin_block_depth=gin_block_depth)

    # f32 weights: strict check against the pure-JAX reference.
    kp32 = prepare_params(raw, x_dim=x_dim, z_dim=z_dim, slice_dim=slice_dim,
                          n_gin_blocks=n_gin_blocks, gin_block_depth=gin_block_depth,
                          compute_dtype=jnp.float32)
    out32 = jax.block_until_ready(gin_flow_decoder(z, kp32))
    assert out32.shape == (B, x_dim)
    assert bool(jnp.all(jnp.isfinite(out32)))
    assert bool(jnp.allclose(out32, ref, atol=1e-3, rtol=1e-3)), "f32 kernel mismatch"

    if check_bf16:
        # bf16 weights (default), f32 accumulation: loose check.
        kp16 = prepare_params(raw, x_dim=x_dim, z_dim=z_dim, slice_dim=slice_dim,
                              n_gin_blocks=n_gin_blocks, gin_block_depth=gin_block_depth,
                              compute_dtype=jnp.bfloat16)
        out16 = jax.block_until_ready(gin_flow_decoder(z, kp16))
        assert bool(jnp.all(jnp.isfinite(out16)))
        rel = jnp.max(jnp.abs(out16 - ref) / (jnp.abs(ref) + 1.0))
        assert float(rel) < 0.1, "bf16 path deviates too much from reference"


if __name__ == "__main__":
    key = jax.random.PRNGKey(0)
    k1, k2, k3, k4 = jax.random.split(key, 4)

    # Case 1: default config (slice_dim = x_dim // 2); B=256 -> bm=128, 2 parallel
    # grid steps (feeds both v7x TensorCores).  f32 strict + bf16 loose checks.
    _run_case(k1, k2, B=256, x_dim=128, z_dim=4, n_gin_blocks=2, gin_block_depth=2,
              check_bf16=True)

    # Case 2: asymmetric slice_dim and odd z_dim exercise the general permutation
    # folding and the z / hidden-dim padding paths (single grid step, bm=B).
    _run_case(k3, k4, B=64, x_dim=128, z_dim=3, n_gin_blocks=2, gin_block_depth=2,
              slice_dim=40)

    print("KERNEL_OK")
</pallas_src>

<mosaic_0001>
module attributes {stable_mosaic.version = 11 : i64} {
  func.func @gin_flow_decoder_kernel(%arg0: i32, %arg1: memref<128x8xf32, #tpu.memory_space<vmem>>, %arg2: memref<8x40xf32, #tpu.memory_space<vmem>>, %arg3: memref<1x40xf32, #tpu.memory_space<vmem>>, %arg4: memref<40x40xf32, #tpu.memory_space<vmem>>, %arg5: memref<1x40xf32, #tpu.memory_space<vmem>>, %arg6: memref<40x128xf32, #tpu.memory_space<vmem>>, %arg7: memref<1x128xf32, #tpu.memory_space<vmem>>, %arg8: memref<4x128x32xf32, #tpu.memory_space<vmem>>, %arg9: memref<4x1x32xf32, #tpu.memory_space<vmem>>, %arg10: memref<4x32x32xf32, #tpu.memory_space<vmem>>, %arg11: memref<4x1x32xf32, #tpu.memory_space<vmem>>, %arg12: memref<4x32x256xf32, #tpu.memory_space<vmem>>, %arg13: memref<4x1x256xf32, #tpu.memory_space<vmem>>, %arg14: memref<128x128xf32, #tpu.memory_space<vmem>>) attributes {dimension_semantics = [#tpu.dimension_semantics<parallel>], iteration_bounds = array<i64: 2>, scalar_prefetch = 0 : i64, scratch_operands = 0 : i64, tpu.core_type = #tpu.core_type<tc>, window_params = [{transform_indices = @transform_0, window_bounds = array<i64: 128, 8>}, {pipeline_mode = #tpu.pipeline_mode<synchronous>, transform_indices = @transform_1, window_bounds = array<i64: 8, 40>}, {pipeline_mode = #tpu.pipeline_mode<synchronous>, transform_indices = @transform_2, window_bounds = array<i64: 1, 40>}, {pipeline_mode = #tpu.pipeline_mode<synchronous>, transform_indices = @transform_3, window_bounds = array<i64: 40, 40>}, {pipeline_mode = #tpu.pipeline_mode<synchronous>, transform_indices = @transform_4, window_bounds = array<i64: 1, 40>}, {pipeline_mode = #tpu.pipeline_mode<synchronous>, transform_indices = @transform_5, window_bounds = array<i64: 40, 128>}, {pipeline_mode = #tpu.pipeline_mode<synchronous>, transform_indices = @transform_6, window_bounds = array<i64: 1, 128>}, {pipeline_mode = #tpu.pipeline_mode<synchronous>, transform_indices = @transform_7, window_bounds = array<i64: 4, 128, 32>}, {pipeline_mode = #tpu.pipeline_mode<synchronous>, transform_indices = @transform_8, window_bounds = array<i64: 4, 1, 32>}, {pipeline_mode = #tpu.pipeline_mode<synchronous>, transform_indices = @transform_9, window_bounds = array<i64: 4, 32, 32>}, {pipeline_mode = #tpu.pipeline_mode<synchronous>, transform_indices = @transform_10, window_bounds = array<i64: 4, 1, 32>}, {pipeline_mode = #tpu.pipeline_mode<synchronous>, transform_indices = @transform_11, window_bounds = array<i64: 4, 32, 256>}, {pipeline_mode = #tpu.pipeline_mode<synchronous>, transform_indices = @transform_12, window_bounds = array<i64: 4, 1, 256>}, {transform_indices = @transform_13, window_bounds = array<i64: 128, 128>}]} {
    %c0 = arith.constant 0 : index
    %c0_0 = arith.constant 0 : index
    %0 = vector.load %arg1[%c0, %c0_0] : memref<128x8xf32, #tpu.memory_space<vmem>>, vector<128x8xf32>
    %c0_1 = arith.constant 0 : index
    %c0_2 = arith.constant 0 : index
    %1 = vector.load %arg2[%c0_1, %c0_2] : memref<8x40xf32, #tpu.memory_space<vmem>>, vector<8x40xf32>
    %cst = arith.constant dense<0.000000e+00> : vector<128x40xf32>
    %2 = tpu.matmul %0, %1, %cst {dimension_numbers = #tpu.dot_dimension_numbers<[1], [0], [0], [1], [0, 0, 1, 1], [], []>} : vector<128x8xf32>, vector<8x40xf32>, vector<128x40xf32> -> vector<128x40xf32>
    %c0_3 = arith.constant 0 : index
    %c0_4 = arith.constant 0 : index
    %3 = vector.load %arg3[%c0_3, %c0_4] : memref<1x40xf32, #tpu.memory_space<vmem>>, vector<1x40xf32>
    %4 = vector.broadcast %3 : vector<1x40xf32> to vector<128x40xf32>
    %5 = arith.addf %2, %4 : vector<128x40xf32>
    %cst_5 = arith.constant 0.000000e+00 : f32
    %6 = vector.broadcast %cst_5 : f32 to vector<128x40xf32>
    %7 = arith.maximumf %5, %6 : vector<128x40xf32>
    %c0_6 = arith.constant 0 : index
    %c0_7 = arith.constant 0 : index
    %8 = vector.load %arg4[%c0_6, %c0_7] : memref<40x40xf32, #tpu.memory_space<vmem>>, vector<40x40xf32>
    %cst_8 = arith.constant dense<0.000000e+00> : vector<128x40xf32>
    %9 = tpu.matmul %7, %8, %cst_8 {dimension_numbers = #tpu.dot_dimension_numbers<[1], [0], [0], [1], [0, 0, 1, 1], [], []>} : vector<128x40xf32>, vector<40x40xf32>, vector<128x40xf32> -> vector<128x40xf32>
    %c0_9 = arith.constant 0 : index
    %c0_10 = arith.constant 0 : index
    %10 = vector.load %arg5[%c0_9, %c0_10] : memref<1x40xf32, #tpu.memory_space<vmem>>, vector<1x40xf32>
    %11 = vector.broadcast %10 : vector<1x40xf32> to vector<128x40xf32>
    %12 = arith.addf %9, %11 : vector<128x40xf32>
    %cst_11 = arith.constant 0.000000e+00 : f32
    %13 = vector.broadcast %cst_11 : f32 to vector<128x40xf32>
    %14 = arith.maximumf %12, %13 : vector<128x40xf32>
    %c0_12 = arith.constant 0 : index
    %c0_13 = arith.constant 0 : index
    %15 = vector.load %arg6[%c0_12, %c0_13] : memref<40x128xf32, #tpu.memory_space<vmem>>, vector<40x128xf32>
    %cst_14 = arith.constant dense<0.000000e+00> : vector<128x128xf32>
    %16 = tpu.matmul %14, %15, %cst_14 {dimension_numbers = #tpu.dot_dimension_numbers<[1], [0], [0], [1], [0, 0, 1, 1], [], []>} : vector<128x40xf32>, vector<40x128xf32>, vector<128x128xf32> -> vector<128x128xf32>
    %c0_15 = arith.constant 0 : index
    %c0_16 = arith.constant 0 : index
    %17 = vector.load %arg7[%c0_15, %c0_16] : memref<1x128xf32, #tpu.memory_space<vmem>>, vector<1x128xf32>
    %18 = vector.broadcast %17 : vector<1x128xf32> to vector<128x128xf32>
    %19 = arith.addf %16, %18 : vector<128x128xf32>
    %c0_17 = arith.constant 0 : index
    %c0_18 = arith.constant 0 : index
    %c0_19 = arith.constant 0 : index
    %20 = vector.load %arg8[%c0_17, %c0_18, %c0_19] : memref<4x128x32xf32, #tpu.memory_space<vmem>>, vector<1x128x32xf32>
    %21 = vector.shape_cast %20 : vector<1x128x32xf32> to vector<128x32xf32>
    %cst_20 = arith.constant dense<0.000000e+00> : vector<128x32xf32>
    %22 = tpu.matmul %19, %21, %cst_20 {dimension_numbers = #tpu.dot_dimension_numbers<[1], [0], [0], [1], [0, 0, 1, 1], [], []>} : vector<128x128xf32>, vector<128x32xf32>, vector<128x32xf32> -> vector<128x32xf32>
    %c0_21 = arith.constant 0 : index
    %c0_22 = arith.constant 0 : index
    %c0_23 = arith.constant 0 : index
    %23 = vector.load %arg9[%c0_21, %c0_22, %c0_23] : memref<4x1x32xf32, #tpu.memory_space<vmem>>, vector<1x1x32xf32>
    %24 = vector.shape_cast %23 : vector<1x1x32xf32> to vector<1x32xf32>
    %25 = vector.broadcast %24 : vector<1x32xf32> to vector<128x32xf32>
    %26 = arith.addf %22, %25 : vector<128x32xf32>
    %cst_24 = arith.constant 0.000000e+00 : f32
    %27 = vector.broadcast %cst_24 : f32 to vector<128x32xf32>
    %28 = arith.maximumf %26, %27 : vector<128x32xf32>
    %c0_25 = arith.constant 0 : index
    %c0_26 = arith.constant 0 : index
    %c0_27 = arith.constant 0 : index
    %29 = vector.load %arg10[%c0_25, %c0_26, %c0_27] : memref<4x32x32xf32, #tpu.memory_space<vmem>>, vector<1x32x32xf32>
    %30 = vector.shape_cast %29 : vector<1x32x32xf32> to vector<32x32xf32>
    %cst_28 = arith.constant dense<0.000000e+00> : vector<128x32xf32>
    %31 = tpu.matmul %28, %30, %cst_28 {dimension_numbers = #tpu.dot_dimension_numbers<[1], [0], [0], [1], [0, 0, 1, 1], [], []>} : vector<128x32xf32>, vector<32x32xf32>, vector<128x32xf32> -> vector<128x32xf32>
    %c0_29 = arith.constant 0 : index
    %c0_30 = arith.constant 0 : index
    %c0_31 = arith.constant 0 : index
    %32 = vector.load %arg11[%c0_29, %c0_30, %c0_31] : memref<4x1x32xf32, #tpu.memory_space<vmem>>, vector<1x1x32xf32>
    %33 = vector.shape_cast %32 : vector<1x1x32xf32> to vector<1x32xf32>
    %34 = vector.broadcast %33 : vector<1x32xf32> to vector<128x32xf32>
    %35 = arith.addf %31, %34 : vector<128x32xf32>
    %cst_32 = arith.constant 0.000000e+00 : f32
    %36 = vector.broadcast %cst_32 : f32 to vector<128x32xf32>
    %37 = arith.maximumf %35, %36 : vector<128x32xf32>
    %c0_33 = arith.constant 0 : index
    %c0_34 = arith.constant 0 : index
    %c0_35 = arith.constant 0 : index
    %38 = vector.load %arg12[%c0_33, %c0_34, %c0_35] : memref<4x32x256xf32, #tpu.memory_space<vmem>>, vector<1x32x256xf32>
    %39 = vector.shape_cast %38 : vector<1x32x256xf32> to vector<32x256xf32>
    %cst_36 = arith.constant dense<0.000000e+00> : vector<128x256xf32>
    %40 = tpu.matmul %37, %39, %cst_36 {dimension_numbers = #tpu.dot_dimension_numbers<[1], [0], [0], [1], [0, 0, 1, 1], [], []>} : vector<128x32xf32>, vector<32x256xf32>, vector<128x256xf32> -> vector<128x256xf32>
    %c0_37 = arith.constant 0 : index
    %c0_38 = arith.constant 0 : index
    %c0_39 = arith.constant 0 : index
    %41 = vector.load %arg13[%c0_37, %c0_38, %c0_39] : memref<4x1x256xf32, #tpu.memory_space<vmem>>, vector<1x1x256xf32>
    %42 = vector.shape_cast %41 : vector<1x1x256xf32> to vector<1x256xf32>
    %43 = vector.broadcast %42 : vector<1x256xf32> to vector<128x256xf32>
    %44 = arith.addf %40, %43 : vector<128x256xf32>
    %45 = vector.extract_strided_slice %44 {offsets = [0, 128], sizes = [128, 128], strides = [1, 1]} : vector<128x256xf32> to vector<128x128xf32>
    %46 = math.exp %45 : vector<128x128xf32>
    %47 = arith.mulf %19, %46 : vector<128x128xf32>
    %48 = vector.extract_strided_slice %44 {offsets = [0, 0], sizes = [128, 128], strides = [1, 1]} : vector<128x256xf32> to vector<128x128xf32>
    %49 = arith.addf %47, %48 : vector<128x128xf32>
    %c1 = arith.constant 1 : index
    %c0_40 = arith.constant 0 : index
    %c0_41 = arith.constant 0 : index
    %50 = vector.load %arg8[%c1, %c0_40, %c0_41] : memref<4x128x32xf32, #tpu.memory_space<vmem>>, vector<1x128x32xf32>
    %51 = vector.shape_cast %50 : vector<1x128x32xf32> to vector<128x32xf32>
    %cst_42 = arith.constant dense<0.000000e+00> : vector<128x32xf32>
    %52 = tpu.matmul %49, %51, %cst_42 {dimension_numbers = #tpu.dot_dimension_numbers<[1], [0], [0], [1], [0, 0, 1, 1], [], []>} : vector<128x128xf32>, vector<128x32xf32>, vector<128x32xf32> -> vector<128x32xf32>
    %c1_43 = arith.constant 1 : index
    %c0_44 = arith.constant 0 : index
    %c0_45 = arith.constant 0 : index
    %53 = vector.load %arg9[%c1_43, %c0_44, %c0_45] : memref<4x1x32xf32, #tpu.memory_space<vmem>>, vector<1x1x32xf32>
    %54 = vector.shape_cast %53 : vector<1x1x32xf32> to vector<1x32xf32>
    %55 = vector.broadcast %54 : vector<1x32xf32> to vector<128x32xf32>
    %56 = arith.addf %52, %55 : vector<128x32xf32>
    %cst_46 = arith.constant 0.000000e+00 : f32
    %57 = vector.broadcast %cst_46 : f32 to vector<128x32xf32>
    %58 = arith.maximumf %56, %57 : vector<128x32xf32>
    %c1_47 = arith.constant 1 : index
    %c0_48 = arith.constant 0 : index
    %c0_49 = arith.constant 0 : index
    %59 = vector.load %arg10[%c1_47, %c0_48, %c0_49] : memref<4x32x32xf32, #tpu.memory_space<vmem>>, vector<1x32x32xf32>
    %60 = vector.shape_cast %59 : vector<1x32x32xf32> to vector<32x32xf32>
    %cst_50 = arith.constant dense<0.000000e+00> : vector<128x32xf32>
    %61 = tpu.matmul %58, %60, %cst_50 {dimension_numbers = #tpu.dot_dimension_numbers<[1], [0], [0], [1], [0, 0, 1, 1], [], []>} : vector<128x32xf32>, vector<32x32xf32>, vector<128x32xf32> -> vector<128x32xf32>
    %c1_51 = arith.constant 1 : index
    %c0_52 = arith.constant 0 : index
    %c0_53 = arith.constant 0 : index
    %62 = vector.load %arg11[%c1_51, %c0_52, %c0_53] : memref<4x1x32xf32, #tpu.memory_space<vmem>>, vector<1x1x32xf32>
    %63 = vector.shape_cast %62 : vector<1x1x32xf32> to vector<1x32xf32>
    %64 = vector.broadcast %63 : vector<1x32xf32> to vector<128x32xf32>
    %65 = arith.addf %61, %64 : vector<128x32xf32>
    %cst_54 = arith.constant 0.000000e+00 : f32
    %66 = vector.broadcast %cst_54 : f32 to vector<128x32xf32>
    %67 = arith.maximumf %65, %66 : vector<128x32xf32>
    %c1_55 = arith.constant 1 : index
    %c0_56 = arith.constant 0 : index
    %c0_57 = arith.constant 0 : index
    %68 = vector.load %arg12[%c1_55, %c0_56, %c0_57] : memref<4x32x256xf32, #tpu.memory_space<vmem>>, vector<1x32x256xf32>
    %69 = vector.shape_cast %68 : vector<1x32x256xf32> to vector<32x256xf32>
    %cst_58 = arith.constant dense<0.000000e+00> : vector<128x256xf32>
    %70 = tpu.matmul %67, %69, %cst_58 {dimension_numbers = #tpu.dot_dimension_numbers<[1], [0], [0], [1], [0, 0, 1, 1], [], []>} : vector<128x32xf32>, vector<32x256xf32>, vector<128x256xf32> -> vector<128x256xf32>
    %c1_59 = arith.constant 1 : index
    %c0_60 = arith.constant 0 : index
    %c0_61 = arith.constant 0 : index
    %71 = vector.load %arg13[%c1_59, %c0_60, %c0_61] : memref<4x1x256xf32, #tpu.memory_space<vmem>>, vector<1x1x256xf32>
    %72 = vector.shape_cast %71 : vector<1x1x256xf32> to vector<1x256xf32>
    %73 = vector.broadcast %72 : vector<1x256xf32> to vector<128x256xf32>
    %74 = arith.addf %70, %73 : vector<128x256xf32>
    %75 = vector.extract_strided_slice %74 {offsets = [0, 128], sizes = [128, 128], strides = [1, 1]} : vector<128x256xf32> to vector<128x128xf32>
    %76 = math.exp %75 : vector<128x128xf32>
    %77 = arith.mulf %49, %76 : vector<128x128xf32>
    %78 = vector.extract_strided_slice %74 {offsets = [0, 0], sizes = [128, 128], strides = [1, 1]} : vector<128x256xf32> to vector<128x128xf32>
    %79 = arith.addf %77, %78 : vector<128x128xf32>
    %c2 = arith.constant 2 : index
    %c0_62 = arith.constant 0 : index
    %c0_63 = arith.constant 0 : index
    %80 = vector.load %arg8[%c2, %c0_62, %c0_63] : memref<4x128x32xf32, #tpu.memory_space<vmem>>, vector<1x128x32xf32>
    %81 = vector.shape_cast %80 : vector<1x128x32xf32> to vector<128x32xf32>
    %cst_64 = arith.constant dense<0.000000e+00> : vector<128x32xf32>
    %82 = tpu.matmul %79, %81, %cst_64 {dimension_numbers = #tpu.dot_dimension_numbers<[1], [0], [0], [1], [0, 0, 1, 1], [], []>} : vector<128x128xf32>, vector<128x32xf32>, vector<128x32xf32> -> vector<128x32xf32>
    %c2_65 = arith.constant 2 : index
    %c0_66 = arith.constant 0 : index
    %c0_67 = arith.constant 0 : index
    %83 = vector.load %arg9[%c2_65, %c0_66, %c0_67] : memref<4x1x32xf32, #tpu.memory_space<vmem>>, vector<1x1x32xf32>
    %84 = vector.shape_cast %83 : vector<1x1x32xf32> to vector<1x32xf32>
    %85 = vector.broadcast %84 : vector<1x32xf32> to vector<128x32xf32>
    %86 = arith.addf %82, %85 : vector<128x32xf32>
    %cst_68 = arith.constant 0.000000e+00 : f32
    %87 = vector.broadcast %cst_68 : f32 to vector<128x32xf32>
    %88 = arith.maximumf %86, %87 : vector<128x32xf32>
    %c2_69 = arith.constant 2 : index
    %c0_70 = arith.constant 0 : index
    %c0_71 = arith.constant 0 : index
    %89 = vector.load %arg10[%c2_69, %c0_70, %c0_71] : memref<4x32x32xf32, #tpu.memory_space<vmem>>, vector<1x32x32xf32>
    %90 = vector.shape_cast %89 : vector<1x32x32xf32> to vector<32x32xf32>
    %cst_72 = arith.constant dense<0.000000e+00> : vector<128x32xf32>
    %91 = tpu.matmul %88, %90, %cst_72 {dimension_numbers = #tpu.dot_dimension_numbers<[1], [0], [0], [1], [0, 0, 1, 1], [], []>} : vector<128x32xf32>, vector<32x32xf32>, vector<128x32xf32> -> vector<128x32xf32>
    %c2_73 = arith.constant 2 : index
    %c0_74 = arith.constant 0 : index
    %c0_75 = arith.constant 0 : index
    %92 = vector.load %arg11[%c2_73, %c0_74, %c0_75] : memref<4x1x32xf32, #tpu.memory_space<vmem>>, vector<1x1x32xf32>
    %93 = vector.shape_cast %92 : vector<1x1x32xf32> to vector<1x32xf32>
    %94 = vector.broadcast %93 : vector<1x32xf32> to vector<128x32xf32>
    %95 = arith.addf %91, %94 : vector<128x32xf32>
    %cst_76 = arith.constant 0.000000e+00 : f32
    %96 = vector.broadcast %cst_76 : f32 to vector<128x32xf32>
    %97 = arith.maximumf %95, %96 : vector<128x32xf32>
    %c2_77 = arith.constant 2 : index
    %c0_78 = arith.constant 0 : index
    %c0_79 = arith.constant 0 : index
    %98 = vector.load %arg12[%c2_77, %c0_78, %c0_79] : memref<4x32x256xf32, #tpu.memory_space<vmem>>, vector<1x32x256xf32>
    %99 = vector.shape_cast %98 : vector<1x32x256xf32> to vector<32x256xf32>
    %cst_80 = arith.constant dense<0.000000e+00> : vector<128x256xf32>
    %100 = tpu.matmul %97, %99, %cst_80 {dimension_numbers = #tpu.dot_dimension_numbers<[1], [0], [0], [1], [0, 0, 1, 1], [], []>} : vector<128x32xf32>, vector<32x256xf32>, vector<128x256xf32> -> vector<128x256xf32>
    %c2_81 = arith.constant 2 : index
    %c0_82 = arith.constant 0 : index
    %c0_83 = arith.constant 0 : index
    %101 = vector.load %arg13[%c2_81, %c0_82, %c0_83] : memref<4x1x256xf32, #tpu.memory_space<vmem>>, vector<1x1x256xf32>
    %102 = vector.shape_cast %101 : vector<1x1x256xf32> to vector<1x256xf32>
    %103 = vector.broadcast %102 : vector<1x256xf32> to vector<128x256xf32>
    %104 = arith.addf %100, %103 : vector<128x256xf32>
    %105 = vector.extract_strided_slice %104 {offsets = [0, 128], sizes = [128, 128], strides = [1, 1]} : vector<128x256xf32> to vector<128x128xf32>
    %106 = math.exp %105 : vector<128x128xf32>
    %107 = arith.mulf %79, %106 : vector<128x128xf32>
    %108 = vector.extract_strided_slice %104 {offsets = [0, 0], sizes = [128, 128], strides = [1, 1]} : vector<128x256xf32> to vector<128x128xf32>
    %109 = arith.addf %107, %108 : vector<128x128xf32>
    %c3 = arith.constant 3 : index
    %c0_84 = arith.constant 0 : index
    %c0_85 = arith.constant 0 : index
    %110 = vector.load %arg8[%c3, %c0_84, %c0_85] : memref<4x128x32xf32, #tpu.memory_space<vmem>>, vector<1x128x32xf32>
    %111 = vector.shape_cast %110 : vector<1x128x32xf32> to vector<128x32xf32>
    %cst_86 = arith.constant dense<0.000000e+00> : vector<128x32xf32>
    %112 = tpu.matmul %109, %111, %cst_86 {dimension_numbers = #tpu.dot_dimension_numbers<[1], [0], [0], [1], [0, 0, 1, 1], [], []>} : vector<128x128xf32>, vector<128x32xf32>, vector<128x32xf32> -> vector<128x32xf32>
    %c3_87 = arith.constant 3 : index
    %c0_88 = arith.constant 0 : index
    %c0_89 = arith.constant 0 : index
    %113 = vector.load %arg9[%c3_87, %c0_88, %c0_89] : memref<4x1x32xf32, #tpu.memory_space<vmem>>, vector<1x1x32xf32>
    %114 = vector.shape_cast %113 : vector<1x1x32xf32> to vector<1x32xf32>
    %115 = vector.broadcast %114 : vector<1x32xf32> to vector<128x32xf32>
    %116 = arith.addf %112, %115 : vector<128x32xf32>
    %cst_90 = arith.constant 0.000000e+00 : f32
    %117 = vector.broadcast %cst_90 : f32 to vector<128x32xf32>
    %118 = arith.maximumf %116, %117 : vector<128x32xf32>
    %c3_91 = arith.constant 3 : index
    %c0_92 = arith.constant 0 : index
    %c0_93 = arith.constant 0 : index
    %119 = vector.load %arg10[%c3_91, %c0_92, %c0_93] : memref<4x32x32xf32, #tpu.memory_space<vmem>>, vector<1x32x32xf32>
    %120 = vector.shape_cast %119 : vector<1x32x32xf32> to vector<32x32xf32>
    %cst_94 = arith.constant dense<0.000000e+00> : vector<128x32xf32>
    %121 = tpu.matmul %118, %120, %cst_94 {dimension_numbers = #tpu.dot_dimension_numbers<[1], [0], [0], [1], [0, 0, 1, 1], [], []>} : vector<128x32xf32>, vector<32x32xf32>, vector<128x32xf32> -> vector<128x32xf32>
    %c3_95 = arith.constant 3 : index
    %c0_96 = arith.constant 0 : index
    %c0_97 = arith.constant 0 : index
    %122 = vector.load %arg11[%c3_95, %c0_96, %c0_97] : memref<4x1x32xf32, #tpu.memory_space<vmem>>, vector<1x1x32xf32>
    %123 = vector.shape_cast %122 : vector<1x1x32xf32> to vector<1x32xf32>
    %124 = vector.broadcast %123 : vector<1x32xf32> to vector<128x32xf32>
    %125 = arith.addf %121, %124 : vector<128x32xf32>
    %cst_98 = arith.constant 0.000000e+00 : f32
    %126 = vector.broadcast %cst_98 : f32 to vector<128x32xf32>
    %127 = arith.maximumf %125, %126 : vector<128x32xf32>
    %c3_99 = arith.constant 3 : index
    %c0_100 = arith.constant 0 : index
    %c0_101 = arith.constant 0 : index
    %128 = vector.load %arg12[%c3_99, %c0_100, %c0_101] : memref<4x32x256xf32, #tpu.memory_space<vmem>>, vector<1x32x256xf32>
    %129 = vector.shape_cast %128 : vector<1x32x256xf32> to vector<32x256xf32>
    %cst_102 = arith.constant dense<0.000000e+00> : vector<128x256xf32>
    %130 = tpu.matmul %127, %129, %cst_102 {dimension_numbers = #tpu.dot_dimension_numbers<[1], [0], [0], [1], [0, 0, 1, 1], [], []>} : vector<128x32xf32>, vector<32x256xf32>, vector<128x256xf32> -> vector<128x256xf32>
    %c3_103 = arith.constant 3 : index
    %c0_104 = arith.constant 0 : index
    %c0_105 = arith.constant 0 : index
    %131 = vector.load %arg13[%c3_103, %c0_104, %c0_105] : memref<4x1x256xf32, #tpu.memory_space<vmem>>, vector<1x1x256xf32>
    %132 = vector.shape_cast %131 : vector<1x1x256xf32> to vector<1x256xf32>
    %133 = vector.broadcast %132 : vector<1x256xf32> to vector<128x256xf32>
    %134 = arith.addf %130, %133 : vector<128x256xf32>
    %135 = vector.extract_strided_slice %134 {offsets = [0, 128], sizes = [128, 128], strides = [1, 1]} : vector<128x256xf32> to vector<128x128xf32>
    %136 = math.exp %135 : vector<128x128xf32>
    %137 = arith.mulf %109, %136 : vector<128x128xf32>
    %138 = vector.extract_strided_slice %134 {offsets = [0, 0], sizes = [128, 128], strides = [1, 1]} : vector<128x256xf32> to vector<128x128xf32>
    %139 = arith.addf %137, %138 : vector<128x128xf32>
    %cst_106 = arith.constant 2.000000e+01 : f32
    %140 = vector.broadcast %cst_106 : f32 to vector<128x128xf32>
    %141 = arith.cmpf ogt, %139, %140 : vector<128x128xf32>
    %cst_107 = arith.constant 2.000000e+01 : f32
    %142 = vector.broadcast %cst_107 : f32 to vector<128x128xf32>
    %143 = arith.minimumf %139, %142 : vector<128x128xf32>
    %144 = math.exp %143 : vector<128x128xf32>
    %cst_108 = arith.constant 1.000000e+00 : f32
    %145 = vector.broadcast %cst_108 : f32 to vector<128x128xf32>
    %146 = arith.addf %145, %144 : vector<128x128xf32>
    %147 = math.log %146 : vector<128x128xf32>
    %148 = arith.select %141, %139, %147 : vector<128x128xi1>, vector<128x128xf32>
    %c0_109 = arith.constant 0 : index
    %c0_110 = arith.constant 0 : index
    %149 = vector.load %arg14[%c0_109, %c0_110] : memref<128x128xf32, #tpu.memory_space<vmem>>, vector<128x128xf32>
    tpu.vector_store %arg14[%c0_109, %c0_110], %148 {strides = array<i32>} : memref<128x128xf32, #tpu.memory_space<vmem>>, vector<128x128xf32>,
    return
  }
  func.func @transform_0(%arg0: i32) -> (i32, i32) {
    %c0_i32 = arith.constant 0 : i32
    %c0_i32_0 = arith.constant 0 : i32
    return %arg0, %c0_i32 : i32, i32
  }
  func.func @transform_1(%arg0: i32) -> (i32, i32) {
    %c0_i32 = arith.constant 0 : i32
    %c0_i32_0 = arith.constant 0 : i32
    %c0_i32_1 = arith.constant 0 : i32
    return %c0_i32, %c0_i32_0 : i32, i32
  }
  func.func @transform_2(%arg0: i32) -> (i32, i32) {
    %c0_i32 = arith.constant 0 : i32
    %c0_i32_0 = arith.constant 0 : i32
    %c0_i32_1 = arith.constant 0 : i32
    return %c0_i32, %c0_i32_0 : i32, i32
  }
  func.func @transform_3(%arg0: i32) -> (i32, i32) {
    %c0_i32 = arith.constant 0 : i32
    %c0_i32_0 = arith.constant 0 : i32
    %c0_i32_1 = arith.constant 0 : i32
    return %c0_i32, %c0_i32_0 : i32, i32
  }
  func.func @transform_4(%arg0: i32) -> (i32, i32) {
    %c0_i32 = arith.constant 0 : i32
    %c0_i32_0 = arith.constant 0 : i32
    %c0_i32_1 = arith.constant 0 : i32
    return %c0_i32, %c0_i32_0 : i32, i32
  }
  func.func @transform_5(%arg0: i32) -> (i32, i32) {
    %c0_i32 = arith.constant 0 : i32
    %c0_i32_0 = arith.constant 0 : i32
    %c0_i32_1 = arith.constant 0 : i32
    return %c0_i32, %c0_i32_0 : i32, i32
  }
  func.func @transform_6(%arg0: i32) -> (i32, i32) {
    %c0_i32 = arith.constant 0 : i32
    %c0_i32_0 = arith.constant 0 : i32
    %c0_i32_1 = arith.constant 0 : i32
    return %c0_i32, %c0_i32_0 : i32, i32
  }
  func.func @transform_7(%arg0: i32) -> (i32, i32, i32) {
    %c0_i32 = arith.constant 0 : i32
    %c0_i32_0 = arith.constant 0 : i32
    %c0_i32_1 = arith.constant 0 : i32
    %c0_i32_2 = arith.constant 0 : i32
    return %c0_i32, %c0_i32_0, %c0_i32_1 : i32, i32, i32
  }
  func.func @transform_8(%arg0: i32) -> (i32, i32, i32) {
    %c0_i32 = arith.constant 0 : i32
    %c0_i32_0 = arith.constant 0 : i32
    %c0_i32_1 = arith.constant 0 : i32
    %c0_i32_2 = arith.constant 0 : i32
    return %c0_i32, %c0_i32_0, %c0_i32_1 : i32, i32, i32
  }
  func.func @transform_9(%arg0: i32) -> (i32, i32, i32) {
    %c0_i32 = arith.constant 0 : i32
    %c0_i32_0 = arith.constant 0 : i32
    %c0_i32_1 = arith.constant 0 : i32
    %c0_i32_2 = arith.constant 0 : i32
    return %c0_i32, %c0_i32_0, %c0_i32_1 : i32, i32, i32
  }
  func.func @transform_10(%arg0: i32) -> (i32, i32, i32) {
    %c0_i32 = arith.constant 0 : i32
    %c0_i32_0 = arith.constant 0 : i32
    %c0_i32_1 = arith.constant 0 : i32
    %c0_i32_2 = arith.constant 0 : i32
    return %c0_i32, %c0_i32_0, %c0_i32_1 : i32, i32, i32
  }
  func.func @transform_11(%arg0: i32) -> (i32, i32, i32) {
    %c0_i32 = arith.constant 0 : i32
    %c0_i32_0 = arith.constant 0 : i32
    %c0_i32_1 = arith.constant 0 : i32
    %c0_i32_2 = arith.constant 0 : i32
    return %c0_i32, %c0_i32_0, %c0_i32_1 : i32, i32, i32
  }
  func.func @transform_12(%arg0: i32) -> (i32, i32, i32) {
    %c0_i32 = arith.constant 0 : i32
    %c0_i32_0 = arith.constant 0 : i32
    %c0_i32_1 = arith.constant 0 : i32
    %c0_i32_2 = arith.constant 0 : i32
    return %c0_i32, %c0_i32_0, %c0_i32_1 : i32, i32, i32
  }
  func.func @transform_13(%arg0: i32) -> (i32, i32) {
    %c0_i32 = arith.constant 0 : i32
    %c0_i32_0 = arith.constant 0 : i32
    return %arg0, %c0_i32 : i32, i32
  }
}

</mosaic_0001>

<bundles_post_ra>
// kernel: tpu_custom_call.1
= control target key start
LH: loop header
LB: loop body
LE: loop exit
PB: predicated region body
PF: predicated region fallthrough
CT: control target
= control target key end

     0   :  { %s7154_s0 = inlined_call_operand.vmem [shape: f32[256,8], index: 0, kind: input, shape index: {}]   ;;  %s7155_s1 = inlined_call_operand.vmem [shape: f32[8,40], index: 1, kind: input, shape index: {}]   ;;  %s7156_s2 = inlined_call_operand.vmem [shape: f32[1,40], index: 2, kind: input, shape index: {}]   ;;  %s7157_s3 = inlined_call_operand.vmem [shape: f32[40,40], index: 3, kind: input, shape index: {}]   ;;  %s7158_s4 = inlined_call_operand.vmem [shape: f32[1,40], index: 4, kind: input, shape index: {}]   ;;  %s7159_s5 = inlined_call_operand.vmem [shape: f32[40,128], index: 5, kind: input, shape index: {}]   ;;  %s7160_s6 = inlined_call_operand.vmem [shape: f32[1,128], index: 6, kind: input, shape index: {}]   ;;  %s7161_s7 = inlined_call_operand.vmem [shape: f32[4,128,32], index: 7, kind: input, shape index: {}]   ;;  %s7162_s8 = inlined_call_operand.vmem [shape: f32[4,1,32], index: 8, kind: input, shape index: {}]   ;;  %s7163_s9 = inlined_call_operand.vmem [shape: f32[4,32,32], index: 9, kind: input, shape index: {}]   ;;  %s7164_s10 = inlined_call_operand.vmem [shape: f32[4,1,32], index: 10, kind: input, shape index: {}]   ;;  %s7165_s11 = inlined_call_operand.vmem [shape: f32[4,32,256], index: 11, kind: input, shape index: {}]   ;;  %s7166_s12 = inlined_call_operand.vmem [shape: f32[4,1,256], index: 12, kind: input, shape index: {}]   ;;  %s7167_s13 = inlined_call_operand.hbm [shape: f32[256,128], index: 13, kind: output, shape index: {}]  }
   0x1   :  { %7168 = sst [smem:[#allocation5_spill]] %s7154_s0 }
   0x2   :  { %7169 = sst [smem:[#allocation6_spill]] %s7155_s1 }
   0x3   :  { %7170 = sst [smem:[#allocation7_spill]] %s7156_s2 }
   0x4   :  { %18 = vsyncpa [#allocation3], 0 }
   0x5   :  { %20 = vsyncpa [#allocation3 + $0x1], 0  ;;  %s5732_s25 = smov 0   ;;  %s5734_s26 = smov 0  }
   0x6   :  { %s5736_s27 = smov 0   ;;  %s5738_s28 = smov 0  }
   0x7 LB: > { %s5753_s29 = sadd.s32 4294967295, %s5656_s28   ;;  %s4130_s30 = sadd.s32 4294967294, %s5656_s28   ;;  %s5656_s28 = sphi %s5738_s28, %s7179_s28   ;;  %s5652_s27 = sphi %s5736_s27, %s7178_s27   ;;  %s5648_s26 = sphi %s5734_s26, %s7177_s26   ;;  %s5644_s25 = sphi %s5732_s25, %s7176_s25  }
   0x8   : > { %s5757_s14 = sadd.s32 1, %s5656_s28   ;;  %s311_s15 = sadd.s32 1, %s5652_s27 }
   0x9   : > { %s308_s16 = ssub.s32 %s5656_s28, %s5757_s14  ;;  %p321_p0 = scmp.ne.s32.totalorder %s5652_s27, %s5648_s26 }
   0xa   : > { %p309_p1 = scmp.eq.s32.totalorder %s308_s16, 0  ;;  %p322_p2 = scmp.eq.s32.totalorder %s5753_s29, 1 }
   0xb   : > { %p327_p3 = scmp.ne.s32.totalorder %s5648_s26, %s5644_s25  ;;  %p328_p4 = scmp.eq.s32.totalorder %s4130_s30, 1 }
   0xc   : > { %s5768_s17 = scalar_select %p309_p1, %s5652_s27, %s311_s15  }
   0xd   : > { %p5770_p5 = por %p322_p2, %p321_p0  ;;  %p5774_p6 = por %p328_p4, %p327_p3 }
   0xe   : > { %p4133_p7 = scmp.ge.s32.totalorder %s5656_s28, 1  ;;  %p391_p8 = scmp.lt.s32.totalorder %s5656_s28, 3 }
  0x10   : > { %p392_p9 = pnand %p4133_p7, %p391_p8 }
  0x11   : > { %s7173_s1 = sld [smem:[#allocation6_spill]] (!%p392_p9)  ;;  %s4135_s22 = sshll.u32 (!%p392_p9), %s5753_s29, 4  ;;  %v676_v1 = vld [vmem:[%s7157_s3] sm:$0xff] (!%p392_p9)  ;;  %v677_v2 = vld [vmem:[%s7157_s3 + $0x8] sm:$0xff] (!%p392_p9)  ;;  %vm466_vm0 = vcmask (!%p392_p9), 64512   ;;  %v678_v20 = vld [vmem:[%s7157_s3 + $0x10] sm:$0xff] (!%p392_p9) }
  0x12   : > { %395 = sbr.rel (%p392_p9) target bundleno = 3471 (0xd8f), region = 72  ;;  %p436_p10 = scmp.lt.s32.totalorder (!%p392_p9), %s4135_s22, 31  ;;  %v5136_v3 = vpack.c.bf16 (!%p392_p9), %v677_v2, %v676_v1  ;;  %v679_v21 = vld [vmem:[%s7157_s3 + $0x18] sm:$0xff] (!%p392_p9)  ;;  %v680_v23 = vld [vmem:[%s7157_s3 + $0x20] sm:$0xff] (!%p392_p9)  ;;  %v899_v25 = vld [vmem:[%s7159_s5 + $0x8] sm:$0xff] (!%p392_p9)  ;;  %vm688_vm1 = vcmask (!%p392_p9), 326656  }
  0x13   : > { %s7174_s0 = sld [smem:[#allocation5_spill]] (!%p392_p9)  ;;  %v5140_v22 = vpack.c.bf16 (!%p392_p9), %v679_v21, %v678_v20  ;;  %v898_v24 = vld [vmem:[%s7159_s5] sm:$0xff] (!%p392_p9)  ;;  %v900_v26 = vld [vmem:[%s7159_s5 + $0x10] sm:$0xff] (!%p392_p9)  ;;  %v901_v28 = vld [vmem:[%s7159_s5 + $0x18] sm:$0xff] (!%p392_p9)  ;;  %s7175_s2 = sld [smem:[#allocation7_spill]] (!%p392_p9)  ;;  %vm1298_vm2 = vcmask (!%p392_p9), 261120  }
  0x14   : > { %5137 = vmatprep.subr.bf16.mxu1 (!%p392_p9), %v5136_v3  ;;  %v5144_v27 = vpack.c.bf16 (!%p392_p9), %v899_v25, %v898_v24  ;;  %v5148_v29 = vpack.c.bf16 (!%p392_p9), %v901_v28, %v900_v26  ;;  %v902_v30 = vld [vmem:[%s7159_s5 + $0x20] sm:$0xff] (!%p392_p9)  ;;  %v1106_v20 = vld [vmem:[%s7161_s7 + $0x18] sm:$0xff] (!%p392_p9)  ;;  %v1109_v25 = vld [vmem:[%s7161_s7 + $0x30] sm:$0xff] (!%p392_p9)  ;;  %s432_s23 = sand.u32 (!%p392_p9), 1, %s5648_s26   ;;  %s4422_s15 = sshll.u32 (!%p392_p9), %s5753_s29, 11 }
  0x15   : > { %5139 = vmatpush3.bf16.msra.mxu1 (!%p392_p9), %v5136_v3  ;;  %v1110_v26 = vld [vmem:[%s7161_s7 + $0x38] sm:$0xff] (!%p392_p9)  ;;  %v1111_v28 = vld [vmem:[%s7161_s7 + $0x40] sm:$0xff] (!%p392_p9)  ;;  %s4134_s24 = sshll.u32 (!%p392_p9), %s432_s23, 7  ;;  %s7106_s20 = scalar_lea.hbm (!%p392_p9), %s7167_s13, %s4422_s15 }
  0x16   : > { %5141 = vmatprep.subr.bf16.mxu1 (!%p392_p9), %v5140_v22  ;;  %s7005_s30 = scalar_lea.vmem (!%p392_p9), [#allocation2], %s4134_s24  ;;  %s7113_s29 = scalar_lea.sflag (!%p392_p9), [#allocation3], %s432_s23 }
  0x17   : > { %v458_v0 = vld [vmem:[%s7173_s1] sm:$0xff] (!%p392_p9)  ;;  %s5659_s21 = smov (!%p392_p9), [#allocation2]  }
  0x18   : > { %4690 = vmatprep.subr.mxu0 (!%p392_p9), %v458_v0 }
  0x19   : > { %4691 = vmatpush3.msra.mxu0 %v458_v0  ;;  %s7181_s22 = smov (!%p436_p10, %s4135_s22), 31  ;;  %5143 = vmatpush3.bf16.msra.mxu1 %v5140_v22  ;;  %v4137_v31 = vld [vmem:[%s7175_s2] ss:$0 sm:$0xff]  ;;  %s4068_s2 = sshll.u32 %s7005_s30, 4  ;;  %s7108_s2 = int_to_ptr.vmem [resolvable:$true] %s4068_s2 }
  0x1a   : > { %s4136_s16 = sshll.u32 %s7181_s22, 3  ;;  %4724 = vmatprep.subr.mxu1 %v680_v23  ;;  %5145 = vmatprep.subr.bf16.mxu0 %v5144_v27  ;;  %v1107_v22 = vld [vmem:[%s7161_s7 + $0x20] sm:$0xff]  ;;  %s5598_s22 = sshll.u32 %s5659_s21, 4  ;;  %s5599_s22 = int_to_ptr.vmem [resolvable:$false] %s5598_s22 }
  0x1b   : > { %s5793_s1 = scalar_lea.vmem %s7174_s0, %s4136_s16  ;;  %s5594_s0 = scalar_lea.vmem %s7108_s2, 2048 }
  0x1c   : > { %v442_v4 = vld [vmem:[%s5793_s1] sm:$0xff]  ;;  %v443_v5 = vld [vmem:[%s5793_s1 + $0x8] sm:$0xff]  ;;  %v444_v6 = vld [vmem:[%s5793_s1 + $0x10] sm:$0xff]  ;;  %p5595_p11 = scmp.ne.s32.totalorder %s7108_s2, %s5594_s0  ;;  %s5600_s24 = scalar_lea.vmem %s5599_s22, 4096 }
  0x1d   : > { %4692 = vmatprep.mubr.msk.f32.mxu0 %vm466_vm0, %v442_v4  ;;  %v445_v7 = vld [vmem:[%s5793_s1 + $0x18] sm:$0xff]  ;;  %v446_v8 = vld [vmem:[%s5793_s1 + $0x20] sm:$0xff]  ;;  %v447_v9 = vld [vmem:[%s5793_s1 + $0x28] sm:$0xff]  ;;  %4725 = vmatpush3.msra.mxu1 %v680_v23  ;;  %p5601_p0 = scmp.lt.s32.totalorder %s7108_s2, %s5599_s22  ;;  %p5602_p1 = scmp.lt.s32.totalorder %s5600_s24, %s5594_s0 }
  0x1e   : > { %4693 = vmatmul.mubr.msk.f32.vlgmr.msra.gmra.mrb[0].mxu0 %vm466_vm0, %v443_v5  ;;  %v448_v10 = vld [vmem:[%s5793_s1 + $0x30] sm:$0xff]  ;;  %v449_v11 = vld [vmem:[%s5793_s1 + $0x38] sm:$0xff]  ;;  %v450_v12 = vld [vmem:[%s5793_s1 + $0x40] sm:$0xff]  ;;  %p5596_p12 = pnand %p5595_p11, %p5770_p5 }
  0x1f   : > { %4695 = vmatprep.mubr.msk.f32.mxu0 %vm466_vm0, %v444_v6  ;;  %v451_v13 = vld [vmem:[%s5793_s1 + $0x48] sm:$0xff]  ;;  %v452_v14 = vld [vmem:[%s5793_s1 + $0x50] sm:$0xff]  ;;  %v453_v15 = vld [vmem:[%s5793_s1 + $0x58] sm:$0xff]  ;;  %5147 = vmatpush3.bf16.msra.mxu0 %v5144_v27  ;;  %v5894_v27 = vpack.c.bf16 %v1110_v26, %v1109_v25  ;;  %p5603_p2 = por %p5602_p1, %p5601_p0 }
  0x20   : > { %v454_v16 = vld [vmem:[%s5793_s1 + $0x60] sm:$0xff]  ;;  %v455_v17 = vld [vmem:[%s5793_s1 + $0x68] sm:$0xff]  ;;  %v456_v18 = vld [vmem:[%s5793_s1 + $0x70] sm:$0xff]  ;;  %5149 = vmatprep.subr.bf16.mxu0 %v5148_v29  ;;  %p5597_p13 = pneg %p5596_p12 }
  0x21   : > { %v457_v19 = vld [vmem:[%s5793_s1 + $0x78] sm:$0xff]  ;;  %v1108_v23 = vld [vmem:[%s7161_s7 + $0x28] sm:$0xff]  ;;  %v1287_v25 = vld [vmem:[%s7163_s9] sm:$0xff] }
  0x22   : > { %4696 = vmatmul.mubr.msk.f32.gmra.mrb[2].mxu0 %vm466_vm0, %v445_v7  ;;  %v5160_v24 = vpack.c.bf16 %v1108_v23, %v1107_v22  ;;  %v1117_v22 = vld [vmem:[%s7161_s7 + $0x70] sm:$0xff]  ;;  %v1118_v23 = vld [vmem:[%s7161_s7 + $0x78] sm:$0xff]  ;;  %v1288_v26 = vld [vmem:[%s7163_s9 + $0x8] sm:$0xff]  ;;  %p5604_p3 = pnand %p5603_p2, %p5597_p13 }
  0x23   : > { %4698 = vmatprep.mubr.msk.f32.mxu0 %vm466_vm0, %v446_v8  ;;  %5151 = vmatpush3.bf16.msra.mxu0 %v5148_v29  ;;  %v1112_v29 = vld [vmem:[%s7161_s7 + $0x48] sm:$0xff] }
  0x24   : > { %4758 = vmatprep.subr.mxu0 %v902_v30 }
  0x26   : > { %4699 = vmatmul.mubr.msk.f32.gmra.mrb[4].mxu0 %vm466_vm0, %v447_v9 }
  0x27   : > { %4701 = vmatprep.mubr.msk.f32.mxu0 %vm466_vm0, %v448_v10  ;;  %4759 = vmatpush3.msra.mxu0 %v902_v30  ;;  %v5903_v30 = vpack.c.bf16 %v1112_v29, %v1111_v28  ;;  %v4171_v28 = vld [vmem:[%s7160_s6] ss:$0 sm:$0xff] }
  0x2a   : > { %4702 = vmatmul.mubr.msk.f32.gmra.mrb[6].mxu0 %vm466_vm0, %v449_v11 }
  0x2b   : > { %4704 = vmatprep.mubr.msk.f32.mxu0 %vm466_vm0, %v450_v12 }
  0x2e   : > { %4705 = vmatmul.mubr.msk.f32.gmra.mrb[8].mxu0 %vm466_vm0, %v451_v13 }
  0x2f   : > { %4707 = vmatprep.mubr.msk.f32.mxu0 %vm466_vm0, %v452_v14 }
  0x32   : > { %4708 = vmatmul.mubr.msk.f32.gmra.mrb[10].mxu0 %vm466_vm0, %v453_v15 }
  0x33   : > { %4710 = vmatprep.mubr.msk.f32.mxu0 %vm466_vm0, %v454_v16  ;;  %v1103_v16 = vld [vmem:[%s7161_s7] sm:$0xff] }
  0x36   : > { %4711 = vmatmul.mubr.msk.f32.gmra.mrb[12].mxu0 %vm466_vm0, %v455_v17  ;;  %v1104_v17 = vld [vmem:[%s7161_s7 + $0x8] sm:$0xff] }
  0x37   : > { %4713 = vmatprep.mubr.msk.f32.mxu0 %vm466_vm0, %v456_v18  ;;  %v1105_v18 = vld [vmem:[%s7161_s7 + $0x10] sm:$0xff] }
  0x38   : > { %v5156_v21 = vpack.c.bf16 %v1106_v20, %v1105_v18 }
  0x3a   : > { %4714 = vmatmul.mubr.msk.f32.gmra.mrb[14].mxu0 %vm466_vm0, %v457_v19  ;;  %v5152_v19 = vpack.c.bf16 %v1104_v17, %v1103_v16 }
  0x3c   : > { %5153 = vmatprep.subr.bf16.mxu0 %v5152_v19  ;;  %5344 = vmatprep.subr.bf16.mxu1 %v5152_v19 }
  0xf1   : > { %v4694_v32 = vpop.f32.mrb[0].mxu0 }
  0xf2   : > { %v587_v33 = vadd.f32 %v4694_v32, %v4137_v31  ;;  %v581_v34 = vpop.f32.mrb[1].mxu0  ;;  %v1114_v32 = vld [vmem:[%s7161_s7 + $0x58] sm:$0xff] }
  0xf3   : > { %v582_v35 = vadd.f32 %v4137_v31, %v581_v34  ;;  %v1115_v34 = vld [vmem:[%s7161_s7 + $0x60] sm:$0xff] }
  0xf4   : > { %v661_v38 = vmax.f32 %v587_v33, 0.0 }
  0xf5   : > { %v660_v36 = vmax.f32 %v582_v35, 0.0  ;;  %v4697_v37 = vpop.f32.mrb[2].mxu0  ;;  %v1116_v35 = vld [vmem:[%s7161_s7 + $0x68] sm:$0xff] }
  0xf6   : > { %v597_v39 = vadd.f32 %v4697_v37, %v4137_v31  ;;  %v591_v40 = vpop.f32.mrb[3].mxu0  ;;  %v5931_v37 = vld [vmem:[%s7158_s4] ss:$0 sm:$0xff] }
  0xf7   : > { %v592_v41 = vadd.f32 %v4137_v31, %v591_v40  ;;  %4726 = vmatprep.mubr.msk.f32.mxu1 %vm688_vm1, %v660_v36  ;;  %v5923_v36 = vpack.c.bf16 %v1116_v35, %v1115_v34 }
  0xf8   : > { %v663_v42 = vmax.f32 %v597_v39, 0.0  ;;  %4727 = vmatmul.mubr.msk.f32.vlgmr.msra.gmra.mrb[0].mxu1 %vm688_vm1, %v661_v38 }
  0xf9   : > { %v662_v43 = vmax.f32 %v592_v41, 0.0  ;;  %v4700_v44 = vpop.f32.mrb[4].mxu0  ;;  %5352 = vmatpush3.bf16.msra.mxu1 %v5152_v19 }
  0xfa   : > { %v607_v45 = vadd.f32 %v4700_v44, %v4137_v31  ;;  %v601_v46 = vpop.f32.mrb[5].mxu0  ;;  %5345 = vmatprep.subr.bf16.mxu1 %v5156_v21 }
  0xfb   : > { %v602_v47 = vadd.f32 %v4137_v31, %v601_v46  ;;  %4729 = vmatprep.mubr.msk.f32.mxu1 %vm688_vm1, %v662_v43 }
  0xfc   : > { %v665_v48 = vmax.f32 %v607_v45, 0.0  ;;  %4730 = vmatmul.mubr.msk.f32.gmra.mrb[2].mxu1 %vm688_vm1, %v663_v42 }
  0xfd   : > { %v664_v49 = vmax.f32 %v602_v47, 0.0  ;;  %v4703_v50 = vpop.f32.mrb[6].mxu0  ;;  %5353 = vmatpush3.bf16.msra.mxu1 %v5156_v21 }
  0xfe   : > { %v617_v51 = vadd.f32 %v4703_v50, %v4137_v31  ;;  %v611_v52 = vpop.f32.mrb[7].mxu0  ;;  %5346 = vmatprep.subr.bf16.mxu1 %v5160_v24 }
  0xff   : > { %4732 = vmatprep.mubr.msk.f32.mxu1 %vm688_vm1, %v664_v49  ;;  %v612_v53 = vadd.f32 %v4137_v31, %v611_v52 }
 0x100   : > { %v667_v54 = vmax.f32 %v617_v51, 0.0  ;;  %4733 = vmatmul.mubr.msk.f32.gmra.mrb[4].mxu1 %vm688_vm1, %v665_v48 }
 0x101   : > { %v666_v55 = vmax.f32 %v612_v53, 0.0  ;;  %v4706_v56 = vpop.f32.mrb[8].mxu0  ;;  %5354 = vmatpush3.bf16.msra.mxu1 %v5160_v24 }
 0x102   : > { %v627_v57 = vadd.f32 %v4706_v56, %v4137_v31  ;;  %v621_v58 = vpop.f32.mrb[9].mxu0  ;;  %5347 = vmatprep.subr.bf16.mxu1 %v5894_v27 }
 0x103   : > { %4735 = vmatprep.mubr.msk.f32.mxu1 %vm688_vm1, %v666_v55  ;;  %v622_v59 = vadd.f32 %v4137_v31, %v621_v58 }
 0x104   : > { %4736 = vmatmul.mubr.msk.f32.gmra.mrb[6].mxu1 %vm688_vm1, %v667_v54  ;;  %v669_v60 = vmax.f32 %v627_v57, 0.0 }
 0x105   : > { %v668_v61 = vmax.f32 %v622_v59, 0.0  ;;  %v4709_v62 = vpop.f32.mrb[10].mxu0  ;;  %5355 = vmatpush3.bf16.msra.mxu1 %v5894_v27 }
 0x106   : > { %v637_v63 = vadd.f32 %v4709_v62, %v4137_v31  ;;  %v631_v0 = vpop.f32.mrb[11].mxu0  ;;  %5348 = vmatprep.subr.bf16.mxu1 %v5903_v30 }
 0x107   : > { %4738 = vmatprep.mubr.msk.f32.mxu1 %vm688_vm1, %v668_v61  ;;  %v632_v1 = vadd.f32 %v4137_v31, %v631_v0 }
 0x108   : > { %4739 = vmatmul.mubr.msk.f32.gmra.mrb[8].mxu1 %vm688_vm1, %v669_v60  ;;  %v671_v2 = vmax.f32 %v637_v63, 0.0 }
 0x109   : > { %v670_v3 = vmax.f32 %v632_v1, 0.0  ;;  %v4712_v4 = vpop.f32.mrb[12].mxu0  ;;  %5356 = vmatpush3.bf16.msra.mxu1 %v5903_v30 }
 0x10a   : > { %v647_v5 = vadd.f32 %v4712_v4, %v4137_v31  ;;  %v641_v6 = vpop.f32.mrb[13].mxu0 }
 0x10b   : > { %4741 = vmatprep.mubr.msk.f32.mxu1 %vm688_vm1, %v670_v3  ;;  %v642_v7 = vadd.f32 %v4137_v31, %v641_v6 }
 0x10c   : > { %4742 = vmatmul.mubr.msk.f32.gmra.mrb[10].mxu1 %vm688_vm1, %v671_v2  ;;  %v673_v8 = vmax.f32 %v647_v5, 0.0 }
 0x10d   : > { %v672_v9 = vmax.f32 %v642_v7, 0.0  ;;  %v4715_v10 = vpop.f32.mrb[14].mxu0 }
 0x10e   : > { %v657_v11 = vadd.f32 %v4715_v10, %v4137_v31  ;;  %v651_v12 = vpop.f32.mrb[15].mxu0 }
 0x10f   : > { %4744 = vmatprep.mubr.msk.f32.mxu1 %vm688_vm1, %v672_v9  ;;  %v652_v13 = vadd.f32 %v4137_v31, %v651_v12  ;;  %v1113_v31 = vld [vmem:[%s7161_s7 + $0x50] sm:$0xff] }
 0x110   : > { %4745 = vmatmul.mubr.msk.f32.gmra.mrb[12].mxu1 %vm688_vm1, %v673_v8  ;;  %v675_v14 = vmax.f32 %v657_v11, 0.0  ;;  %v5913_v33 = vpack.c.bf16 %v1114_v32, %v1113_v31  ;;  %v1290_v31 = vld [vmem:[%s7163_s9 + $0x18] sm:$0xff] }
 0x111   : > { %v674_v15 = vmax.f32 %v652_v13, 0.0 }
 0x112   : > { %5349 = vmatprep.subr.bf16.mxu1 %v5913_v33 }
 0x113   : > { %4747 = vmatprep.mubr.msk.f32.mxu1 %vm688_vm1, %v674_v15  ;;  %5357 = vmatpush3.bf16.msra.mxu1 %v5913_v33 }
 0x114   : > { %4748 = vmatmul.mubr.msk.f32.gmra.mrb[14].mxu1 %vm688_vm1, %v675_v14  ;;  %5350 = vmatprep.subr.bf16.mxu1 %v5923_v36 }
 0x117   : > { %5358 = vmatpush3.bf16.msra.mxu1 %v5923_v36 }
 0x1cb   : > { %v4728_v38 = vpop.f32.mrb[0].mxu1 }
 0x1cc   : > { %v809_v39 = vadd.f32 %v4728_v38, %v5931_v37  ;;  %v803_v40 = vpop.f32.mrb[1].mxu1 }
 0x1cd   : > { %v804_v41 = vadd.f32 %v5931_v37, %v803_v40 }
 0x1ce   : > { %v883_v44 = vmax.f32 %v809_v39, 0.0 }
 0x1cf   : > { %v882_v42 = vmax.f32 %v804_v41, 0.0  ;;  %v4731_v43 = vpop.f32.mrb[2].mxu1 }
 0x1d0   : > { %v819_v45 = vadd.f32 %v4731_v43, %v5931_v37  ;;  %v813_v46 = vpop.f32.mrb[3].mxu1 }
 0x1d1   : > { %v814_v47 = vadd.f32 %v5931_v37, %v813_v46  ;;  %4760 = vmatprep.mubr.msk.f32.mxu0 %vm688_vm1, %v882_v42 }
 0x1d2   : > { %v885_v48 = vmax.f32 %v819_v45, 0.0  ;;  %4761 = vmatmul.mubr.msk.f32.vlgmr.msra.gmra.mrb[16].mxu0 %vm688_vm1, %v883_v44 }
 0x1d3   : > { %v884_v49 = vmax.f32 %v814_v47, 0.0  ;;  %v4734_v50 = vpop.f32.mrb[4].mxu1  ;;  %5155 = vmatpush3.bf16.msra.mxu0 %v5152_v19 }
 0x1d4   : > { %v829_v51 = vadd.f32 %v4734_v50, %v5931_v37  ;;  %v823_v52 = vpop.f32.mrb[5].mxu1  ;;  %5157 = vmatprep.subr.bf16.mxu0 %v5156_v21 }
 0x1d5   : > { %v824_v53 = vadd.f32 %v5931_v37, %v823_v52  ;;  %4763 = vmatprep.mubr.msk.f32.mxu0 %vm688_vm1, %v884_v49 }
 0x1d6   : > { %v887_v54 = vmax.f32 %v829_v51, 0.0  ;;  %4764 = vmatmul.mubr.msk.f32.gmra.mrb[18].mxu0 %vm688_vm1, %v885_v48 }
 0x1d7   : > { %v886_v55 = vmax.f32 %v824_v53, 0.0  ;;  %v4737_v56 = vpop.f32.mrb[6].mxu1  ;;  %5159 = vmatpush3.bf16.msra.mxu0 %v5156_v21 }
 0x1d8   : > { %v839_v57 = vadd.f32 %v4737_v56, %v5931_v37  ;;  %v833_v58 = vpop.f32.mrb[7].mxu1  ;;  %5161 = vmatprep.subr.bf16.mxu0 %v5160_v24 }
 0x1d9   : > { %4766 = vmatprep.mubr.msk.f32.mxu0 %vm688_vm1, %v886_v55  ;;  %v834_v59 = vadd.f32 %v5931_v37, %v833_v58 }
 0x1da   : > { %v889_v60 = vmax.f32 %v839_v57, 0.0  ;;  %4767 = vmatmul.mubr.msk.f32.gmra.mrb[20].mxu0 %vm688_vm1, %v887_v54 }
 0x1db   : > { %v888_v61 = vmax.f32 %v834_v59, 0.0  ;;  %v4740_v62 = vpop.f32.mrb[8].mxu1  ;;  %5163 = vmatpush3.bf16.msra.mxu0 %v5160_v24  ;;  %v5180_v24 = vpack.c.bf16 %v1118_v23, %v1117_v22 }
 0x1dc   : > { %v849_v63 = vadd.f32 %v4740_v62, %v5931_v37  ;;  %v843_v0 = vpop.f32.mrb[9].mxu1  ;;  %5165 = vmatprep.subr.bf16.mxu0 %v5894_v27 }
 0x1dd   : > { %4769 = vmatprep.mubr.msk.f32.mxu0 %vm688_vm1, %v888_v61  ;;  %v844_v1 = vadd.f32 %v5931_v37, %v843_v0  ;;  %5351 = vmatprep.subr.bf16.mxu1 %v5180_v24  ;;  %v1509_v0 = vld [vmem:[%s7165_s11 + $0x8] sm:$0xff] }
 0x1de   : > { %4770 = vmatmul.mubr.msk.f32.gmra.mrb[22].mxu0 %vm688_vm1, %v889_v60  ;;  %v891_v2 = vmax.f32 %v849_v63, 0.0  ;;  %5359 = vmatpush3.bf16.msra.mxu1 %v5180_v24 }
 0x1df   : > { %v890_v3 = vmax.f32 %v844_v1, 0.0  ;;  %v4743_v4 = vpop.f32.mrb[10].mxu1  ;;  %5167 = vmatpush3.bf16.msra.mxu0 %v5894_v27  ;;  %v5184_v27 = vpack.c.bf16 %v1288_v26, %v1287_v25  ;;  %v1511_v1 = vld [vmem:[%s7165_s11 + $0x18] sm:$0xff] }
 0x1e0   : > { %v859_v5 = vadd.f32 %v4743_v4, %v5931_v37  ;;  %v853_v6 = vpop.f32.mrb[11].mxu1  ;;  %5169 = vmatprep.subr.bf16.mxu0 %v5903_v30  ;;  %v1510_v4 = vld [vmem:[%s7165_s11 + $0x10] sm:$0xff] }
 0x1e1   : > { %4772 = vmatprep.mubr.msk.f32.mxu0 %vm688_vm1, %v890_v3  ;;  %v854_v7 = vadd.f32 %v5931_v37, %v853_v6  ;;  %v5192_v3 = vpack.c.bf16 %v1511_v1, %v1509_v0  ;;  %v1515_v6 = vld [vmem:[%s7165_s11 + $0x38] sm:$0xff] }
 0x1e2   : > { %4773 = vmatmul.mubr.msk.f32.gmra.mrb[24].mxu0 %vm688_vm1, %v891_v2  ;;  %v893_v8 = vmax.f32 %v859_v5, 0.0  ;;  %v1508_v2 = vld [vmem:[%s7165_s11] sm:$0xff]  ;;  %v1513_v5 = vld [vmem:[%s7165_s11 + $0x28] sm:$0xff] }
 0x1e3   : > { %v892_v9 = vmax.f32 %v854_v7, 0.0  ;;  %v4746_v10 = vpop.f32.mrb[12].mxu1  ;;  %5171 = vmatpush3.bf16.msra.mxu0 %v5903_v30  ;;  %v1289_v30 = vld [vmem:[%s7163_s9 + $0x10] sm:$0xff]  ;;  %v5194_v7 = vpack.c.bf16 %v1510_v4, %v1508_v2  ;;  %5193 = vmatprep.subr.bf16.mxu1 %v5192_v3 }
 0x1e4   : > { %v869_v11 = vadd.f32 %v4746_v10, %v5931_v37  ;;  %v863_v12 = vpop.f32.mrb[13].mxu1  ;;  %5173 = vmatprep.subr.bf16.mxu0 %v5913_v33  ;;  %v5188_v35 = vpack.c.bf16 %v1290_v31, %v1289_v30 }
 0x1e5   : > { %4775 = vmatprep.mubr.msk.f32.mxu0 %vm688_vm1, %v892_v9  ;;  %v864_v13 = vadd.f32 %v5931_v37, %v863_v12  ;;  %v4188_v9 = vld [vmem:[%s7162_s8] ss:$0 sm:$0xff] }
 0x1e6   : > { %4776 = vmatmul.mubr.msk.f32.gmra.mrb[26].mxu0 %vm688_vm1, %v893_v8  ;;  %v895_v14 = vmax.f32 %v869_v11, 0.0  ;;  %v5196_v8 = vpack.c.bf16 %v1515_v6, %v1513_v5 }
 0x1e7   : > { %v894_v15 = vmax.f32 %v864_v13, 0.0  ;;  %v4749_v16 = vpop.f32.mrb[14].mxu1  ;;  %5175 = vmatpush3.bf16.msra.mxu0 %v5913_v33 }
 0x1e8   : > { %v879_v17 = vadd.f32 %v4749_v16, %v5931_v37  ;;  %v873_v18 = vpop.f32.mrb[15].mxu1  ;;  %5177 = vmatprep.subr.bf16.mxu0 %v5923_v36 }
 0x1e9   : > { %4778 = vmatprep.mubr.msk.f32.mxu0 %vm688_vm1, %v894_v15  ;;  %v874_v19 = vadd.f32 %v5931_v37, %v873_v18 }
 0x1ea   : > { %4779 = vmatmul.mubr.msk.f32.gmra.mrb[28].mxu0 %vm688_vm1, %v895_v14  ;;  %v897_v20 = vmax.f32 %v879_v17, 0.0 }
 0x1eb   : > { %v896_v21 = vmax.f32 %v874_v19, 0.0  ;;  %5179 = vmatpush3.bf16.msra.mxu0 %v5923_v36 }
 0x1ec   : > { %5181 = vmatprep.subr.bf16.mxu0 %v5180_v24 }
 0x1ed   : > { %4781 = vmatprep.mubr.msk.f32.mxu0 %vm688_vm1, %v896_v21 }
 0x1ee   : > { %4782 = vmatmul.mubr.msk.f32.gmra.mrb[30].mxu0 %vm688_vm1, %v897_v20 }
 0x1ef   : > { %5183 = vmatpush3.bf16.msra.mxu0 %v5180_v24 }
 0x1f0   : > { %5185 = vmatprep.subr.bf16.mxu0 %v5184_v27 }
 0x2a5   : > { %v4762_v29 = vpop.f32.mrb[16].mxu0 }
 0x2a6   : > { %v1024_v32 = vpop.f32.mrb[17].mxu0  ;;  %v5996_v34 = vadd.f32 %v4762_v29, %v4171_v28 }
 0x2a7   : > { %v5994_v33 = vadd.f32 %v4171_v28, %v1024_v32 }
 0x2a9   : > { %v4765_v36 = vpop.f32.mrb[18].mxu0  ;;  %4816 = vmatprep.mubr.f32.mxu0 %v5994_v33 }
 0x2aa   : > { %v1034_v37 = vpop.f32.mrb[19].mxu0  ;;  %4817 = vmatmul.mubr.f32.vlgmr.msra.gmra.mrb[32].mxu0 %v5996_v34  ;;  %v6002_v39 = vadd.f32 %v4765_v36, %v4171_v28 }
 0x2ab   : > { %v6000_v38 = vadd.f32 %v4171_v28, %v1034_v37  ;;  %5187 = vmatpush3.bf16.msra.mxu0 %v5184_v27 }
 0x2ac   : > { %5189 = vmatprep.subr.bf16.mxu0 %v5188_v35 }
 0x2ad   : > { %v4768_v40 = vpop.f32.mrb[20].mxu0  ;;  %4819 = vmatprep.mubr.f32.mxu0 %v6000_v38 }
 0x2ae   : > { %v6005_v41 = vadd.f32 %v4768_v40, %v4171_v28  ;;  %v1044_v42 = vpop.f32.mrb[21].mxu0  ;;  %4820 = vmatmul.mubr.f32.gmra.mrb[34].mxu0 %v6002_v39 }
 0x2af   : > { %v6008_v43 = vadd.f32 %v4171_v28, %v1044_v42  ;;  %5191 = vmatpush3.bf16.msra.mxu0 %v5188_v35 }
 0x2b1   : > { %4822 = vmatprep.mubr.f32.mxu0 %v6008_v43  ;;  %v4771_v44 = vpop.f32.mrb[22].mxu0 }
 0x2b2   : > { %4823 = vmatmul.mubr.f32.gmra.mrb[36].mxu0 %v6005_v41  ;;  %v6012_v45 = vadd.f32 %v4771_v44, %v4171_v28  ;;  %v1054_v46 = vpop.f32.mrb[23].mxu0 }
 0x2b3   : > { %v6014_v47 = vadd.f32 %v4171_v28, %v1054_v46 }
 0x2b5   : > { %4825 = vmatprep.mubr.f32.mxu0 %v6014_v47  ;;  %v4774_v48 = vpop.f32.mrb[24].mxu0 }
 0x2b6   : > { %4826 = vmatmul.mubr.f32.gmra.mrb[38].mxu0 %v6012_v45  ;;  %v6018_v49 = vadd.f32 %v4774_v48, %v4171_v28  ;;  %v1064_v50 = vpop.f32.mrb[25].mxu0 }
 0x2b7   : > { %v6020_v51 = vadd.f32 %v4171_v28, %v1064_v50 }
 0x2b9   : > { %4828 = vmatprep.mubr.f32.mxu0 %v6020_v51  ;;  %v4777_v52 = vpop.f32.mrb[26].mxu0 }
 0x2ba   : > { %4829 = vmatmul.mubr.f32.gmra.mrb[40].mxu0 %v6018_v49  ;;  %v6024_v53 = vadd.f32 %v4777_v52, %v4171_v28  ;;  %v1074_v54 = vpop.f32.mrb[27].mxu0 }
 0x2bb   : > { %v6026_v55 = vadd.f32 %v4171_v28, %v1074_v54 }
 0x2bd   : > { %4831 = vmatprep.mubr.f32.mxu1 %v6026_v55  ;;  %v4780_v56 = vpop.f32.mrb[28].mxu0 }
 0x2be   : > { %4832 = vmatmul.mubr.f32.vlgmr.msra.gmra.mrb[16].mxu1 %v6024_v53  ;;  %v6030_v57 = vadd.f32 %v4780_v56, %v4171_v28  ;;  %v1084_v58 = vpop.f32.mrb[29].mxu0 }
 0x2bf   : > { %v6032_v59 = vadd.f32 %v4171_v28, %v1084_v58  ;;  %5195 = vmatpush1.bf16.msra.mxu1 %v5194_v7 }
 0x2c0   : > { %5197 = vmatprep.subr.bf16.mxu1 %v5196_v8 }
 0x2c1   : > { %4834 = vmatprep.mubr.f32.mxu1 %v6032_v59  ;;  %v4783_v60 = vpop.f32.mrb[30].mxu0 }
 0x2c2   : > { %4835 = vmatmul.mubr.f32.gmra.mrb[18].mxu1 %v6030_v57  ;;  %v6036_v61 = vadd.f32 %v4783_v60, %v4171_v28  ;;  %v1094_v62 = vpop.f32.mrb[31].mxu0 }
 0x2c3   : > { %v6038_v63 = vadd.f32 %v4171_v28, %v1094_v62 }
 0x2c5   : > { %4837 = vmatprep.mubr.f32.mxu1 %v6038_v63 }
 0x2c6   : > { %4838 = vmatmul.mubr.f32.gmra.mrb[20].mxu1 %v6036_v61 }
 0x37d   : > { %v4818_v10 = vpop.f32.mrb[32].mxu0 }
 0x37e   : > { %v1198_v11 = vadd.f32 %v4818_v10, %v4188_v9  ;;  %v1192_v12 = vpop.f32.mrb[33].mxu0 }
 0x37f   : > { %v1193_v13 = vadd.f32 %v4188_v9, %v1192_v12  ;;  %v1514_v12 = vld [vmem:[%s7165_s11 + $0x30] sm:$0xff] }
 0x380   : > { %v1272_v16 = vmax.f32 %v1198_v11, 0.0  ;;  %v1512_v11 = vld [vmem:[%s7165_s11 + $0x20] sm:$0xff] }
 0x381   : > { %v1271_v14 = vmax.f32 %v1193_v13, 0.0  ;;  %v4821_v15 = vpop.f32.mrb[34].mxu0  ;;  %v5198_v13 = vpack.c.bf16 %v1514_v12, %v1512_v11 }
 0x382   : > { %v1208_v17 = vadd.f32 %v4821_v15, %v4188_v9  ;;  %v1202_v18 = vpop.f32.mrb[35].mxu0  ;;  %v4223_v15 = vld [vmem:[%s7161_s7 + $0x88] sm:$0xff] }
 0x383   : > { %v1203_v19 = vadd.f32 %v4188_v9, %v1202_v18  ;;  %4848 = vmatprep.mubr.msk.f32.mxu0 %vm1298_vm2, %v1271_v14  ;;  %5199 = vmatpush1.bf16.msra.mxu1 %v5198_v13  ;;  %v5658_v14 = vmov 0.0   ;;  %v4225_v18 = vld [vmem:[%s7161_s7 + $0x98] sm:$0xff] }
 0x384   : > { %4849 = vmatmul.mubr.msk.f32.vlgmr.msra.gmra.mrb[42].mxu0 %vm1298_vm2, %v1272_v16  ;;  %v1274_v22 = vmax.f32 %v1208_v17, 0.0  ;;  %1640 = vmatprep.mubr.f32.mxu1 %v5658_v14  ;;  %v4224_v16 = vld [vmem:[%s7161_s7 + $0x90] sm:$0xff] }
 0x385   : > { %v1273_v20 = vmax.f32 %v1203_v19, 0.0  ;;  %v4824_v21 = vpop.f32.mrb[36].mxu0  ;;  %v5204_v19 = vpack.c.bf16 %v4225_v18, %v4224_v16 }
 0x386   : > { %v1218_v23 = vadd.f32 %v4824_v21, %v4188_v9  ;;  %v1212_v24 = vpop.f32.mrb[37].mxu0 }
 0x387   : > { %v1213_v25 = vadd.f32 %v4188_v9, %v1212_v24  ;;  %4851 = vmatprep.mubr.msk.f32.mxu0 %vm1298_vm2, %v1273_v20  ;;  %v6101_v20 = vld [vmem:[%s7164_s10] ss:$0 sm:$0xff] }
 0x388   : > { %v1276_v26 = vmax.f32 %v1218_v23, 0.0  ;;  %4852 = vmatmul.mubr.msk.f32.gmra.mrb[44].mxu0 %vm1298_vm2, %v1274_v22 }
 0x389   : > { %v1275_v27 = vmax.f32 %v1213_v25, 0.0  ;;  %v4827_v28 = vpop.f32.mrb[38].mxu0 }
 0x38a   : > { %v1228_v29 = vadd.f32 %v4827_v28, %v4188_v9  ;;  %v1222_v30 = vpop.f32.mrb[39].mxu0 }
 0x38b   : > { %4854 = vmatprep.mubr.msk.f32.mxu0 %vm1298_vm2, %v1275_v27  ;;  %v1223_v31 = vadd.f32 %v4188_v9, %v1222_v30 }
 0x38c   : > { %v1278_v32 = vmax.f32 %v1228_v29, 0.0  ;;  %4855 = vmatmul.mubr.msk.f32.gmra.mrb[46].mxu0 %vm1298_vm2, %v1276_v26 }
 0x38d   : > { %v1277_v35 = vmax.f32 %v1223_v31, 0.0  ;;  %v4830_v36 = vpop.f32.mrb[40].mxu0 }
 0x38e   : > { %v1238_v37 = vadd.f32 %v4830_v36, %v4188_v9  ;;  %v1232_v40 = vpop.f32.mrb[41].mxu0 }
 0x38f   : > { %4857 = vmatprep.mubr.msk.f32.mxu0 %vm1298_vm2, %v1277_v35  ;;  %v1233_v42 = vadd.f32 %v4188_v9, %v1232_v40 }
 0x390   : > { %4858 = vmatmul.mubr.msk.f32.gmra.mrb[48].mxu0 %vm1298_vm2, %v1278_v32  ;;  %v1280_v44 = vmax.f32 %v1238_v37, 0.0 }
 0x391   : > { %v1279_v46 = vmax.f32 %v1233_v42, 0.0  ;;  %v4833_v48 = vpop.f32.mrb[16].mxu1 }
 0x392   : > { %v1248_v50 = vadd.f32 %v4833_v48, %v4188_v9  ;;  %v1242_v52 = vpop.f32.mrb[17].mxu1 }
 0x393   : > { %4860 = vmatprep.mubr.msk.f32.mxu0 %vm1298_vm2, %v1279_v46  ;;  %v1243_v54 = vadd.f32 %v4188_v9, %v1242_v52 }
 0x394   : > { %4861 = vmatmul.mubr.msk.f32.gmra.mrb[50].mxu0 %vm1298_vm2, %v1280_v44  ;;  %v1282_v56 = vmax.f32 %v1248_v50, 0.0 }
 0x395   : > { %v1281_v58 = vmax.f32 %v1243_v54, 0.0  ;;  %v4836_v60 = vpop.f32.mrb[18].mxu1 }
 0x396   : > { %v1258_v62 = vadd.f32 %v4836_v60, %v4188_v9  ;;  %v1252_v0 = vpop.f32.mrb[19].mxu1 }
 0x397   : > { %4863 = vmatprep.mubr.msk.f32.mxu0 %vm1298_vm2, %v1281_v58  ;;  %v1253_v1 = vadd.f32 %v4188_v9, %v1252_v0 }
 0x398   : > { %4864 = vmatmul.mubr.msk.f32.gmra.mrb[52].mxu0 %vm1298_vm2, %v1282_v56  ;;  %v1284_v2 = vmax.f32 %v1258_v62, 0.0 }
 0x399   : > { %v1283_v3 = vmax.f32 %v1253_v1, 0.0  ;;  %v4839_v4 = vpop.f32.mrb[20].mxu1 }
 0x39a   : > { %v1268_v5 = vadd.f32 %v4839_v4, %v4188_v9  ;;  %v1262_v6 = vpop.f32.mrb[21].mxu1 }
 0x39b   : > { %4866 = vmatprep.mubr.msk.f32.mxu0 %vm1298_vm2, %v1283_v3  ;;  %v1263_v7 = vadd.f32 %v4188_v9, %v1262_v6  ;;  %v4222_v9 = vld [vmem:[%s7161_s7 + $0x80] sm:$0xff] }
 0x39c   : > { %4867 = vmatmul.mubr.msk.f32.gmra.mrb[54].mxu0 %vm1298_vm2, %v1284_v2  ;;  %v1286_v8 = vmax.f32 %v1268_v5, 0.0  ;;  %v5200_v17 = vpack.c.bf16 %v4223_v15, %v4222_v9 }
 0x39d   : > { %v1285_v10 = vmax.f32 %v1263_v7, 0.0 }
 0x39e   : > { %5201 = vmatprep.subr.bf16.mxu0 %v5200_v17 }
 0x39f   : > { %4869 = vmatprep.mubr.msk.f32.mxu0 %vm1298_vm2, %v1285_v10  ;;  %5203 = vmatpush3.bf16.msra.mxu0 %v5200_v17 }
 0x3a0   : > { %4870 = vmatmul.mubr.msk.f32.gmra.mrb[56].mxu0 %vm1298_vm2, %v1286_v8  ;;  %5205 = vmatprep.subr.bf16.mxu0 %v5204_v19 }
 0x3a3   : > { %5207 = vmatpush3.bf16.msra.mxu0 %v5204_v19 }
 0x457   : > { %v4850_v21 = vpop.f32.mrb[42].mxu0 }
 0x458   : > { %v1413_v22 = vpop.f32.mrb[43].mxu0  ;;  %v1419_v24 = vadd.f32 %v4850_v21, %v6101_v20 }
 0x459   : > { %v1414_v23 = vadd.f32 %v6101_v20, %v1413_v22 }
 0x45a   : > { %v1493_v28 = vmax.f32 %v1419_v24, 0.0  ;;  %v4227_v24 = vld [vmem:[%s7161_s7 + $0xa8] sm:$0xff] }
 0x45b   : > { %v1492_v25 = vmax.f32 %v1414_v23, 0.0  ;;  %v4853_v26 = vpop.f32.mrb[44].mxu0  ;;  %v4226_v23 = vld [vmem:[%s7161_s7 + $0xa0] sm:$0xff] }
 0x45c   : > { %v1423_v27 = vpop.f32.mrb[45].mxu0  ;;  %v1429_v32 = vadd.f32 %v4853_v26, %v6101_v20  ;;  %v4229_v26 = vld [vmem:[%s7161_s7 + $0xb8] sm:$0xff] }
 0x45d   : > { %4206 = vmatmul.mubr.msk.f32.vlgmr.msra.gmra.mrb[22].mxu1 %vm1298_vm2, %v1492_v25  ;;  %v1424_v29 = vadd.f32 %v6101_v20, %v1423_v27  ;;  %v5208_v25 = vpack.c.bf16 %v4227_v24, %v4226_v23 }
 0x45e   : > { %1646 = vmatprep.mubr.f32.mxu1 %v5658_v14  ;;  %v1495_v40 = vmax.f32 %v1429_v32, 0.0  ;;  %v4233_v32 = vld [vmem:[%s7161_s7 + $0xd8] sm:$0xff] }
 0x45f   : > { %v4856_v30 = vpop.f32.mrb[46].mxu0  ;;  %v1494_v35 = vmax.f32 %v1424_v29, 0.0  ;;  %5209 = vmatprep.subr.bf16.mxu0 %v5208_v25  ;;  %v4231_v29 = vld [vmem:[%s7161_s7 + $0xc8] sm:$0xff] }
 0x460   : > { %v1433_v31 = vpop.f32.mrb[47].mxu0  ;;  %v1439_v48 = vadd.f32 %v4856_v30, %v6101_v20  ;;  %5211 = vmatpush3.bf16.msra.mxu0 %v5208_v25 }
 0x461   : > { %4207 = vmatmul.mubr.msk.f32.gmra.mrb[24].mxu1 %vm1298_vm2, %v1493_v28  ;;  %v1434_v42 = vadd.f32 %v6101_v20, %v1433_v31  ;;  %v4230_v28 = vld [vmem:[%s7161_s7 + $0xc0] sm:$0xff]  ;;  %v4232_v31 = vld [vmem:[%s7161_s7 + $0xd0] sm:$0xff] }
 0x462   : > { %1652 = vmatprep.mubr.f32.mxu1 %v5658_v14  ;;  %v1497_v56 = vmax.f32 %v1439_v48, 0.0  ;;  %v5216_v30 = vpack.c.bf16 %v4231_v29, %v4230_v28  ;;  %v4240_v48 = vld [vmem:[%s7163_s9 + $0x20] sm:$0xff]  ;;  %v4242_v29 = vld [vmem:[%s7163_s9 + $0x30] sm:$0xff] }
 0x463   : > { %v4859_v36 = vpop.f32.mrb[48].mxu0  ;;  %v1496_v50 = vmax.f32 %v1434_v42, 0.0  ;;  %v4236_v42 = vld [vmem:[%s7161_s7 + $0xf0] sm:$0xff] }
 0x464   : > { %v1443_v37 = vpop.f32.mrb[49].mxu0  ;;  %v1449_v0 = vadd.f32 %v4859_v36, %v6101_v20  ;;  %v4234_v36 = vld [vmem:[%s7161_s7 + $0xe0] sm:$0xff] }
 0x465   : > { %4208 = vmatmul.mubr.msk.f32.gmra.mrb[26].mxu1 %vm1298_vm2, %v1494_v35  ;;  %v1444_v58 = vadd.f32 %v6101_v20, %v1443_v37  ;;  %v5220_v35 = vpack.c.bf16 %v4233_v32, %v4232_v31  ;;  %v4235_v37 = vld [vmem:[%s7161_s7 + $0xe8] sm:$0xff] }
 0x466   : > { %1658 = vmatprep.mubr.f32.mxu1 %v5658_v14  ;;  %v1499_v4 = vmax.f32 %v1449_v0, 0.0 }
 0x467   : > { %v4862_v44 = vpop.f32.mrb[50].mxu0  ;;  %v1498_v1 = vmax.f32 %v1444_v58, 0.0 }
 0x468   : > { %v1453_v46 = vpop.f32.mrb[51].mxu0  ;;  %v1459_v6 = vadd.f32 %v4862_v44, %v6101_v20  ;;  %v4237_v44 = vld [vmem:[%s7161_s7 + $0xf8] sm:$0xff] }
 0x469   : > { %4209 = vmatmul.mubr.msk.f32.gmra.mrb[28].mxu1 %vm1298_vm2, %v1495_v40  ;;  %v1454_v5 = vadd.f32 %v6101_v20, %v1453_v46  ;;  %v5224_v40 = vpack.c.bf16 %v4235_v37, %v4234_v36  ;;  %v5228_v46 = vpack.c.bf16 %v4237_v44, %v4236_v42 }
 0x46a   : > { %1664 = vmatprep.mubr.f32.mxu1 %v5658_v14  ;;  %v1501_v8 = vmax.f32 %v1459_v6, 0.0 }
 0x46b   : > { %v4865_v52 = vpop.f32.mrb[52].mxu0  ;;  %v1500_v7 = vmax.f32 %v1454_v5, 0.0 }
 0x46c   : > { %v1463_v54 = vpop.f32.mrb[53].mxu0  ;;  %v1469_v11 = vadd.f32 %v4865_v52, %v6101_v20 }
 0x46d   : > { %4210 = vmatmul.mubr.msk.f32.gmra.mrb[30].mxu1 %vm1298_vm2, %v1496_v50  ;;  %v1464_v10 = vadd.f32 %v6101_v20, %v1463_v54  ;;  %v4241_v50 = vld [vmem:[%s7163_s9 + $0x28] sm:$0xff]  ;;  %v1518_v54 = vlaneseq }
 0x46e   : > { %1670 = vmatprep.mubr.f32.mxu1 %v5658_v14  ;;  %v1503_v13 = vmax.f32 %v1469_v11, 0.0  ;;  %v5232_v52 = vpack.c.bf16 %v4241_v50, %v4240_v48 }
 0x46f   : > { %v4868_v60 = vpop.f32.mrb[54].mxu0  ;;  %v1502_v12 = vmax.f32 %v1464_v10, 0.0 }
 0x470   : > { %v1473_v62 = vpop.f32.mrb[55].mxu0  ;;  %v1479_v15 = vadd.f32 %v4868_v60, %v6101_v20  ;;  %v1516_v60 = vld [vmem:[%s7166_s12] sm:$0x3] }
 0x471   : > { %4211 = vmatmul.mubr.msk.f32.gmra.mrb[32].mxu1 %vm1298_vm2, %v1497_v56  ;;  %v1474_v9 = vadd.f32 %v6101_v20, %v1473_v62  ;;  %v1519_v56 = vshrl.u32 %v1518_v54, 7 }
 0x472   : > { %1676 = vmatprep.mubr.f32.mxu1 %v5658_v14  ;;  %v1505_v17 = vmax.f32 %v1479_v15, 0.0 }
 0x473   : > { %v4871_v2 = vpop.f32.mrb[56].mxu0  ;;  %v1504_v16 = vmax.f32 %v1474_v9, 0.0  ;;  %v6193_v58 = vsub.s32 1, %v1519_v56  ;;  %v6203_v10 = vsub.s32 0, %v1519_v56 }
 0x474   : > { %v1483_v3 = vpop.f32.mrb[57].mxu0  ;;  %v1489_v19 = vadd.f32 %v4871_v2, %v6101_v20 }
 0x475   : > { %4212 = vmatmul.mubr.msk.f32.gmra.mrb[34].mxu1 %vm1298_vm2, %v1498_v1  ;;  %v1484_v18 = vadd.f32 %v6101_v20, %v1483_v3  ;;  %v4228_v20 = vld [vmem:[%s7161_s7 + $0xb0] sm:$0xff]  ;;  %v6199_v62 = vrot.slane %v1516_v60, %v6193_v58  ;;  %v6207_v15 = vrot.slane %v1516_v60, %v6203_v10 }
 0x476   : > { %1682 = vmatprep.mubr.f32.mxu1 %v5658_v14  ;;  %v1507_v22 = vmax.f32 %v1489_v19, 0.0  ;;  %v5212_v27 = vpack.c.bf16 %v4229_v26, %v4228_v20 }
 0x477   : > { %v1506_v21 = vmax.f32 %v1484_v18, 0.0 }
 0x478   : > { %5213 = vmatprep.subr.bf16.mxu0 %v5212_v27 }
 0x479   : > { %4213 = vmatmul.mubr.msk.f32.gmra.mrb[36].mxu1 %vm1298_vm2, %v1499_v4  ;;  %5215 = vmatpush3.bf16.msra.mxu0 %v5212_v27 }
 0x47a   : > { %1688 = vmatprep.mubr.f32.mxu1 %v5658_v14  ;;  %5217 = vmatprep.subr.bf16.mxu0 %v5216_v30 }
 0x47d   : > { %4214 = vmatmul.mubr.msk.f32.gmra.mrb[38].mxu1 %vm1298_vm2, %v1500_v7  ;;  %5219 = vmatpush3.bf16.msra.mxu0 %v5216_v30  ;;  %v4243_v30 = vld [vmem:[%s7163_s9 + $0x38] sm:$0xff] }
 0x47e   : > { %1694 = vmatprep.mubr.f32.mxu1 %v5658_v14  ;;  %5221 = vmatprep.subr.bf16.mxu0 %v5220_v35  ;;  %v5236_v37 = vpack.c.bf16 %v4243_v30, %v4242_v29 }
 0x481   : > { %4215 = vmatmul.mubr.msk.f32.gmra.mrb[40].mxu1 %vm1298_vm2, %v1501_v8  ;;  %5223 = vmatpush3.bf16.msra.mxu0 %v5220_v35 }
 0x482   : > { %1700 = vmatprep.mubr.f32.mxu1 %v5658_v14  ;;  %5225 = vmatprep.subr.bf16.mxu0 %v5224_v40 }
 0x485   : > { %4216 = vmatmul.mubr.msk.f32.gmra.mrb[42].mxu1 %vm1298_vm2, %v1502_v12  ;;  %5227 = vmatpush3.bf16.msra.mxu0 %v5224_v40 }
 0x486   : > { %1706 = vmatprep.mubr.f32.mxu1 %v5658_v14  ;;  %5229 = vmatprep.subr.bf16.mxu0 %v5228_v46 }
 0x489   : > { %4217 = vmatmul.mubr.msk.f32.gmra.mrb[44].mxu1 %vm1298_vm2, %v1503_v13  ;;  %5231 = vmatpush3.bf16.msra.mxu0 %v5228_v46 }
 0x48a   : > { %1712 = vmatprep.mubr.f32.mxu1 %v5658_v14  ;;  %5233 = vmatprep.subr.bf16.mxu0 %v5232_v52 }
 0x48d   : > { %4218 = vmatmul.mubr.msk.f32.gmra.mrb[46].mxu1 %vm1298_vm2, %v1504_v16 }
 0x48e   : > { %1718 = vmatprep.mubr.f32.mxu1 %v5658_v14 }
 0x491   : > { %4219 = vmatmul.mubr.msk.f32.gmra.mrb[48].mxu1 %vm1298_vm2, %v1505_v17 }
 0x492   : > { %1724 = vmatprep.mubr.f32.mxu1 %v5658_v14 }
 0x495   : > { %4220 = vmatmul.mubr.msk.f32.gmra.mrb[50].mxu1 %vm1298_vm2, %v1506_v21 }
 0x496   : > { %1730 = vmatprep.mubr.f32.mxu1 %v5658_v14 }
 0x499   : > { %4221 = vmatmul.mubr.msk.f32.gmra.mrb[52].mxu1 %vm1298_vm2, %v1507_v22 }
 0x49a   : > { %2343 = vmatprep.mubr.f32.mxu1 %v5658_v14 }
 0x530   : > { %v1642_v0 = vpop.f32.mrb[22].mxu1 }
 0x531   : > { %v1644_v1 = vpop.f32.mrb[23].mxu1  ;;  %v1643_v22 = vadd.f32 %v1642_v0, %v6207_v15 }
 0x532   : > { %v1645_v2 = vadd.f32 %v1644_v1, %v6199_v62 }
 0x534   : > { %v1737_v3 = vmul.f32 1.442695, %v1645_v2  ;;  %v1648_v4 = vpop.f32.mrb[24].mxu1 }
 0x535   : > { %v1650_v5 = vpop.f32.mrb[25].mxu1  ;;  %v1649_v31 = vadd.f32 %v1648_v4, %v6207_v15 }
 0x536   : > { %5402 = vpow2.f32 %v1737_v3  ;;  %v1651_v6 = vadd.f32 %v1650_v5, %v6199_v62 }
 0x538   : > { %v1739_v7 = vmul.f32 1.442695, %v1651_v6  ;;  %v1654_v8 = vpop.f32.mrb[26].mxu1 }
 0x539   : > { %v1656_v11 = vpop.f32.mrb[27].mxu1  ;;  %v1655_v46 = vadd.f32 %v1654_v8, %v6207_v15 }
 0x53a   : > { %5404 = vpow2.f32 %v1739_v7  ;;  %v1657_v12 = vadd.f32 %v1656_v11, %v6199_v62 }
 0x53c   : > { %v1741_v13 = vmul.f32 1.442695, %v1657_v12  ;;  %v1660_v9 = vpop.f32.mrb[28].mxu1 }
 0x53d   : > { %v1662_v16 = vpop.f32.mrb[29].mxu1  ;;  %v1661_v1 = vadd.f32 %v1660_v9, %v6207_v15 }
 0x53e   : > { %5406 = vpow2.f32 %v1741_v13  ;;  %v1663_v17 = vadd.f32 %v1662_v16, %v6199_v62 }
 0x540   : > { %v5403_v18 = vpop.eup %5402  ;;  %v1743_v19 = vmul.f32 1.442695, %v1663_v17  ;;  %v1666_v21 = vpop.f32.mrb[30].mxu1 }
 0x541   : > { %v1668_v23 = vpop.f32.mrb[31].mxu1  ;;  %v1769_v24 = vmul.f32 %v5403_v18, %v5994_v33  ;;  %v1667_v7 = vadd.f32 %v1666_v21, %v6207_v15 }
 0x542   : > { %5408 = vpow2.f32 %v1743_v19  ;;  %v1669_v25 = vadd.f32 %v1668_v23, %v6199_v62 }
 0x543   : > { %v6213_v20 = vadd.f32 %v1769_v24, %v1643_v22 }
 0x544   : > { %v5405_v26 = vpop.eup %5404  ;;  %v1745_v27 = vmul.f32 1.442695, %v1669_v25  ;;  %v1672_v28 = vpop.f32.mrb[32].mxu1 }
 0x545   : > { %v1770_v33 = vmul.f32 %v5405_v26, %v5996_v34  ;;  %v1674_v32 = vpop.f32.mrb[33].mxu1  ;;  %4904 = vmatprep.mubr.f32.mxu0 %v6213_v20  ;;  %v1673_v17 = vadd.f32 %v1672_v28, %v6207_v15 }
 0x546   : > { %5410 = vpow2.f32 %v1745_v27  ;;  %v1675_v35 = vadd.f32 %v1674_v32, %v6199_v62 }
 0x547   : > { %v6225_v36 = vadd.f32 %v1770_v33, %v1649_v31 }
 0x548   : > { %v5407_v40 = vpop.eup %5406  ;;  %v1747_v42 = vmul.f32 1.442695, %v1675_v35  ;;  %v1678_v44 = vpop.f32.mrb[34].mxu1 }
 0x549   : > { %v1680_v48 = vpop.f32.mrb[35].mxu1  ;;  %4905 = vmatmul.mubr.f32.vlgmr.msra.gmra.mrb[58].mxu0 %v6225_v36  ;;  %v1771_v50 = vmul.f32 %v5407_v40, %v6000_v38  ;;  %v1679_v25 = vadd.f32 %v1678_v44, %v6207_v15 }
 0x54a   : > { %5412 = vpow2.f32 %v1747_v42  ;;  %v1681_v34 = vadd.f32 %v1680_v48, %v6199_v62  ;;  %5235 = vmatpush3.bf16.msra.mxu0 %v5232_v52 }
 0x54b   : > { %v6231_v54 = vadd.f32 %v1771_v50, %v1655_v46  ;;  %5237 = vmatprep.subr.bf16.mxu0 %v5236_v37 }
 0x54c   : > { %v5409_v56 = vpop.eup %5408  ;;  %v1749_v60 = vmul.f32 1.442695, %v1681_v34  ;;  %v1684_v0 = vpop.f32.mrb[36].mxu1 }
 0x54d   : > { %v1686_v2 = vpop.f32.mrb[37].mxu1  ;;  %4907 = vmatprep.mubr.f32.mxu0 %v6231_v54  ;;  %v1772_v3 = vmul.f32 %v5409_v56, %v6002_v39  ;;  %v1685_v33 = vadd.f32 %v1684_v0, %v6207_v15 }
 0x54e   : > { %5414 = vpow2.f32 %v1749_v60  ;;  %v1687_v38 = vadd.f32 %v1686_v2, %v6199_v62  ;;  %5239 = vmatpush3.bf16.msra.mxu0 %v5236_v37 }
 0x54f   : > { %v6237_v4 = vadd.f32 %v1772_v3, %v1661_v1 }
 0x550   : > { %v5411_v52 = vpop.eup %5410  ;;  %v1751_v5 = vmul.f32 1.442695, %v1687_v38  ;;  %v1690_v6 = vpop.f32.mrb[38].mxu1 }
 0x551   : > { %v1692_v8 = vpop.f32.mrb[39].mxu1  ;;  %4908 = vmatmul.mubr.f32.gmra.mrb[60].mxu0 %v6237_v4  ;;  %v1773_v11 = vmul.f32 %v5411_v52, %v6008_v43  ;;  %v1691_v46 = vadd.f32 %v1690_v6, %v6207_v15 }
 0x552   : > { %5416 = vpow2.f32 %v1751_v5  ;;  %v1693_v12 = vadd.f32 %v1692_v8, %v6199_v62 }
 0x553   : > { %v6243_v39 = vadd.f32 %v1773_v11, %v1667_v7 }
 0x554   : > { %v5413_v13 = vpop.eup %5412  ;;  %v1753_v9 = vmul.f32 1.442695, %v1693_v12  ;;  %v1696_v16 = vpop.f32.mrb[40].mxu1 }
 0x555   : > { %v1698_v18 = vpop.f32.mrb[41].mxu1  ;;  %4910 = vmatprep.mubr.f32.mxu0 %v6243_v39  ;;  %v1774_v19 = vmul.f32 %v5413_v13, %v6005_v41  ;;  %v1697_v1 = vadd.f32 %v1696_v16, %v6207_v15 }
 0x556   : > { %5418 = vpow2.f32 %v1753_v9  ;;  %v1699_v21 = vadd.f32 %v1698_v18, %v6199_v62 }
 0x557   : > { %v6249_v22 = vadd.f32 %v1774_v19, %v1673_v17 }
 0x558   : > { %v5415_v43 = vpop.eup %5414  ;;  %v1755_v23 = vmul.f32 1.442695, %v1699_v21  ;;  %v1702_v24 = vpop.f32.mrb[42].mxu1 }
 0x559   : > { %v1704_v26 = vpop.f32.mrb[43].mxu1  ;;  %4911 = vmatmul.mubr.f32.gmra.mrb[62].mxu0 %v6249_v22  ;;  %v1775_v27 = vmul.f32 %v5415_v43, %v6014_v47  ;;  %v1703_v7 = vadd.f32 %v1702_v24, %v6207_v15 }
 0x55a   : > { %5420 = vpow2.f32 %v1755_v23  ;;  %v1705_v28 = vadd.f32 %v1704_v26, %v6199_v62 }
 0x55b   : > { %v6255_v29 = vadd.f32 %v1775_v27, %v1679_v25 }
 0x55c   : > { %v5417_v41 = vpop.eup %5416  ;;  %v1757_v30 = vmul.f32 1.442695, %v1705_v28  ;;  %v1708_v31 = vpop.f32.mrb[44].mxu1 }
 0x55d   : > { %v1710_v32 = vpop.f32.mrb[45].mxu1  ;;  %4913 = vmatprep.mubr.f32.mxu0 %v6255_v29  ;;  %v1776_v35 = vmul.f32 %v5417_v41, %v6012_v45  ;;  %v1709_v17 = vadd.f32 %v1708_v31, %v6207_v15 }
 0x55e   : > { %5422 = vpow2.f32 %v1757_v30  ;;  %v1711_v37 = vadd.f32 %v1710_v32, %v6199_v62 }
 0x55f   : > { %v6261_v40 = vadd.f32 %v1776_v35, %v1685_v33 }
 0x560   : > { %v5419_v47 = vpop.eup %5418  ;;  %v1759_v42 = vmul.f32 1.442695, %v1711_v37  ;;  %v1714_v44 = vpop.f32.mrb[46].mxu1 }
 0x561   : > { %v1716_v48 = vpop.f32.mrb[47].mxu1  ;;  %4914 = vmatmul.mubr.f32.gmra.mrb[64].mxu0 %v6261_v40  ;;  %v1777_v50 = vmul.f32 %v5419_v47, %v6020_v51  ;;  %v1715_v24 = vadd.f32 %v1714_v44, %v6207_v15  ;;  %v4269_v44 = vld [vmem:[%s7165_s11 + $0x78] sm:$0xff] }
 0x562   : > { %5424 = vpow2.f32 %v1759_v42  ;;  %v1717_v34 = vadd.f32 %v1716_v48, %v6199_v62  ;;  %v4267_v42 = vld [vmem:[%s7165_s11 + $0x68] sm:$0xff] }
 0x563   : > { %v6267_v56 = vadd.f32 %v1777_v50, %v1691_v46  ;;  %v5244_v48 = vpack.c.bf16 %v4269_v44, %v4267_v42  ;;  %v4266_v50 = vld [vmem:[%s7165_s11 + $0x60] sm:$0xff] }
 0x564   : > { %v5421_v45 = vpop.eup %5420  ;;  %v1761_v60 = vmul.f32 1.442695, %v1717_v34  ;;  %v1720_v0 = vpop.f32.mrb[48].mxu1  ;;  %v4268_v34 = vld [vmem:[%s7165_s11 + $0x70] sm:$0xff] }
 0x565   : > { %v1722_v2 = vpop.f32.mrb[49].mxu1  ;;  %4916 = vmatprep.mubr.f32.mxu0 %v6267_v56  ;;  %v1778_v3 = vmul.f32 %v5421_v45, %v6018_v49  ;;  %v1721_v28 = vadd.f32 %v1720_v0, %v6207_v15  ;;  %v5246_v45 = vpack.c.bf16 %v4268_v34, %v4266_v50 }
 0x566   : > { %5426 = vpow2.f32 %v1761_v60  ;;  %v1723_v38 = vadd.f32 %v1722_v2, %v6199_v62  ;;  %v4239_v60 = vld [vmem:[%s7162_s8 + $0x1] ss:$0 sm:$0xff] }
 0x567   : > { %v6273_v52 = vadd.f32 %v1778_v3, %v1697_v1 }
 0x568   : > { %v5423_v51 = vpop.eup %5422  ;;  %v1763_v5 = vmul.f32 1.442695, %v1723_v38  ;;  %v1726_v6 = vpop.f32.mrb[50].mxu1 }
 0x569   : > { %v1728_v8 = vpop.f32.mrb[51].mxu1  ;;  %4917 = vmatmul.mubr.f32.gmra.mrb[66].mxu0 %v6273_v52  ;;  %v1779_v11 = vmul.f32 %v5423_v51, %v6026_v55  ;;  %v1727_v30 = vadd.f32 %v1726_v6, %v6207_v15 }
 0x56a   : > { %5428 = vpow2.f32 %v1763_v5  ;;  %v1729_v12 = vadd.f32 %v1728_v8, %v6199_v62 }
 0x56b   : > { %v6279_v13 = vadd.f32 %v1779_v11, %v1703_v7 }
 0x56c   : > { %v5425_v49 = vpop.eup %5424  ;;  %v1765_v9 = vmul.f32 1.442695, %v1729_v12  ;;  %v1732_v16 = vpop.f32.mrb[52].mxu1 }
 0x56d   : > { %v1734_v18 = vpop.f32.mrb[53].mxu1  ;;  %4919 = vmatprep.mubr.f32.mxu0 %v6279_v13  ;;  %v1780_v19 = vmul.f32 %v5425_v49, %v6024_v53  ;;  %v1733_v32 = vadd.f32 %v1732_v16, %v6207_v15  ;;  %v4262_v15 = vld [vmem:[%s7165_s11 + $0x40] sm:$0xff] }
 0x56e   : > { %5430 = vpow2.f32 %v1765_v9  ;;  %v1735_v21 = vadd.f32 %v1734_v18, %v6199_v62 }
 0x56f   : > { %v6285_v43 = vadd.f32 %v1780_v19, %v1709_v17 }
 0x570   : > { %v5427_v55 = vpop.eup %5426  ;;  %v1767_v23 = vmul.f32 1.442695, %v1735_v21 }
 0x571   : > { %4920 = vmatmul.mubr.f32.gmra.mrb[68].mxu0 %v6285_v43  ;;  %v1781_v25 = vmul.f32 %v5427_v55, %v6032_v59 }
 0x572   : > { %5432 = vpow2.f32 %v1767_v23 }
 0x573   : > { %v6290_v26 = vadd.f32 %v1781_v25, %v1715_v24 }
 0x574   : > { %v5429_v27 = vpop.eup %5428 }
 0x575   : > { %4922 = vmatprep.mubr.f32.mxu0 %v6290_v26  ;;  %v1782_v53 = vmul.f32 %v5429_v27, %v6030_v57  ;;  %v4263_v57 = vld [vmem:[%s7165_s11 + $0x48] sm:$0xff] }
 0x577   : > { %v6295_v62 = vadd.f32 %v1782_v53, %v1721_v28 }
 0x578   : > { %v5431_v41 = vpop.eup %5430 }
 0x579   : > { %4923 = vmatmul.mubr.f32.gmra.mrb[70].mxu0 %v6295_v62  ;;  %v1783_v31 = vmul.f32 %v5431_v41, %v6038_v63  ;;  %v4265_v63 = vld [vmem:[%s7165_s11 + $0x58] sm:$0xff] }
 0x57a   : > { %v5240_v47 = vpack.c.bf16 %v4265_v63, %v4263_v57 }
 0x57b   : > { %v6300_v59 = vadd.f32 %v1783_v31, %v1727_v30 }
 0x57c   : > { %v5433_v33 = vpop.eup %5432  ;;  %5241 = vmatprep.subr.bf16.mxu1 %v5240_v47 }
 0x57d   : > { %4925 = vmatprep.mubr.f32.mxu0 %v6300_v59  ;;  %v1784_v35 = vmul.f32 %v5433_v33, %v6036_v61  ;;  %v4264_v61 = vld [vmem:[%s7165_s11 + $0x50] sm:$0xff] }
 0x57e   : > { %v5242_v46 = vpack.c.bf16 %v4264_v61, %v4262_v15 }
 0x57f   : > { %v6305_v37 = vadd.f32 %v1784_v35, %v1733_v32 }
 0x580   : > { %5243 = vmatpush1.bf16.msra.mxu1 %v5242_v46 }
 0x581   : > { %4926 = vmatmul.mubr.f32.gmra.mrb[72].mxu0 %v6305_v37  ;;  %5245 = vmatprep.subr.bf16.mxu1 %v5244_v48 }
 0x584   : > { %5247 = vmatpush1.bf16.msra.mxu1 %v5246_v45 }
 0x61c   : > { %v4906_v0 = vpop.f32.mrb[58].mxu0 }
 0x61d   : > { %v1898_v1 = vadd.f32 %v4906_v0, %v4239_v60  ;;  %v1892_v2 = vpop.f32.mrb[59].mxu0 }
 0x61e   : > { %v1893_v3 = vadd.f32 %v4239_v60, %v1892_v2 }
 0x61f   : > { %v1972_v51 = vmax.f32 %v1898_v1, 0.0 }
 0x620   : > { %v1971_v38 = vmax.f32 %v1893_v3, 0.0 }
 0x622   : > { %4936 = vmatprep.mubr.msk.f32.mxu0 %vm1298_vm2, %v1971_v38  ;;  %v4287_v38 = vld [vmem:[%s7161_s7 + $0x100] sm:$0xff] }
 0x623   : > { %4937 = vmatmul.mubr.msk.f32.vlgmr.msra.gmra.mrb[74].mxu0 %vm1298_vm2, %v1972_v51  ;;  %v4288_v51 = vld [vmem:[%s7161_s7 + $0x108] sm:$0xff] }
 0x624   : > { %v4909_v5 = vpop.f32.mrb[60].mxu0 }
 0x625   : > { %v1908_v6 = vadd.f32 %v4909_v5, %v4239_v60  ;;  %v1902_v7 = vpop.f32.mrb[61].mxu0  ;;  %v4289_v5 = vld [vmem:[%s7161_s7 + $0x110] sm:$0xff] }
 0x626   : > { %v1903_v8 = vadd.f32 %v4239_v60, %v1902_v7 }
 0x627   : > { %v1974_v12 = vmax.f32 %v1908_v6, 0.0  ;;  %v5248_v6 = vpack.c.bf16 %v4288_v51, %v4287_v38 }
 0x628   : > { %v1973_v11 = vmax.f32 %v1903_v8, 0.0  ;;  %v6366_v8 = vld [vmem:[%s7164_s10 + $0x1] ss:$0 sm:$0xff] }
 0x629   : > { %5249 = vmatprep.subr.bf16.mxu0 %v5248_v6 }
 0x62a   : > { %4939 = vmatprep.mubr.msk.f32.mxu0 %vm1298_vm2, %v1973_v11  ;;  %5251 = vmatpush3.bf16.msra.mxu0 %v5248_v6 }
 0x62b   : > { %4940 = vmatmul.mubr.msk.f32.gmra.mrb[76].mxu0 %vm1298_vm2, %v1974_v12 }
 0x62c   : > { %v4912_v49 = vpop.f32.mrb[62].mxu0 }
 0x62d   : > { %v1918_v9 = vadd.f32 %v4912_v49, %v4239_v60  ;;  %v1912_v16 = vpop.f32.mrb[63].mxu0 }
 0x62e   : > { %v1913_v17 = vadd.f32 %v4239_v60, %v1912_v16 }
 0x62f   : > { %v1976_v19 = vmax.f32 %v1918_v9, 0.0 }
 0x630   : > { %v1975_v18 = vmax.f32 %v1913_v17, 0.0 }
 0x632   : > { %4942 = vmatprep.mubr.msk.f32.mxu0 %vm1298_vm2, %v1975_v18 }
 0x633   : > { %4943 = vmatmul.mubr.msk.f32.gmra.mrb[78].mxu0 %vm1298_vm2, %v1976_v19 }
 0x634   : > { %v4915_v21 = vpop.f32.mrb[64].mxu0 }
 0x635   : > { %v1928_v55 = vadd.f32 %v4915_v21, %v4239_v60  ;;  %v1922_v23 = vpop.f32.mrb[65].mxu0 }
 0x636   : > { %v1923_v24 = vadd.f32 %v4239_v60, %v1922_v23 }
 0x637   : > { %v1978_v27 = vmax.f32 %v1928_v55, 0.0 }
 0x638   : > { %v1977_v25 = vmax.f32 %v1923_v24, 0.0 }
 0x63a   : > { %4945 = vmatprep.mubr.msk.f32.mxu0 %vm1298_vm2, %v1977_v25 }
 0x63b   : > { %4946 = vmatmul.mubr.msk.f32.gmra.mrb[80].mxu0 %vm1298_vm2, %v1978_v27 }
 0x63c   : > { %v4918_v28 = vpop.f32.mrb[66].mxu0 }
 0x63d   : > { %v1938_v53 = vadd.f32 %v4918_v28, %v4239_v60  ;;  %v1932_v41 = vpop.f32.mrb[67].mxu0 }
 0x63e   : > { %v1933_v30 = vadd.f32 %v4239_v60, %v1932_v41 }
 0x63f   : > { %v1980_v33 = vmax.f32 %v1938_v53, 0.0 }
 0x640   : > { %v1979_v31 = vmax.f32 %v1933_v30, 0.0 }
 0x642   : > { %4948 = vmatprep.mubr.msk.f32.mxu0 %vm1298_vm2, %v1979_v31 }
 0x643   : > { %4949 = vmatmul.mubr.msk.f32.gmra.mrb[82].mxu0 %vm1298_vm2, %v1980_v33 }
 0x644   : > { %v4921_v32 = vpop.f32.mrb[68].mxu0 }
 0x645   : > { %v1948_v35 = vadd.f32 %v4921_v32, %v4239_v60  ;;  %v1942_v57 = vpop.f32.mrb[69].mxu0 }
 0x646   : > { %v1943_v63 = vadd.f32 %v4239_v60, %v1942_v57 }
 0x647   : > { %v1982_v47 = vmax.f32 %v1948_v35, 0.0 }
 0x648   : > { %v1981_v15 = vmax.f32 %v1943_v63, 0.0 }
 0x64a   : > { %4951 = vmatprep.mubr.msk.f32.mxu0 %vm1298_vm2, %v1981_v15 }
 0x64b   : > { %4952 = vmatmul.mubr.msk.f32.gmra.mrb[84].mxu0 %vm1298_vm2, %v1982_v47 }
 0x64c   : > { %v4924_v61 = vpop.f32.mrb[70].mxu0 }
 0x64d   : > { %v1958_v42 = vadd.f32 %v4924_v61, %v4239_v60  ;;  %v1952_v44 = vpop.f32.mrb[71].mxu0 }
 0x64e   : > { %v1953_v46 = vadd.f32 %v4239_v60, %v1952_v44 }
 0x64f   : > { %v1984_v50 = vmax.f32 %v1958_v42, 0.0 }
 0x650   : > { %v1983_v48 = vmax.f32 %v1953_v46, 0.0 }
 0x652   : > { %4954 = vmatprep.mubr.msk.f32.mxu0 %vm1298_vm2, %v1983_v48 }
 0x653   : > { %4955 = vmatmul.mubr.msk.f32.gmra.mrb[86].mxu0 %vm1298_vm2, %v1984_v50 }
 0x654   : > { %v4927_v34 = vpop.f32.mrb[72].mxu0 }
 0x655   : > { %v1968_v45 = vadd.f32 %v4927_v34, %v4239_v60  ;;  %v1962_v0 = vpop.f32.mrb[73].mxu0 }
 0x656   : > { %v1963_v1 = vadd.f32 %v4239_v60, %v1962_v0  ;;  %v4290_v60 = vld [vmem:[%s7161_s7 + $0x118] sm:$0xff] }
 0x657   : > { %v1986_v3 = vmax.f32 %v1968_v45, 0.0  ;;  %v5252_v7 = vpack.c.bf16 %v4290_v60, %v4289_v5 }
 0x658   : > { %v1985_v2 = vmax.f32 %v1963_v1, 0.0 }
 0x659   : > { %5253 = vmatprep.subr.bf16.mxu0 %v5252_v7 }
 0x65a   : > { %4957 = vmatprep.mubr.msk.f32.mxu0 %vm1298_vm2, %v1985_v2  ;;  %5255 = vmatpush3.bf16.msra.mxu0 %v5252_v7 }
 0x65b   : > { %4958 = vmatmul.mubr.msk.f32.gmra.mrb[88].mxu0 %vm1298_vm2, %v1986_v3 }
 0x6f6   : > { %v4938_v11 = vpop.f32.mrb[74].mxu0 }
 0x6f7   : > { %v2114_v12 = vpop.f32.mrb[75].mxu0  ;;  %v2120_v9 = vadd.f32 %v4938_v11, %v6366_v8 }
 0x6f8   : > { %v2115_v49 = vadd.f32 %v6366_v8, %v2114_v12 }
 0x6f9   : > { %v2194_v17 = vmax.f32 %v2120_v9, 0.0 }
 0x6fa   : > { %v2193_v16 = vmax.f32 %v2115_v49, 0.0 }
 0x6fc   : > { %4271 = vmatmul.mubr.msk.f32.vlgmr.msra.gmra.mrb[54].mxu1 %vm1298_vm2, %v2193_v16  ;;  %v4291_v16 = vld [vmem:[%s7161_s7 + $0x120] sm:$0xff] }
 0x6fd   : > { %2349 = vmatprep.mubr.f32.mxu1 %v5658_v14 }
 0x6fe   : > { %v4941_v18 = vpop.f32.mrb[76].mxu0 }
 0x6ff   : > { %v2124_v19 = vpop.f32.mrb[77].mxu0  ;;  %v2130_v55 = vadd.f32 %v4941_v18, %v6366_v8 }
 0x700   : > { %v2125_v21 = vadd.f32 %v6366_v8, %v2124_v19  ;;  %4272 = vmatmul.mubr.msk.f32.gmra.mrb[56].mxu1 %vm1298_vm2, %v2194_v17  ;;  %v4292_v17 = vld [vmem:[%s7161_s7 + $0x128] sm:$0xff]  ;;  %v4294_v19 = vld [vmem:[%s7161_s7 + $0x138] sm:$0xff] }
 0x701   : > { %2355 = vmatprep.mubr.f32.mxu1 %v5658_v14  ;;  %v2196_v24 = vmax.f32 %v2130_v55, 0.0  ;;  %v5256_v18 = vpack.c.bf16 %v4292_v17, %v4291_v16  ;;  %v4295_v55 = vld [vmem:[%s7161_s7 + $0x140] sm:$0xff] }
 0x702   : > { %v2195_v23 = vmax.f32 %v2125_v21, 0.0 }
 0x703   : > { %5257 = vmatprep.subr.bf16.mxu0 %v5256_v18 }
 0x704   : > { %4273 = vmatmul.mubr.msk.f32.gmra.mrb[58].mxu1 %vm1298_vm2, %v2195_v23  ;;  %5259 = vmatpush3.bf16.msra.mxu0 %v5256_v18  ;;  %v4296_v23 = vld [vmem:[%s7161_s7 + $0x148] sm:$0xff] }
 0x705   : > { %2361 = vmatprep.mubr.f32.mxu1 %v5658_v14 }
 0x706   : > { %v4944_v25 = vpop.f32.mrb[78].mxu0 }
 0x707   : > { %v2134_v27 = vpop.f32.mrb[79].mxu0  ;;  %v2140_v53 = vadd.f32 %v4944_v25, %v6366_v8  ;;  %v4297_v25 = vld [vmem:[%s7161_s7 + $0x150] sm:$0xff] }
 0x708   : > { %v2135_v28 = vadd.f32 %v6366_v8, %v2134_v27  ;;  %4274 = vmatmul.mubr.msk.f32.gmra.mrb[60].mxu1 %vm1298_vm2, %v2196_v24  ;;  %v5264_v24 = vpack.c.bf16 %v4296_v23, %v4295_v55  ;;  %v4298_v27 = vld [vmem:[%s7161_s7 + $0x158] sm:$0xff] }
 0x709   : > { %2367 = vmatprep.mubr.f32.mxu1 %v5658_v14  ;;  %v2198_v30 = vmax.f32 %v2140_v53, 0.0  ;;  %v4299_v53 = vld [vmem:[%s7161_s7 + $0x160] sm:$0xff]  ;;  %v4308_v55 = vld [vmem:[%s7163_s9 + $0x58] sm:$0xff] }
 0x70a   : > { %v2197_v41 = vmax.f32 %v2135_v28, 0.0  ;;  %v5268_v28 = vpack.c.bf16 %v4298_v27, %v4297_v25 }
 0x70c   : > { %4275 = vmatmul.mubr.msk.f32.gmra.mrb[62].mxu1 %vm1298_vm2, %v2197_v41  ;;  %v4300_v41 = vld [vmem:[%s7161_s7 + $0x168] sm:$0xff] }
 0x70d   : > { %2373 = vmatprep.mubr.f32.mxu1 %v5658_v14 }
 0x70e   : > { %v4947_v31 = vpop.f32.mrb[80].mxu0 }
 0x70f   : > { %v2144_v33 = vpop.f32.mrb[81].mxu0  ;;  %v2150_v35 = vadd.f32 %v4947_v31, %v6366_v8  ;;  %v4301_v31 = vld [vmem:[%s7161_s7 + $0x170] sm:$0xff] }
 0x710   : > { %v2145_v32 = vadd.f32 %v6366_v8, %v2144_v33  ;;  %4276 = vmatmul.mubr.msk.f32.gmra.mrb[64].mxu1 %vm1298_vm2, %v2198_v30  ;;  %v5272_v30 = vpack.c.bf16 %v4300_v41, %v4299_v53  ;;  %v4302_v33 = vld [vmem:[%s7161_s7 + $0x178] sm:$0xff] }
 0x711   : > { %2379 = vmatprep.mubr.f32.mxu1 %v5658_v14  ;;  %v2200_v63 = vmax.f32 %v2150_v35, 0.0  ;;  %v4305_v35 = vld [vmem:[%s7163_s9 + $0x40] sm:$0xff] }
 0x712   : > { %v2199_v57 = vmax.f32 %v2145_v32, 0.0  ;;  %v5276_v32 = vpack.c.bf16 %v4302_v33, %v4301_v31 }
 0x714   : > { %4277 = vmatmul.mubr.msk.f32.gmra.mrb[66].mxu1 %vm1298_vm2, %v2199_v57  ;;  %v4306_v57 = vld [vmem:[%s7163_s9 + $0x48] sm:$0xff] }
 0x715   : > { %2385 = vmatprep.mubr.f32.mxu1 %v5658_v14 }
 0x716   : > { %v4950_v15 = vpop.f32.mrb[82].mxu0 }
 0x717   : > { %v2154_v47 = vpop.f32.mrb[83].mxu0  ;;  %v2160_v42 = vadd.f32 %v4950_v15, %v6366_v8  ;;  %v4270_v15 = vld [vmem:[%s7166_s12 + $0x2] sm:$0x3] }
 0x718   : > { %v2155_v61 = vadd.f32 %v6366_v8, %v2154_v47  ;;  %4278 = vmatmul.mubr.msk.f32.gmra.mrb[68].mxu1 %vm1298_vm2, %v2200_v63  ;;  %v5280_v63 = vpack.c.bf16 %v4306_v57, %v4305_v35  ;;  %v6462_v47 = vrot.slane %v4270_v15, %v6193_v58 }
 0x719   : > { %2391 = vmatprep.mubr.f32.mxu1 %v5658_v14  ;;  %v2202_v46 = vmax.f32 %v2160_v42, 0.0 }
 0x71a   : > { %v2201_v44 = vmax.f32 %v2155_v61, 0.0 }
 0x71c   : > { %4279 = vmatmul.mubr.msk.f32.gmra.mrb[70].mxu1 %vm1298_vm2, %v2201_v44 }
 0x71d   : > { %2397 = vmatprep.mubr.f32.mxu1 %v5658_v14 }
 0x71e   : > { %v4953_v48 = vpop.f32.mrb[84].mxu0 }
 0x71f   : > { %v2164_v50 = vpop.f32.mrb[85].mxu0  ;;  %v2170_v45 = vadd.f32 %v4953_v48, %v6366_v8 }
 0x720   : > { %v2165_v34 = vadd.f32 %v6366_v8, %v2164_v50  ;;  %4280 = vmatmul.mubr.msk.f32.gmra.mrb[72].mxu1 %vm1298_vm2, %v2202_v46 }
 0x721   : > { %2403 = vmatprep.mubr.f32.mxu1 %v5658_v14  ;;  %v2204_v1 = vmax.f32 %v2170_v45, 0.0 }
 0x722   : > { %v2203_v0 = vmax.f32 %v2165_v34, 0.0 }
 0x724   : > { %4281 = vmatmul.mubr.msk.f32.gmra.mrb[74].mxu1 %vm1298_vm2, %v2203_v0 }
 0x725   : > { %2409 = vmatprep.mubr.f32.mxu1 %v5658_v14 }
 0x726   : > { %v4956_v2 = vpop.f32.mrb[86].mxu0 }
 0x727   : > { %v2174_v3 = vpop.f32.mrb[87].mxu0  ;;  %v2180_v51 = vadd.f32 %v4956_v2, %v6366_v8 }
 0x728   : > { %v2175_v38 = vadd.f32 %v6366_v8, %v2174_v3  ;;  %4282 = vmatmul.mubr.msk.f32.gmra.mrb[76].mxu1 %vm1298_vm2, %v2204_v1 }
 0x729   : > { %2415 = vmatprep.mubr.f32.mxu1 %v5658_v14  ;;  %v2206_v6 = vmax.f32 %v2180_v51, 0.0  ;;  %v6468_v51 = vrot.slane %v4270_v15, %v6203_v10 }
 0x72a   : > { %v2205_v5 = vmax.f32 %v2175_v38, 0.0 }
 0x72c   : > { %4283 = vmatmul.mubr.msk.f32.gmra.mrb[78].mxu1 %vm1298_vm2, %v2205_v5 }
 0x72d   : > { %2421 = vmatprep.mubr.f32.mxu1 %v5658_v14 }
 0x72e   : > { %v4959_v60 = vpop.f32.mrb[88].mxu0 }
 0x72f   : > { %v2184_v7 = vpop.f32.mrb[89].mxu0  ;;  %v2190_v12 = vadd.f32 %v4959_v60, %v6366_v8 }
 0x730   : > { %v2185_v11 = vadd.f32 %v6366_v8, %v2184_v7  ;;  %4284 = vmatmul.mubr.msk.f32.gmra.mrb[80].mxu1 %vm1298_vm2, %v2206_v6  ;;  %v4293_v8 = vld [vmem:[%s7161_s7 + $0x130] sm:$0xff] }
 0x731   : > { %2427 = vmatprep.mubr.f32.mxu1 %v5658_v14  ;;  %v2208_v9 = vmax.f32 %v2190_v12, 0.0  ;;  %v5260_v21 = vpack.c.bf16 %v4294_v19, %v4293_v8 }
 0x732   : > { %v2207_v49 = vmax.f32 %v2185_v11, 0.0 }
 0x733   : > { %5261 = vmatprep.subr.bf16.mxu0 %v5260_v21 }
 0x734   : > { %4285 = vmatmul.mubr.msk.f32.gmra.mrb[82].mxu1 %vm1298_vm2, %v2207_v49  ;;  %5263 = vmatpush3.bf16.msra.mxu0 %v5260_v21  ;;  %v4307_v21 = vld [vmem:[%s7163_s9 + $0x50] sm:$0xff] }
 0x735   : > { %2433 = vmatprep.mubr.f32.mxu1 %v5658_v14  ;;  %5265 = vmatprep.subr.bf16.mxu0 %v5264_v24 }
 0x738   : > { %4286 = vmatmul.mubr.msk.f32.gmra.mrb[84].mxu1 %vm1298_vm2, %v2208_v9  ;;  %5267 = vmatpush3.bf16.msra.mxu0 %v5264_v24 }
 0x739   : > { %3046 = vmatprep.mubr.f32.mxu1 %v5658_v14  ;;  %5269 = vmatprep.subr.bf16.mxu0 %v5268_v28 }
 0x73c   : > { %5271 = vmatpush3.bf16.msra.mxu0 %v5268_v28  ;;  %v5284_v28 = vpack.c.bf16 %v4308_v55, %v4307_v21 }
 0x73d   : > { %5273 = vmatprep.subr.bf16.mxu0 %v5272_v30 }
 0x740   : > { %5275 = vmatpush3.bf16.msra.mxu0 %v5272_v30 }
 0x741   : > { %5277 = vmatprep.subr.bf16.mxu0 %v5276_v32 }
 0x744   : > { %5279 = vmatpush3.bf16.msra.mxu0 %v5276_v32 }
 0x745   : > { %5281 = vmatprep.subr.bf16.mxu0 %v5280_v63 }
 0x7cf   : > { %v2345_v61 = vpop.f32.mrb[54].mxu1 }
 0x7d0   : > { %v2347_v42 = vpop.f32.mrb[55].mxu1  ;;  %v2346_v12 = vadd.f32 %v2345_v61, %v6468_v51 }
 0x7d1   : > { %v2348_v44 = vadd.f32 %v2347_v42, %v6462_v47 }
 0x7d3   : > { %v2440_v46 = vmul.f32 1.442695, %v2348_v44  ;;  %v2351_v48 = vpop.f32.mrb[56].mxu1 }
 0x7d4   : > { %v2353_v50 = vpop.f32.mrb[57].mxu1  ;;  %v2352_v23 = vadd.f32 %v2351_v48, %v6468_v51 }
 0x7d5   : > { %5434 = vpow2.f32 %v2440_v46  ;;  %v2354_v34 = vadd.f32 %v2353_v50, %v6462_v47 }
 0x7d7   : > { %v2442_v45 = vmul.f32 1.442695, %v2354_v34  ;;  %v2357_v0 = vpop.f32.mrb[58].mxu1 }
 0x7d8   : > { %v2359_v1 = vpop.f32.mrb[59].mxu1  ;;  %v2358_v31 = vadd.f32 %v2357_v0, %v6468_v51 }
 0x7d9   : > { %5436 = vpow2.f32 %v2442_v45  ;;  %v2360_v2 = vadd.f32 %v2359_v1, %v6462_v47 }
 0x7db   : > { %v2444_v3 = vmul.f32 1.442695, %v2360_v2  ;;  %v2363_v38 = vpop.f32.mrb[60].mxu1 }
 0x7dc   : > { %v2365_v5 = vpop.f32.mrb[61].mxu1  ;;  %v2364_v42 = vadd.f32 %v2363_v38, %v6468_v51 }
 0x7dd   : > { %5438 = vpow2.f32 %v2444_v3  ;;  %v2366_v6 = vadd.f32 %v2365_v5, %v6462_v47 }
 0x7df   : > { %v5435_v60 = vpop.eup %5434  ;;  %v2446_v7 = vmul.f32 1.442695, %v2366_v6  ;;  %v2369_v11 = vpop.f32.mrb[62].mxu1 }
 0x7e0   : > { %v2371_v49 = vpop.f32.mrb[63].mxu1  ;;  %v2472_v9 = vmul.f32 %v5435_v60, %v6213_v20  ;;  %v2370_v45 = vadd.f32 %v2369_v11, %v6468_v51 }
 0x7e1   : > { %5440 = vpow2.f32 %v2446_v7  ;;  %v2372_v16 = vadd.f32 %v2371_v49, %v6462_v47 }
 0x7e2   : > { %v6474_v17 = vadd.f32 %v2472_v9, %v2346_v12 }
 0x7e3   : > { %v5437_v18 = vpop.eup %5436  ;;  %v2448_v8 = vmul.f32 1.442695, %v2372_v16  ;;  %v2375_v19 = vpop.f32.mrb[64].mxu1 }
 0x7e4   : > { %v2473_v20 = vmul.f32 %v5437_v18, %v6225_v36  ;;  %v2377_v24 = vpop.f32.mrb[65].mxu1  ;;  %4992 = vmatprep.mubr.f32.mxu0 %v6474_v17  ;;  %v2376_v6 = vadd.f32 %v2375_v19, %v6468_v51 }
 0x7e5   : > { %5442 = vpow2.f32 %v2448_v8  ;;  %v2378_v25 = vadd.f32 %v2377_v24, %v6462_v47 }
 0x7e6   : > { %v6486_v27 = vadd.f32 %v2473_v20, %v2352_v23 }
 0x7e7   : > { %v5439_v53 = vpop.eup %5438  ;;  %v2450_v41 = vmul.f32 1.442695, %v2378_v25  ;;  %v2381_v30 = vpop.f32.mrb[66].mxu1 }
 0x7e8   : > { %v2383_v33 = vpop.f32.mrb[67].mxu1  ;;  %4993 = vmatmul.mubr.f32.vlgmr.msra.gmra.mrb[90].mxu0 %v6486_v27  ;;  %v2474_v32 = vmul.f32 %v5439_v53, %v6231_v54  ;;  %v2382_v16 = vadd.f32 %v2381_v30, %v6468_v51 }
 0x7e9   : > { %5444 = vpow2.f32 %v2450_v41  ;;  %v2384_v36 = vadd.f32 %v2383_v33, %v6462_v47  ;;  %5283 = vmatpush3.bf16.msra.mxu0 %v5280_v63 }
 0x7ea   : > { %v6492_v35 = vadd.f32 %v2474_v32, %v2358_v31  ;;  %5285 = vmatprep.subr.bf16.mxu0 %v5284_v28 }
 0x7eb   : > { %v5441_v57 = vpop.eup %5440  ;;  %v2452_v15 = vmul.f32 1.442695, %v2384_v36  ;;  %v2387_v61 = vpop.f32.mrb[68].mxu1 }
 0x7ec   : > { %v2389_v44 = vpop.f32.mrb[69].mxu1  ;;  %4995 = vmatprep.mubr.f32.mxu0 %v6492_v35  ;;  %v2475_v46 = vmul.f32 %v5441_v57, %v6237_v4  ;;  %v2388_v20 = vadd.f32 %v2387_v61, %v6468_v51 }
 0x7ed   : > { %5446 = vpow2.f32 %v2452_v15  ;;  %v2390_v54 = vadd.f32 %v2389_v44, %v6462_v47  ;;  %5287 = vmatpush3.bf16.msra.mxu0 %v5284_v28 }
 0x7ee   : > { %v6498_v48 = vadd.f32 %v2475_v46, %v2364_v42 }
 0x7ef   : > { %v5443_v63 = vpop.eup %5442  ;;  %v2454_v50 = vmul.f32 1.442695, %v2390_v54  ;;  %v2393_v34 = vpop.f32.mrb[70].mxu1 }
 0x7f0   : > { %v2395_v0 = vpop.f32.mrb[71].mxu1  ;;  %4996 = vmatmul.mubr.f32.gmra.mrb[92].mxu0 %v6498_v48  ;;  %v2476_v1 = vmul.f32 %v5443_v63, %v6243_v39  ;;  %v2394_v31 = vadd.f32 %v2393_v34, %v6468_v51 }
 0x7f1   : > { %5448 = vpow2.f32 %v2454_v50  ;;  %v2396_v2 = vadd.f32 %v2395_v0, %v6462_v47 }
 0x7f2   : > { %v6504_v4 = vadd.f32 %v2476_v1, %v2370_v45 }
 0x7f3   : > { %v5445_v3 = vpop.eup %5444  ;;  %v2456_v38 = vmul.f32 1.442695, %v2396_v2  ;;  %v2399_v5 = vpop.f32.mrb[72].mxu1 }
 0x7f4   : > { %v2401_v60 = vpop.f32.mrb[73].mxu1  ;;  %4998 = vmatprep.mubr.f32.mxu0 %v6504_v4  ;;  %v2477_v7 = vmul.f32 %v5445_v3, %v6249_v22  ;;  %v2400_v42 = vadd.f32 %v2399_v5, %v6468_v51 }
 0x7f5   : > { %5450 = vpow2.f32 %v2456_v38  ;;  %v2402_v11 = vadd.f32 %v2401_v60, %v6462_v47 }
 0x7f6   : > { %v6510_v12 = vadd.f32 %v2477_v7, %v2376_v6 }
 0x7f7   : > { %v5447_v39 = vpop.eup %5446  ;;  %v2458_v49 = vmul.f32 1.442695, %v2402_v11  ;;  %v2405_v9 = vpop.f32.mrb[74].mxu1 }
 0x7f8   : > { %v2407_v18 = vpop.f32.mrb[75].mxu1  ;;  %4999 = vmatmul.mubr.f32.gmra.mrb[94].mxu0 %v6510_v12  ;;  %v2478_v8 = vmul.f32 %v5447_v39, %v6255_v29  ;;  %v2406_v45 = vadd.f32 %v2405_v9, %v6468_v51 }
 0x7f9   : > { %5452 = vpow2.f32 %v2458_v49  ;;  %v2408_v19 = vadd.f32 %v2407_v18, %v6462_v47 }
 0x7fa   : > { %v6516_v21 = vadd.f32 %v2478_v8, %v2382_v16 }
 0x7fb   : > { %v5449_v22 = vpop.eup %5448  ;;  %v2460_v55 = vmul.f32 1.442695, %v2408_v19  ;;  %v2411_v23 = vpop.f32.mrb[76].mxu1 }
 0x7fc   : > { %v2413_v24 = vpop.f32.mrb[77].mxu1  ;;  %5001 = vmatprep.mubr.f32.mxu0 %v6516_v21  ;;  %v2479_v25 = vmul.f32 %v5449_v22, %v6261_v40  ;;  %v2412_v6 = vadd.f32 %v2411_v23, %v6468_v51 }
 0x7fd   : > { %5454 = vpow2.f32 %v2460_v55  ;;  %v2414_v28 = vadd.f32 %v2413_v24, %v6462_v47 }
 0x7fe   : > { %v6522_v53 = vadd.f32 %v2479_v25, %v2388_v20 }
 0x7ff   : > { %v5451_v29 = vpop.eup %5450  ;;  %v2462_v41 = vmul.f32 1.442695, %v2414_v28  ;;  %v2417_v30 = vpop.f32.mrb[78].mxu1 }
 0x800   : > { %v2419_v33 = vpop.f32.mrb[79].mxu1  ;;  %5002 = vmatmul.mubr.f32.gmra.mrb[96].mxu0 %v6522_v53  ;;  %v2480_v32 = vmul.f32 %v5451_v29, %v6267_v56  ;;  %v2418_v9 = vadd.f32 %v2417_v30, %v6468_v51  ;;  %v4334_v30 = vld [vmem:[%s7165_s11 + $0xb8] sm:$0xff] }
 0x801   : > { %5456 = vpow2.f32 %v2462_v41  ;;  %v2420_v36 = vadd.f32 %v2419_v33, %v6462_v47  ;;  %v4332_v41 = vld [vmem:[%s7165_s11 + $0xa8] sm:$0xff] }
 0x802   : > { %v6528_v57 = vadd.f32 %v2480_v32, %v2394_v31  ;;  %v5292_v33 = vpack.c.bf16 %v4334_v30, %v4332_v41  ;;  %v4331_v32 = vld [vmem:[%s7165_s11 + $0xa0] sm:$0xff] }
 0x803   : > { %v5453_v40 = vpop.eup %5452  ;;  %v2464_v15 = vmul.f32 1.442695, %v2420_v36  ;;  %v2423_v61 = vpop.f32.mrb[80].mxu1  ;;  %v4333_v36 = vld [vmem:[%s7165_s11 + $0xb0] sm:$0xff] }
 0x804   : > { %v2425_v44 = vpop.f32.mrb[81].mxu1  ;;  %5004 = vmatprep.mubr.f32.mxu0 %v6528_v57  ;;  %v2481_v46 = vmul.f32 %v5453_v40, %v6273_v52  ;;  %v2424_v19 = vadd.f32 %v2423_v61, %v6468_v51  ;;  %v5294_v40 = vpack.c.bf16 %v4333_v36, %v4331_v32 }
 0x805   : > { %5458 = vpow2.f32 %v2464_v15  ;;  %v2426_v54 = vadd.f32 %v2425_v44, %v6462_v47  ;;  %v4304_v15 = vld [vmem:[%s7162_s8 + $0x2] ss:$0 sm:$0xff] }
 0x806   : > { %v6534_v63 = vadd.f32 %v2481_v46, %v2400_v42 }
 0x807   : > { %v5455_v56 = vpop.eup %5454  ;;  %v2466_v50 = vmul.f32 1.442695, %v2426_v54  ;;  %v2429_v34 = vpop.f32.mrb[82].mxu1 }
 0x808   : > { %v2431_v0 = vpop.f32.mrb[83].mxu1  ;;  %5005 = vmatmul.mubr.f32.gmra.mrb[98].mxu0 %v6534_v63  ;;  %v2482_v1 = vmul.f32 %v5455_v56, %v6279_v13  ;;  %v2430_v55 = vadd.f32 %v2429_v34, %v6468_v51 }
 0x809   : > { %5460 = vpow2.f32 %v2466_v50  ;;  %v2432_v2 = vadd.f32 %v2431_v0, %v6462_v47 }
 0x80a   : > { %v6540_v3 = vadd.f32 %v2482_v1, %v2406_v45 }
 0x80b   : > { %v5457_v52 = vpop.eup %5456  ;;  %v2468_v38 = vmul.f32 1.442695, %v2432_v2  ;;  %v2435_v5 = vpop.f32.mrb[84].mxu1 }
 0x80c   : > { %v2437_v60 = vpop.f32.mrb[85].mxu1  ;;  %5007 = vmatprep.mubr.f32.mxu0 %v6540_v3  ;;  %v2483_v7 = vmul.f32 %v5457_v52, %v6285_v43  ;;  %v2436_v24 = vadd.f32 %v2435_v5, %v6468_v51  ;;  %v4327_v51 = vld [vmem:[%s7165_s11 + $0x80] sm:$0xff] }
 0x80d   : > { %5462 = vpow2.f32 %v2468_v38  ;;  %v2438_v11 = vadd.f32 %v2437_v60, %v6462_v47 }
 0x80e   : > { %v6546_v39 = vadd.f32 %v2483_v7, %v2412_v6 }
 0x80f   : > { %v5459_v13 = vpop.eup %5458  ;;  %v2470_v49 = vmul.f32 1.442695, %v2438_v11 }
 0x810   : > { %5008 = vmatmul.mubr.f32.gmra.mrb[100].mxu0 %v6546_v39  ;;  %v2484_v16 = vmul.f32 %v5459_v13, %v6290_v26 }
 0x811   : > { %5464 = vpow2.f32 %v2470_v49 }
 0x812   : > { %v6551_v18 = vadd.f32 %v2484_v16, %v2418_v9 }
 0x813   : > { %v5461_v8 = vpop.eup %5460 }
 0x814   : > { %5010 = vmatprep.mubr.f32.mxu0 %v6551_v18  ;;  %v2485_v43 = vmul.f32 %v5461_v8, %v6295_v62  ;;  %v4328_v62 = vld [vmem:[%s7165_s11 + $0x88] sm:$0xff] }
 0x816   : > { %v6556_v47 = vadd.f32 %v2485_v43, %v2424_v19 }
 0x817   : > { %v5463_v22 = vpop.eup %5462 }
 0x818   : > { %5011 = vmatmul.mubr.f32.gmra.mrb[102].mxu0 %v6556_v47  ;;  %v2486_v23 = vmul.f32 %v5463_v22, %v6300_v59  ;;  %v4330_v59 = vld [vmem:[%s7165_s11 + $0x98] sm:$0xff] }
 0x819   : > { %v5288_v29 = vpack.c.bf16 %v4330_v59, %v4328_v62 }
 0x81a   : > { %v6561_v26 = vadd.f32 %v2486_v23, %v2430_v55 }
 0x81b   : > { %v5465_v20 = vpop.eup %5464  ;;  %5289 = vmatprep.subr.bf16.mxu1 %v5288_v29 }
 0x81c   : > { %5013 = vmatprep.mubr.f32.mxu0 %v6561_v26  ;;  %v2487_v25 = vmul.f32 %v5465_v20, %v6305_v37  ;;  %v4329_v37 = vld [vmem:[%s7165_s11 + $0x90] sm:$0xff] }
 0x81d   : > { %v5290_v31 = vpack.c.bf16 %v4329_v37, %v4327_v51 }
 0x81e   : > { %v6566_v28 = vadd.f32 %v2487_v25, %v2436_v24 }
 0x81f   : > { %5291 = vmatpush1.bf16.msra.mxu1 %v5290_v31 }
 0x820   : > { %5014 = vmatmul.mubr.f32.gmra.mrb[104].mxu0 %v6566_v28  ;;  %5293 = vmatprep.subr.bf16.mxu1 %v5292_v33 }
 0x823   : > { %5295 = vmatpush1.bf16.msra.mxu1 %v5294_v40 }
 0x8bb   : > { %v4994_v61 = vpop.f32.mrb[90].mxu0 }
 0x8bc   : > { %v2601_v42 = vadd.f32 %v4994_v61, %v4304_v15  ;;  %v2595_v44 = vpop.f32.mrb[91].mxu0 }
 0x8bd   : > { %v2596_v46 = vadd.f32 %v4304_v15, %v2595_v44 }
 0x8be   : > { %v2675_v56 = vmax.f32 %v2601_v42, 0.0 }
 0x8bf   : > { %v2674_v54 = vmax.f32 %v2596_v46, 0.0 }
 0x8c1   : > { %5024 = vmatprep.mubr.msk.f32.mxu0 %vm1298_vm2, %v2674_v54  ;;  %v4352_v54 = vld [vmem:[%s7161_s7 + $0x180] sm:$0xff] }
 0x8c2   : > { %5025 = vmatmul.mubr.msk.f32.vlgmr.msra.gmra.mrb[106].mxu0 %vm1298_vm2, %v2675_v56  ;;  %v4353_v56 = vld [vmem:[%s7161_s7 + $0x188] sm:$0xff] }
 0x8c3   : > { %v4997_v50 = vpop.f32.mrb[92].mxu0 }
 0x8c4   : > { %v2611_v34 = vadd.f32 %v4997_v50, %v4304_v15  ;;  %v2605_v45 = vpop.f32.mrb[93].mxu0  ;;  %v4354_v50 = vld [vmem:[%s7161_s7 + $0x190] sm:$0xff] }
 0x8c5   : > { %v2606_v0 = vadd.f32 %v4304_v15, %v2605_v45 }
 0x8c6   : > { %v2677_v2 = vmax.f32 %v2611_v34, 0.0  ;;  %v5296_v34 = vpack.c.bf16 %v4353_v56, %v4352_v54 }
 0x8c7   : > { %v2676_v1 = vmax.f32 %v2606_v0, 0.0  ;;  %v6627_v0 = vld [vmem:[%s7164_s10 + $0x2] ss:$0 sm:$0xff] }
 0x8c8   : > { %5297 = vmatprep.subr.bf16.mxu0 %v5296_v34 }
 0x8c9   : > { %5027 = vmatprep.mubr.msk.f32.mxu0 %vm1298_vm2, %v2676_v1  ;;  %5299 = vmatpush3.bf16.msra.mxu0 %v5296_v34 }
 0x8ca   : > { %5028 = vmatmul.mubr.msk.f32.gmra.mrb[108].mxu0 %vm1298_vm2, %v2677_v2 }
 0x8cb   : > { %v5000_v52 = vpop.f32.mrb[94].mxu0 }
 0x8cc   : > { %v2621_v38 = vadd.f32 %v5000_v52, %v4304_v15  ;;  %v2615_v5 = vpop.f32.mrb[95].mxu0 }
 0x8cd   : > { %v2616_v6 = vadd.f32 %v4304_v15, %v2615_v5 }
 0x8ce   : > { %v2679_v7 = vmax.f32 %v2621_v38, 0.0 }
 0x8cf   : > { %v2678_v60 = vmax.f32 %v2616_v6, 0.0 }
 0x8d1   : > { %5030 = vmatprep.mubr.msk.f32.mxu0 %vm1298_vm2, %v2678_v60 }
 0x8d2   : > { %5031 = vmatmul.mubr.msk.f32.gmra.mrb[110].mxu0 %vm1298_vm2, %v2679_v7 }
 0x8d3   : > { %v5003_v11 = vpop.f32.mrb[96].mxu0 }
 0x8d4   : > { %v2631_v13 = vadd.f32 %v5003_v11, %v4304_v15  ;;  %v2625_v49 = vpop.f32.mrb[97].mxu0 }
 0x8d5   : > { %v2626_v9 = vadd.f32 %v4304_v15, %v2625_v49 }
 0x8d6   : > { %v2681_v8 = vmax.f32 %v2631_v13, 0.0 }
 0x8d7   : > { %v2680_v16 = vmax.f32 %v2626_v9, 0.0 }
 0x8d9   : > { %5033 = vmatprep.mubr.msk.f32.mxu0 %vm1298_vm2, %v2680_v16 }
 0x8da   : > { %5034 = vmatmul.mubr.msk.f32.gmra.mrb[112].mxu0 %vm1298_vm2, %v2681_v8 }
 0x8db   : > { %v5006_v19 = vpop.f32.mrb[98].mxu0 }
 0x8dc   : > { %v2641_v43 = vadd.f32 %v5006_v19, %v4304_v15  ;;  %v2635_v22 = vpop.f32.mrb[99].mxu0 }
 0x8dd   : > { %v2636_v55 = vadd.f32 %v4304_v15, %v2635_v22 }
 0x8de   : > { %v2683_v20 = vmax.f32 %v2641_v43, 0.0 }
 0x8df   : > { %v2682_v23 = vmax.f32 %v2636_v55, 0.0 }
 0x8e1   : > { %5036 = vmatprep.mubr.msk.f32.mxu0 %vm1298_vm2, %v2682_v23 }
 0x8e2   : > { %5037 = vmatmul.mubr.msk.f32.gmra.mrb[114].mxu0 %vm1298_vm2, %v2683_v20 }
 0x8e3   : > { %v5009_v24 = vpop.f32.mrb[100].mxu0 }
 0x8e4   : > { %v2651_v25 = vadd.f32 %v5009_v24, %v4304_v15  ;;  %v2645_v62 = vpop.f32.mrb[101].mxu0 }
 0x8e5   : > { %v2646_v59 = vadd.f32 %v4304_v15, %v2645_v62 }
 0x8e6   : > { %v2685_v29 = vmax.f32 %v2651_v25, 0.0 }
 0x8e7   : > { %v2684_v51 = vmax.f32 %v2646_v59, 0.0 }
 0x8e9   : > { %5039 = vmatprep.mubr.msk.f32.mxu0 %vm1298_vm2, %v2684_v51 }
 0x8ea   : > { %5040 = vmatmul.mubr.msk.f32.gmra.mrb[116].mxu0 %vm1298_vm2, %v2685_v29 }
 0x8eb   : > { %v5012_v37 = vpop.f32.mrb[102].mxu0 }
 0x8ec   : > { %v2661_v41 = vadd.f32 %v5012_v37, %v4304_v15  ;;  %v2655_v30 = vpop.f32.mrb[103].mxu0 }
 0x8ed   : > { %v2656_v31 = vadd.f32 %v4304_v15, %v2655_v30 }
 0x8ee   : > { %v2687_v32 = vmax.f32 %v2661_v41, 0.0 }
 0x8ef   : > { %v2686_v33 = vmax.f32 %v2656_v31, 0.0 }
 0x8f1   : > { %5042 = vmatprep.mubr.msk.f32.mxu0 %vm1298_vm2, %v2686_v33 }
 0x8f2   : > { %5043 = vmatmul.mubr.msk.f32.gmra.mrb[118].mxu0 %vm1298_vm2, %v2687_v32 }
 0x8f3   : > { %v5015_v36 = vpop.f32.mrb[104].mxu0 }
 0x8f4   : > { %v2671_v40 = vadd.f32 %v5015_v36, %v4304_v15  ;;  %v2665_v61 = vpop.f32.mrb[105].mxu0 }
 0x8f5   : > { %v2666_v42 = vadd.f32 %v4304_v15, %v2665_v61  ;;  %v4355_v15 = vld [vmem:[%s7161_s7 + $0x198] sm:$0xff] }
 0x8f6   : > { %v2689_v46 = vmax.f32 %v2671_v40, 0.0  ;;  %v5300_v45 = vpack.c.bf16 %v4355_v15, %v4354_v50 }
 0x8f7   : > { %v2688_v44 = vmax.f32 %v2666_v42, 0.0 }
 0x8f8   : > { %5301 = vmatprep.subr.bf16.mxu0 %v5300_v45 }
 0x8f9   : > { %5045 = vmatprep.mubr.msk.f32.mxu0 %vm1298_vm2, %v2688_v44  ;;  %5303 = vmatpush3.bf16.msra.mxu0 %v5300_v45 }
 0x8fa   : > { %5046 = vmatmul.mubr.msk.f32.gmra.mrb[120].mxu0 %vm1298_vm2, %v2689_v46 }
 0x995   : > { %v5026_v1 = vpop.f32.mrb[106].mxu0 }
 0x996   : > { %v2817_v2 = vpop.f32.mrb[107].mxu0  ;;  %v2823_v38 = vadd.f32 %v5026_v1, %v6627_v0 }
 0x997   : > { %v2818_v52 = vadd.f32 %v6627_v0, %v2817_v2 }
 0x998   : > { %v2897_v6 = vmax.f32 %v2823_v38, 0.0 }
 0x999   : > { %v2896_v5 = vmax.f32 %v2818_v52, 0.0 }
 0x99b   : > { %4336 = vmatmul.mubr.msk.f32.vlgmr.msra.gmra.mrb[86].mxu1 %vm1298_vm2, %v2896_v5  ;;  %v4356_v5 = vld [vmem:[%s7161_s7 + $0x1a0] sm:$0xff] }
 0x99c   : > { %3052 = vmatprep.mubr.f32.mxu1 %v5658_v14 }
 0x99d   : > { %v5029_v60 = vpop.f32.mrb[108].mxu0 }
 0x99e   : > { %v2827_v7 = vpop.f32.mrb[109].mxu0  ;;  %v2833_v13 = vadd.f32 %v5029_v60, %v6627_v0 }
 0x99f   : > { %v2828_v11 = vadd.f32 %v6627_v0, %v2827_v7  ;;  %4337 = vmatmul.mubr.msk.f32.gmra.mrb[88].mxu1 %vm1298_vm2, %v2897_v6  ;;  %v4357_v6 = vld [vmem:[%s7161_s7 + $0x1a8] sm:$0xff]  ;;  %v4359_v7 = vld [vmem:[%s7161_s7 + $0x1b8] sm:$0xff] }
 0x9a0   : > { %3058 = vmatprep.mubr.f32.mxu1 %v5658_v14  ;;  %v2899_v9 = vmax.f32 %v2833_v13, 0.0  ;;  %v5304_v60 = vpack.c.bf16 %v4357_v6, %v4356_v5  ;;  %v4360_v13 = vld [vmem:[%s7161_s7 + $0x1c0] sm:$0xff] }
 0x9a1   : > { %v2898_v49 = vmax.f32 %v2828_v11, 0.0 }
 0x9a2   : > { %5305 = vmatprep.subr.bf16.mxu0 %v5304_v60 }
 0x9a3   : > { %4338 = vmatmul.mubr.msk.f32.gmra.mrb[90].mxu1 %vm1298_vm2, %v2898_v49  ;;  %5307 = vmatpush3.bf16.msra.mxu0 %v5304_v60  ;;  %v4361_v49 = vld [vmem:[%s7161_s7 + $0x1c8] sm:$0xff] }
 0x9a4   : > { %3064 = vmatprep.mubr.f32.mxu1 %v5658_v14 }
 0x9a5   : > { %v5032_v16 = vpop.f32.mrb[110].mxu0 }
 0x9a6   : > { %v2837_v8 = vpop.f32.mrb[111].mxu0  ;;  %v2843_v43 = vadd.f32 %v5032_v16, %v6627_v0  ;;  %v4362_v16 = vld [vmem:[%s7161_s7 + $0x1d0] sm:$0xff] }
 0x9a7   : > { %v2838_v19 = vadd.f32 %v6627_v0, %v2837_v8  ;;  %4339 = vmatmul.mubr.msk.f32.gmra.mrb[92].mxu1 %vm1298_vm2, %v2899_v9  ;;  %v5312_v9 = vpack.c.bf16 %v4361_v49, %v4360_v13  ;;  %v4363_v8 = vld [vmem:[%s7161_s7 + $0x1d8] sm:$0xff] }
 0x9a8   : > { %3070 = vmatprep.mubr.f32.mxu1 %v5658_v14  ;;  %v2901_v55 = vmax.f32 %v2843_v43, 0.0  ;;  %v4364_v43 = vld [vmem:[%s7161_s7 + $0x1e0] sm:$0xff]  ;;  %v4373_v13 = vld [vmem:[%s7163_s9 + $0x78] sm:$0xff] }
 0x9a9   : > { %v2900_v22 = vmax.f32 %v2838_v19, 0.0  ;;  %v5316_v19 = vpack.c.bf16 %v4363_v8, %v4362_v16 }
 0x9ab   : > { %4340 = vmatmul.mubr.msk.f32.gmra.mrb[94].mxu1 %vm1298_vm2, %v2900_v22  ;;  %v4365_v22 = vld [vmem:[%s7161_s7 + $0x1e8] sm:$0xff] }
 0x9ac   : > { %3076 = vmatprep.mubr.f32.mxu1 %v5658_v14 }
 0x9ad   : > { %v5035_v23 = vpop.f32.mrb[112].mxu0 }
 0x9ae   : > { %v2847_v20 = vpop.f32.mrb[113].mxu0  ;;  %v2853_v25 = vadd.f32 %v5035_v23, %v6627_v0  ;;  %v4366_v23 = vld [vmem:[%s7161_s7 + $0x1f0] sm:$0xff] }
 0x9af   : > { %v2848_v24 = vadd.f32 %v6627_v0, %v2847_v20  ;;  %4341 = vmatmul.mubr.msk.f32.gmra.mrb[96].mxu1 %vm1298_vm2, %v2901_v55  ;;  %v5320_v55 = vpack.c.bf16 %v4365_v22, %v4364_v43  ;;  %v4367_v20 = vld [vmem:[%s7161_s7 + $0x1f8] sm:$0xff] }
 0x9b0   : > { %3082 = vmatprep.mubr.f32.mxu1 %v5658_v14  ;;  %v2903_v59 = vmax.f32 %v2853_v25, 0.0  ;;  %v4370_v25 = vld [vmem:[%s7163_s9 + $0x60] sm:$0xff] }
 0x9b1   : > { %v2902_v62 = vmax.f32 %v2848_v24, 0.0  ;;  %v5324_v24 = vpack.c.bf16 %v4367_v20, %v4366_v23 }
 0x9b3   : > { %4342 = vmatmul.mubr.msk.f32.gmra.mrb[98].mxu1 %vm1298_vm2, %v2902_v62  ;;  %v4371_v62 = vld [vmem:[%s7163_s9 + $0x68] sm:$0xff] }
 0x9b4   : > { %3088 = vmatprep.mubr.f32.mxu1 %v5658_v14 }
 0x9b5   : > { %v5038_v51 = vpop.f32.mrb[114].mxu0 }
 0x9b6   : > { %v2857_v29 = vpop.f32.mrb[115].mxu0  ;;  %v2863_v41 = vadd.f32 %v5038_v51, %v6627_v0  ;;  %v4335_v51 = vld [vmem:[%s7166_s12 + $0x4] sm:$0x3] }
 0x9b7   : > { %v2858_v37 = vadd.f32 %v6627_v0, %v2857_v29  ;;  %4343 = vmatmul.mubr.msk.f32.gmra.mrb[100].mxu1 %vm1298_vm2, %v2903_v59  ;;  %v5328_v59 = vpack.c.bf16 %v4371_v62, %v4370_v25  ;;  %v6723_v29 = vrot.slane %v4335_v51, %v6193_v58 }
 0x9b8   : > { %3094 = vmatprep.mubr.f32.mxu1 %v5658_v14  ;;  %v2905_v31 = vmax.f32 %v2863_v41, 0.0 }
 0x9b9   : > { %v2904_v30 = vmax.f32 %v2858_v37, 0.0 }
 0x9bb   : > { %4344 = vmatmul.mubr.msk.f32.gmra.mrb[102].mxu1 %vm1298_vm2, %v2904_v30 }
 0x9bc   : > { %3100 = vmatprep.mubr.f32.mxu1 %v5658_v14 }
 0x9bd   : > { %v5041_v33 = vpop.f32.mrb[116].mxu0 }
 0x9be   : > { %v2867_v32 = vpop.f32.mrb[117].mxu0  ;;  %v2873_v40 = vadd.f32 %v5041_v33, %v6627_v0 }
 0x9bf   : > { %v2868_v36 = vadd.f32 %v6627_v0, %v2867_v32  ;;  %4345 = vmatmul.mubr.msk.f32.gmra.mrb[104].mxu1 %vm1298_vm2, %v2905_v31 }
 0x9c0   : > { %3106 = vmatprep.mubr.f32.mxu1 %v5658_v14  ;;  %v2907_v42 = vmax.f32 %v2873_v40, 0.0 }
 0x9c1   : > { %v2906_v61 = vmax.f32 %v2868_v36, 0.0 }
 0x9c3   : > { %4346 = vmatmul.mubr.msk.f32.gmra.mrb[106].mxu1 %vm1298_vm2, %v2906_v61 }
 0x9c4   : > { %3112 = vmatprep.mubr.f32.mxu1 %v5658_v14 }
 0x9c5   : > { %v5044_v44 = vpop.f32.mrb[118].mxu0 }
 0x9c6   : > { %v2877_v46 = vpop.f32.mrb[119].mxu0  ;;  %v2883_v56 = vadd.f32 %v5044_v44, %v6627_v0 }
 0x9c7   : > { %v2878_v54 = vadd.f32 %v6627_v0, %v2877_v46  ;;  %4347 = vmatmul.mubr.msk.f32.gmra.mrb[108].mxu1 %vm1298_vm2, %v2907_v42 }
 0x9c8   : > { %3118 = vmatprep.mubr.f32.mxu1 %v5658_v14  ;;  %v2909_v34 = vmax.f32 %v2883_v56, 0.0  ;;  %v6729_v56 = vrot.slane %v4335_v51, %v6203_v10 }
 0x9c9   : > { %v2908_v50 = vmax.f32 %v2878_v54, 0.0 }
 0x9cb   : > { %4348 = vmatmul.mubr.msk.f32.gmra.mrb[110].mxu1 %vm1298_vm2, %v2908_v50 }
 0x9cc   : > { %3124 = vmatprep.mubr.f32.mxu1 %v5658_v14 }
 0x9cd   : > { %v5047_v15 = vpop.f32.mrb[120].mxu0 }
 0x9ce   : > { %v2887_v45 = vpop.f32.mrb[121].mxu0  ;;  %v2893_v2 = vadd.f32 %v5047_v15, %v6627_v0 }
 0x9cf   : > { %v2888_v1 = vadd.f32 %v6627_v0, %v2887_v45  ;;  %4349 = vmatmul.mubr.msk.f32.gmra.mrb[112].mxu1 %vm1298_vm2, %v2909_v34  ;;  %v4358_v0 = vld [vmem:[%s7161_s7 + $0x1b0] sm:$0xff] }
 0x9d0   : > { %3130 = vmatprep.mubr.f32.mxu1 %v5658_v14  ;;  %v2911_v38 = vmax.f32 %v2893_v2, 0.0  ;;  %v5308_v11 = vpack.c.bf16 %v4359_v7, %v4358_v0 }
 0x9d1   : > { %v2910_v52 = vmax.f32 %v2888_v1, 0.0 }
 0x9d2   : > { %5309 = vmatprep.subr.bf16.mxu0 %v5308_v11 }
 0x9d3   : > { %4350 = vmatmul.mubr.msk.f32.gmra.mrb[114].mxu1 %vm1298_vm2, %v2910_v52  ;;  %5311 = vmatpush3.bf16.msra.mxu0 %v5308_v11  ;;  %v4372_v11 = vld [vmem:[%s7163_s9 + $0x70] sm:$0xff] }
 0x9d4   : > { %3136 = vmatprep.mubr.f32.mxu1 %v5658_v14  ;;  %5313 = vmatprep.subr.bf16.mxu0 %v5312_v9 }
 0x9d7   : > { %4351 = vmatmul.mubr.msk.f32.gmra.mrb[116].mxu1 %vm1298_vm2, %v2911_v38  ;;  %5315 = vmatpush3.bf16.msra.mxu0 %v5312_v9 }
 0x9d8   : > { %3749 = vmatprep.mubr.f32.mxu1 %v5658_v14  ;;  %5317 = vmatprep.subr.bf16.mxu0 %v5316_v19 }
 0x9db   : > { %5319 = vmatpush3.bf16.msra.mxu0 %v5316_v19  ;;  %v5332_v19 = vpack.c.bf16 %v4373_v13, %v4372_v11 }
 0x9dc   : > { %5321 = vmatprep.subr.bf16.mxu0 %v5320_v55 }
 0x9df   : > { %5323 = vmatpush3.bf16.msra.mxu0 %v5320_v55 }
 0x9e0   : > { %5325 = vmatprep.subr.bf16.mxu0 %v5324_v24 }
 0x9e3   : > { %5327 = vmatpush3.bf16.msra.mxu0 %v5324_v24 }
 0x9e4   : > { %5329 = vmatprep.subr.bf16.mxu0 %v5328_v59 }
 0xa6e   : > { %v3048_v37 = vpop.f32.mrb[86].mxu1 }
 0xa6f   : > { %v3050_v41 = vpop.f32.mrb[87].mxu1  ;;  %v3049_v2 = vadd.f32 %v3048_v37, %v6729_v56 }
 0xa70   : > { %v3051_v30 = vadd.f32 %v3050_v41, %v6723_v29 }
 0xa72   : > { %v3143_v31 = vmul.f32 1.442695, %v3051_v30  ;;  %v3054_v33 = vpop.f32.mrb[88].mxu1 }
 0xa73   : > { %v3056_v32 = vpop.f32.mrb[89].mxu1  ;;  %v3055_v49 = vadd.f32 %v3054_v33, %v6729_v56 }
 0xa74   : > { %5466 = vpow2.f32 %v3143_v31  ;;  %v3057_v36 = vadd.f32 %v3056_v32, %v6723_v29 }
 0xa76   : > { %v3145_v40 = vmul.f32 1.442695, %v3057_v36  ;;  %v3060_v61 = vpop.f32.mrb[90].mxu1 }
 0xa77   : > { %v3062_v42 = vpop.f32.mrb[91].mxu1  ;;  %v3061_v23 = vadd.f32 %v3060_v61, %v6729_v56 }
 0xa78   : > { %5468 = vpow2.f32 %v3145_v40  ;;  %v3063_v44 = vadd.f32 %v3062_v42, %v6723_v29 }
 0xa7a   : > { %v3147_v46 = vmul.f32 1.442695, %v3063_v44  ;;  %v3066_v54 = vpop.f32.mrb[92].mxu1 }
 0xa7b   : > { %v3068_v50 = vpop.f32.mrb[93].mxu1  ;;  %v3067_v41 = vadd.f32 %v3066_v54, %v6729_v56 }
 0xa7c   : > { %5470 = vpow2.f32 %v3147_v46  ;;  %v3069_v34 = vadd.f32 %v3068_v50, %v6723_v29 }
 0xa7e   : > { %v5467_v15 = vpop.eup %5466  ;;  %v3149_v45 = vmul.f32 1.442695, %v3069_v34  ;;  %v3072_v1 = vpop.f32.mrb[94].mxu1 }
 0xa7f   : > { %v3074_v52 = vpop.f32.mrb[95].mxu1  ;;  %v3175_v38 = vmul.f32 %v5467_v15, %v6474_v17  ;;  %v3073_v40 = vadd.f32 %v3072_v1, %v6729_v56 }
 0xa80   : > { %5472 = vpow2.f32 %v3149_v45  ;;  %v3075_v5 = vadd.f32 %v3074_v52, %v6723_v29 }
 0xa81   : > { %v6735_v6 = vadd.f32 %v3175_v38, %v3049_v2 }
 0xa82   : > { %v5469_v60 = vpop.eup %5468  ;;  %v3151_v0 = vmul.f32 1.442695, %v3075_v5  ;;  %v3078_v7 = vpop.f32.mrb[96].mxu1 }
 0xa83   : > { %v3176_v17 = vmul.f32 %v5469_v60, %v6486_v27  ;;  %v3080_v9 = vpop.f32.mrb[97].mxu1  ;;  %5080 = vmatprep.mubr.f32.mxu0 %v6735_v6  ;;  %v3079_v34 = vadd.f32 %v3078_v7, %v6729_v56 }
 0xa84   : > { %5474 = vpow2.f32 %v3151_v0  ;;  %v3081_v16 = vadd.f32 %v3080_v9, %v6723_v29 }
 0xa85   : > { %v6747_v8 = vadd.f32 %v3176_v17, %v3055_v49 }
 0xa86   : > { %v5471_v43 = vpop.eup %5470  ;;  %v3153_v22 = vmul.f32 1.442695, %v3081_v16  ;;  %v3084_v55 = vpop.f32.mrb[98].mxu1 }
 0xa87   : > { %v3086_v20 = vpop.f32.mrb[99].mxu1  ;;  %5081 = vmatmul.mubr.f32.vlgmr.msra.gmra.mrb[122].mxu0 %v6747_v8  ;;  %v3177_v24 = vmul.f32 %v5471_v43, %v6492_v35  ;;  %v3085_v5 = vadd.f32 %v3084_v55, %v6729_v56 }
 0xa88   : > { %5476 = vpow2.f32 %v3153_v22  ;;  %v3087_v27 = vadd.f32 %v3086_v20, %v6723_v29  ;;  %5331 = vmatpush3.bf16.msra.mxu0 %v5328_v59 }
 0xa89   : > { %v6753_v25 = vadd.f32 %v3177_v24, %v3061_v23  ;;  %5333 = vmatprep.subr.bf16.mxu0 %v5332_v19 }
 0xa8a   : > { %v5473_v62 = vpop.eup %5472  ;;  %v3155_v51 = vmul.f32 1.442695, %v3087_v27  ;;  %v3090_v37 = vpop.f32.mrb[100].mxu1 }
 0xa8b   : > { %v3092_v30 = vpop.f32.mrb[101].mxu1  ;;  %5083 = vmatprep.mubr.f32.mxu0 %v6753_v25  ;;  %v3178_v31 = vmul.f32 %v5473_v62, %v6498_v48  ;;  %v3091_v17 = vadd.f32 %v3090_v37, %v6729_v56 }
 0xa8c   : > { %5478 = vpow2.f32 %v3155_v51  ;;  %v3093_v35 = vadd.f32 %v3092_v30, %v6723_v29  ;;  %5335 = vmatpush3.bf16.msra.mxu0 %v5332_v19 }
 0xa8d   : > { %v6759_v33 = vadd.f32 %v3178_v31, %v3067_v41 }
 0xa8e   : > { %v5475_v59 = vpop.eup %5474  ;;  %v3157_v32 = vmul.f32 1.442695, %v3093_v35  ;;  %v3096_v36 = vpop.f32.mrb[102].mxu1 }
 0xa8f   : > { %v3098_v61 = vpop.f32.mrb[103].mxu1  ;;  %5084 = vmatmul.mubr.f32.gmra.mrb[124].mxu0 %v6759_v33  ;;  %v3179_v42 = vmul.f32 %v5475_v59, %v6504_v4  ;;  %v3097_v23 = vadd.f32 %v3096_v36, %v6729_v56 }
 0xa90   : > { %5480 = vpow2.f32 %v3157_v32  ;;  %v3099_v44 = vadd.f32 %v3098_v61, %v6723_v29 }
 0xa91   : > { %v6765_v48 = vadd.f32 %v3179_v42, %v3073_v40 }
 0xa92   : > { %v5477_v46 = vpop.eup %5476  ;;  %v3159_v54 = vmul.f32 1.442695, %v3099_v44  ;;  %v3102_v50 = vpop.f32.mrb[104].mxu1 }
 0xa93   : > { %v3104_v15 = vpop.f32.mrb[105].mxu1  ;;  %5086 = vmatprep.mubr.f32.mxu0 %v6765_v48  ;;  %v3180_v45 = vmul.f32 %v5477_v46, %v6510_v12  ;;  %v3103_v41 = vadd.f32 %v3102_v50, %v6729_v56 }
 0xa94   : > { %5482 = vpow2.f32 %v3159_v54  ;;  %v3105_v1 = vadd.f32 %v3104_v15, %v6723_v29 }
 0xa95   : > { %v6771_v2 = vadd.f32 %v3180_v45, %v3079_v34 }
 0xa96   : > { %v5479_v4 = vpop.eup %5478  ;;  %v3161_v52 = vmul.f32 1.442695, %v3105_v1  ;;  %v3108_v38 = vpop.f32.mrb[106].mxu1 }
 0xa97   : > { %v3110_v60 = vpop.f32.mrb[107].mxu1  ;;  %5087 = vmatmul.mubr.f32.gmra.mrb[126].mxu0 %v6771_v2  ;;  %v3181_v0 = vmul.f32 %v5479_v4, %v6516_v21  ;;  %v3109_v40 = vadd.f32 %v3108_v38, %v6729_v56 }
 0xa98   : > { %5484 = vpow2.f32 %v3161_v52  ;;  %v3111_v7 = vadd.f32 %v3110_v60, %v6723_v29 }
 0xa99   : > { %v6777_v11 = vadd.f32 %v3181_v0, %v3085_v5 }
 0xa9a   : > { %v5481_v12 = vpop.eup %5480  ;;  %v3163_v13 = vmul.f32 1.442695, %v3111_v7  ;;  %v3114_v49 = vpop.f32.mrb[108].mxu1 }
 0xa9b   : > { %v3116_v9 = vpop.f32.mrb[109].mxu1  ;;  %5089 = vmatprep.mubr.f32.mxu0 %v6777_v11  ;;  %v3182_v16 = vmul.f32 %v5481_v12, %v6522_v53  ;;  %v3115_v34 = vadd.f32 %v3114_v49, %v6729_v56 }
 0xa9c   : > { %5486 = vpow2.f32 %v3163_v13  ;;  %v3117_v19 = vadd.f32 %v3116_v9, %v6723_v29 }
 0xa9d   : > { %v6783_v43 = vadd.f32 %v3182_v16, %v3091_v17 }
 0xa9e   : > { %v5483_v21 = vpop.eup %5482  ;;  %v3165_v22 = vmul.f32 1.442695, %v3117_v19  ;;  %v3120_v55 = vpop.f32.mrb[110].mxu1 }
 0xa9f   : > { %v3122_v20 = vpop.f32.mrb[111].mxu1  ;;  %5090 = vmatmul.mubr.f32.gmra.mrb[128].mxu0 %v6783_v43  ;;  %v3183_v24 = vmul.f32 %v5483_v21, %v6528_v57  ;;  %v3121_v38 = vadd.f32 %v3120_v55, %v6729_v56  ;;  %v4399_v55 = vld [vmem:[%s7165_s11 + $0xf8] sm:$0xff] }
 0xaa0   : > { %5488 = vpow2.f32 %v3165_v22  ;;  %v3123_v27 = vadd.f32 %v3122_v20, %v6723_v29  ;;  %v4397_v22 = vld [vmem:[%s7165_s11 + $0xe8] sm:$0xff] }
 0xaa1   : > { %v6789_v62 = vadd.f32 %v3183_v24, %v3097_v23  ;;  %v5340_v20 = vpack.c.bf16 %v4399_v55, %v4397_v22  ;;  %v4396_v24 = vld [vmem:[%s7165_s11 + $0xe0] sm:$0xff] }
 0xaa2   : > { %v5485_v53 = vpop.eup %5484  ;;  %v3167_v51 = vmul.f32 1.442695, %v3123_v27  ;;  %v3126_v37 = vpop.f32.mrb[112].mxu1  ;;  %v4398_v27 = vld [vmem:[%s7165_s11 + $0xf0] sm:$0xff] }
 0xaa3   : > { %v3128_v30 = vpop.f32.mrb[113].mxu1  ;;  %5092 = vmatprep.mubr.f32.mxu0 %v6789_v62  ;;  %v3184_v31 = vmul.f32 %v5485_v53, %v6534_v63  ;;  %v3127_v7 = vadd.f32 %v3126_v37, %v6729_v56  ;;  %v5342_v53 = vpack.c.bf16 %v4398_v27, %v4396_v24 }
 0xaa4   : > { %5490 = vpow2.f32 %v3167_v51  ;;  %v3129_v35 = vadd.f32 %v3128_v30, %v6723_v29  ;;  %v4369_v51 = vld [vmem:[%s7162_s8 + $0x3] ss:$0 sm:$0xff] }
 0xaa5   : > { %v6795_v59 = vadd.f32 %v3184_v31, %v3103_v41 }
 0xaa6   : > { %v5487_v57 = vpop.eup %5486  ;;  %v3169_v32 = vmul.f32 1.442695, %v3129_v35  ;;  %v3132_v36 = vpop.f32.mrb[114].mxu1 }
 0xaa7   : > { %v3134_v61 = vpop.f32.mrb[115].mxu1  ;;  %5093 = vmatmul.mubr.f32.gmra.mrb[130].mxu0 %v6795_v59  ;;  %v3185_v42 = vmul.f32 %v5487_v57, %v6540_v3  ;;  %v3133_v13 = vadd.f32 %v3132_v36, %v6729_v56 }
 0xaa8   : > { %5492 = vpow2.f32 %v3169_v32  ;;  %v3135_v44 = vadd.f32 %v3134_v61, %v6723_v29 }
 0xaa9   : > { %v6801_v46 = vadd.f32 %v3185_v42, %v3109_v40 }
 0xaaa   : > { %v5489_v63 = vpop.eup %5488  ;;  %v3171_v54 = vmul.f32 1.442695, %v3135_v44  ;;  %v3138_v50 = vpop.f32.mrb[116].mxu1 }
 0xaab   : > { %v3140_v15 = vpop.f32.mrb[117].mxu1  ;;  %5095 = vmatprep.mubr.f32.mxu0 %v6801_v46  ;;  %v3186_v45 = vmul.f32 %v5489_v63, %v6546_v39  ;;  %v3139_v9 = vadd.f32 %v3138_v50, %v6729_v56  ;;  %v4392_v56 = vld [vmem:[%s7165_s11 + $0xc0] sm:$0xff] }
 0xaac   : > { %5494 = vpow2.f32 %v3171_v54  ;;  %v3141_v1 = vadd.f32 %v3140_v15, %v6723_v29 }
 0xaad   : > { %v6807_v4 = vadd.f32 %v3186_v45, %v3115_v34 }
 0xaae   : > { %v5491_v3 = vpop.eup %5490  ;;  %v3173_v52 = vmul.f32 1.442695, %v3141_v1 }
 0xaaf   : > { %5096 = vmatmul.mubr.f32.gmra.mrb[132].mxu0 %v6807_v4  ;;  %v3187_v5 = vmul.f32 %v5491_v3, %v6551_v18 }
 0xab0   : > { %5496 = vpow2.f32 %v3173_v52 }
 0xab1   : > { %v6812_v60 = vadd.f32 %v3187_v5, %v3121_v38 }
 0xab2   : > { %v5493_v0 = vpop.eup %5492 }
 0xab3   : > { %5098 = vmatprep.mubr.f32.mxu0 %v6812_v60  ;;  %v3188_v39 = vmul.f32 %v5493_v0, %v6556_v47  ;;  %v4393_v47 = vld [vmem:[%s7165_s11 + $0xc8] sm:$0xff] }
 0xab5   : > { %v6817_v29 = vadd.f32 %v3188_v39, %v3127_v7 }
 0xab6   : > { %v5495_v12 = vpop.eup %5494 }
 0xab7   : > { %5099 = vmatmul.mubr.f32.gmra.mrb[134].mxu0 %v6817_v29  ;;  %v3189_v49 = vmul.f32 %v5495_v12, %v6561_v26  ;;  %v4395_v26 = vld [vmem:[%s7165_s11 + $0xd8] sm:$0xff] }
 0xab8   : > { %v5336_v21 = vpack.c.bf16 %v4395_v26, %v4393_v47 }
 0xab9   : > { %v6822_v18 = vadd.f32 %v3189_v49, %v3133_v13 }
 0xaba   : > { %v5497_v17 = vpop.eup %5496  ;;  %5337 = vmatprep.subr.bf16.mxu1 %v5336_v21 }
 0xabb   : > { %5101 = vmatprep.mubr.f32.mxu0 %v6822_v18  ;;  %v3190_v16 = vmul.f32 %v5497_v17, %v6566_v28  ;;  %v4394_v28 = vld [vmem:[%s7165_s11 + $0xd0] sm:$0xff] }
 0xabc   : > { %v5338_v23 = vpack.c.bf16 %v4394_v28, %v4392_v56 }
 0xabd   : > { %v6827_v19 = vadd.f32 %v3190_v16, %v3139_v9 }
 0xabe   : > { %5339 = vmatpush1.bf16.msra.mxu1 %v5338_v23 }
 0xabf   : > { %5102 = vmatmul.mubr.f32.gmra.mrb[136].mxu0 %v6827_v19  ;;  %5341 = vmatprep.subr.bf16.mxu1 %v5340_v20 }
 0xac2   : > { %5343 = vmatpush1.bf16.msra.mxu1 %v5342_v53 }
 0xb5a   : > { %v5082_v37 = vpop.f32.mrb[122].mxu0 }
 0xb5b   : > { %v3304_v41 = vadd.f32 %v5082_v37, %v4369_v51  ;;  %v3298_v30 = vpop.f32.mrb[123].mxu0 }
 0xb5c   : > { %v3299_v31 = vadd.f32 %v4369_v51, %v3298_v30 }
 0xb5d   : > { %v3378_v57 = vmax.f32 %v3304_v41, 0.0 }
 0xb5e   : > { %v3377_v35 = vmax.f32 %v3299_v31, 0.0 }
 0xb60   : > { %5112 = vmatprep.mubr.msk.f32.mxu0 %vm1298_vm2, %v3377_v35  ;;  %v6876_v35 = vld [vmem:[%s7164_s10 + $0x3] ss:$0 sm:$0xff] }
 0xb61   : > { %5113 = vmatmul.mubr.msk.f32.vlgmr.msra.gmra.mrb[138].mxu0 %vm1298_vm2, %v3378_v57 }
 0xb62   : > { %v5085_v32 = vpop.f32.mrb[124].mxu0 }
 0xb63   : > { %v3314_v36 = vadd.f32 %v5085_v32, %v4369_v51  ;;  %v3308_v40 = vpop.f32.mrb[125].mxu0 }
 0xb64   : > { %v3309_v61 = vadd.f32 %v4369_v51, %v3308_v40 }
 0xb65   : > { %v3380_v44 = vmax.f32 %v3314_v36, 0.0 }
 0xb66   : > { %v3379_v42 = vmax.f32 %v3309_v61, 0.0 }
 0xb68   : > { %5115 = vmatprep.mubr.msk.f32.mxu0 %vm1298_vm2, %v3379_v42 }
 0xb69   : > { %5116 = vmatmul.mubr.msk.f32.gmra.mrb[140].mxu0 %vm1298_vm2, %v3380_v44 }
 0xb6a   : > { %v5088_v63 = vpop.f32.mrb[126].mxu0 }
 0xb6b   : > { %v3324_v54 = vadd.f32 %v5088_v63, %v4369_v51  ;;  %v3318_v50 = vpop.f32.mrb[127].mxu0 }
 0xb6c   : > { %v3319_v34 = vadd.f32 %v4369_v51, %v3318_v50 }
 0xb6d   : > { %v3382_v45 = vmax.f32 %v3324_v54, 0.0 }
 0xb6e   : > { %v3381_v15 = vmax.f32 %v3319_v34, 0.0 }
 0xb70   : > { %5118 = vmatprep.mubr.msk.f32.mxu0 %vm1298_vm2, %v3381_v15 }
 0xb71   : > { %5119 = vmatmul.mubr.msk.f32.gmra.mrb[142].mxu0 %vm1298_vm2, %v3382_v45 }
 0xb72   : > { %v5091_v1 = vpop.f32.mrb[128].mxu0 }
 0xb73   : > { %v3334_v3 = vadd.f32 %v5091_v1, %v4369_v51  ;;  %v3328_v52 = vpop.f32.mrb[129].mxu0 }
 0xb74   : > { %v3329_v38 = vadd.f32 %v4369_v51, %v3328_v52 }
 0xb75   : > { %v3384_v0 = vmax.f32 %v3334_v3, 0.0 }
 0xb76   : > { %v3383_v5 = vmax.f32 %v3329_v38, 0.0 }
 0xb78   : > { %5121 = vmatprep.mubr.msk.f32.mxu0 %vm1298_vm2, %v3383_v5 }
 0xb79   : > { %5122 = vmatmul.mubr.msk.f32.gmra.mrb[144].mxu0 %vm1298_vm2, %v3384_v0 }
 0xb7a   : > { %v5094_v7 = vpop.f32.mrb[130].mxu0 }
 0xb7b   : > { %v3344_v39 = vadd.f32 %v5094_v7, %v4369_v51  ;;  %v3338_v12 = vpop.f32.mrb[131].mxu0 }
 0xb7c   : > { %v3339_v13 = vadd.f32 %v4369_v51, %v3338_v12 }
 0xb7d   : > { %v3386_v17 = vmax.f32 %v3344_v39, 0.0 }
 0xb7e   : > { %v3385_v49 = vmax.f32 %v3339_v13, 0.0 }
 0xb80   : > { %5124 = vmatprep.mubr.msk.f32.mxu0 %vm1298_vm2, %v3385_v49 }
 0xb81   : > { %5125 = vmatmul.mubr.msk.f32.gmra.mrb[146].mxu0 %vm1298_vm2, %v3386_v17 }
 0xb82   : > { %v5097_v9 = vpop.f32.mrb[132].mxu0 }
 0xb83   : > { %v3354_v16 = vadd.f32 %v5097_v9, %v4369_v51  ;;  %v3348_v47 = vpop.f32.mrb[133].mxu0 }
 0xb84   : > { %v3349_v26 = vadd.f32 %v4369_v51, %v3348_v47 }
 0xb85   : > { %v3388_v21 = vmax.f32 %v3354_v16, 0.0 }
 0xb86   : > { %v3387_v56 = vmax.f32 %v3349_v26, 0.0 }
 0xb88   : > { %5127 = vmatprep.mubr.msk.f32.mxu0 %vm1298_vm2, %v3387_v56 }
 0xb89   : > { %5128 = vmatmul.mubr.msk.f32.gmra.mrb[148].mxu0 %vm1298_vm2, %v3388_v21 }
 0xb8a   : > { %v5100_v28 = vpop.f32.mrb[134].mxu0 }
 0xb8b   : > { %v3364_v22 = vadd.f32 %v5100_v28, %v4369_v51  ;;  %v3358_v55 = vpop.f32.mrb[135].mxu0 }
 0xb8c   : > { %v3359_v23 = vadd.f32 %v4369_v51, %v3358_v55 }
 0xb8d   : > { %v3390_v24 = vmax.f32 %v3364_v22, 0.0 }
 0xb8e   : > { %v3389_v20 = vmax.f32 %v3359_v23, 0.0 }
 0xb90   : > { %5130 = vmatprep.mubr.msk.f32.mxu0 %vm1298_vm2, %v3389_v20 }
 0xb91   : > { %5131 = vmatmul.mubr.msk.f32.gmra.mrb[150].mxu0 %vm1298_vm2, %v3390_v24 }
 0xb92   : > { %v5103_v27 = vpop.f32.mrb[136].mxu0 }
 0xb93   : > { %v3374_v53 = vadd.f32 %v5103_v27, %v4369_v51  ;;  %v3368_v37 = vpop.f32.mrb[137].mxu0 }
 0xb94   : > { %v3369_v41 = vadd.f32 %v4369_v51, %v3368_v37 }
 0xb95   : > { %v3392_v31 = vmax.f32 %v3374_v53, 0.0 }
 0xb96   : > { %v3391_v30 = vmax.f32 %v3369_v41, 0.0 }
 0xb98   : > { %5133 = vmatprep.mubr.msk.f32.mxu0 %vm1298_vm2, %v3391_v30 }
 0xb99   : > { %5134 = vmatmul.mubr.msk.f32.gmra.mrb[152].mxu0 %vm1298_vm2, %v3392_v31 }
 0xc34   : > { %v5114_v57 = vpop.f32.mrb[138].mxu0 }
 0xc35   : > { %v3520_v32 = vpop.f32.mrb[139].mxu0  ;;  %v3526_v40 = vadd.f32 %v5114_v57, %v6876_v35 }
 0xc36   : > { %v3521_v36 = vadd.f32 %v6876_v35, %v3520_v32 }
 0xc37   : > { %v3600_v51 = vmax.f32 %v3526_v40, 0.0 }
 0xc38   : > { %v3599_v61 = vmax.f32 %v3521_v36, 0.0 }
 0xc3a   : > { %4401 = vmatmul.mubr.msk.f32.vlgmr.msra.gmra.mrb[118].mxu1 %vm1298_vm2, %v3599_v61  ;;  %v4400_v61 = vld [vmem:[%s7166_s12 + $0x6] sm:$0x3] }
 0xc3b   : > { %3755 = vmatprep.mubr.f32.mxu1 %v5658_v14 }
 0xc3c   : > { %v5117_v42 = vpop.f32.mrb[140].mxu0 }
 0xc3d   : > { %v3530_v44 = vpop.f32.mrb[141].mxu0  ;;  %v3536_v54 = vadd.f32 %v5117_v42, %v6876_v35 }
 0xc3e   : > { %v3531_v63 = vadd.f32 %v6876_v35, %v3530_v44  ;;  %4402 = vmatmul.mubr.msk.f32.gmra.mrb[120].mxu1 %vm1298_vm2, %v3600_v51  ;;  %v6929_v51 = vrot.slane %v4400_v61, %v6193_v58  ;;  %v6935_v58 = vrot.slane %v4400_v61, %v6203_v10 }
 0xc3f   : > { %3761 = vmatprep.mubr.f32.mxu1 %v5658_v14  ;;  %v3602_v34 = vmax.f32 %v3536_v54, 0.0 }
 0xc40   : > { %v3601_v50 = vmax.f32 %v3531_v63, 0.0 }
 0xc42   : > { %4403 = vmatmul.mubr.msk.f32.gmra.mrb[122].mxu1 %vm1298_vm2, %v3601_v50 }
 0xc43   : > { %3767 = vmatprep.mubr.f32.mxu1 %v5658_v14 }
 0xc44   : > { %v5120_v15 = vpop.f32.mrb[142].mxu0 }
 0xc45   : > { %v3540_v45 = vpop.f32.mrb[143].mxu0  ;;  %v3546_v3 = vadd.f32 %v5120_v15, %v6876_v35 }
 0xc46   : > { %v3541_v1 = vadd.f32 %v6876_v35, %v3540_v45  ;;  %4404 = vmatmul.mubr.msk.f32.gmra.mrb[124].mxu1 %vm1298_vm2, %v3602_v34 }
 0xc47   : > { %3773 = vmatprep.mubr.f32.mxu1 %v5658_v14  ;;  %v3604_v38 = vmax.f32 %v3546_v3, 0.0 }
 0xc48   : > { %v3603_v52 = vmax.f32 %v3541_v1, 0.0 }
 0xc4a   : > { %4405 = vmatmul.mubr.msk.f32.gmra.mrb[126].mxu1 %vm1298_vm2, %v3603_v52 }
 0xc4b   : > { %3779 = vmatprep.mubr.f32.mxu1 %v5658_v14 }
 0xc4c   : > { %v5123_v5 = vpop.f32.mrb[144].mxu0 }
 0xc4d   : > { %v3550_v0 = vpop.f32.mrb[145].mxu0  ;;  %v3556_v39 = vadd.f32 %v5123_v5, %v6876_v35 }
 0xc4e   : > { %v3551_v7 = vadd.f32 %v6876_v35, %v3550_v0  ;;  %4406 = vmatmul.mubr.msk.f32.gmra.mrb[128].mxu1 %vm1298_vm2, %v3604_v38 }
 0xc4f   : > { %3785 = vmatprep.mubr.f32.mxu1 %v5658_v14  ;;  %v3606_v13 = vmax.f32 %v3556_v39, 0.0 }
 0xc50   : > { %v3605_v12 = vmax.f32 %v3551_v7, 0.0 }
 0xc52   : > { %4407 = vmatmul.mubr.msk.f32.gmra.mrb[130].mxu1 %vm1298_vm2, %v3605_v12 }
 0xc53   : > { %3791 = vmatprep.mubr.f32.mxu1 %v5658_v14 }
 0xc54   : > { %v5126_v49 = vpop.f32.mrb[146].mxu0 }
 0xc55   : > { %v3560_v17 = vpop.f32.mrb[147].mxu0  ;;  %v3566_v16 = vadd.f32 %v5126_v49, %v6876_v35 }
 0xc56   : > { %v3561_v9 = vadd.f32 %v6876_v35, %v3560_v17  ;;  %4408 = vmatmul.mubr.msk.f32.gmra.mrb[132].mxu1 %vm1298_vm2, %v3606_v13 }
 0xc57   : > { %3797 = vmatprep.mubr.f32.mxu1 %v5658_v14  ;;  %v3608_v26 = vmax.f32 %v3566_v16, 0.0 }
 0xc58   : > { %v3607_v47 = vmax.f32 %v3561_v9, 0.0 }
 0xc5a   : > { %4409 = vmatmul.mubr.msk.f32.gmra.mrb[134].mxu1 %vm1298_vm2, %v3607_v47 }
 0xc5b   : > { %3803 = vmatprep.mubr.f32.mxu1 %v5658_v14 }
 0xc5c   : > { %v5129_v56 = vpop.f32.mrb[148].mxu0 }
 0xc5d   : > { %v3570_v21 = vpop.f32.mrb[149].mxu0  ;;  %v3576_v22 = vadd.f32 %v5129_v56, %v6876_v35 }
 0xc5e   : > { %v3571_v28 = vadd.f32 %v6876_v35, %v3570_v21  ;;  %4410 = vmatmul.mubr.msk.f32.gmra.mrb[136].mxu1 %vm1298_vm2, %v3608_v26 }
 0xc5f   : > { %3809 = vmatprep.mubr.f32.mxu1 %v5658_v14  ;;  %v3610_v23 = vmax.f32 %v3576_v22, 0.0 }
 0xc60   : > { %v3609_v55 = vmax.f32 %v3571_v28, 0.0 }
 0xc62   : > { %4411 = vmatmul.mubr.msk.f32.gmra.mrb[138].mxu1 %vm1298_vm2, %v3609_v55 }
 0xc63   : > { %3815 = vmatprep.mubr.f32.mxu1 %v5658_v14 }
 0xc64   : > { %v5132_v20 = vpop.f32.mrb[150].mxu0 }
 0xc65   : > { %v3580_v24 = vpop.f32.mrb[151].mxu0  ;;  %v3586_v53 = vadd.f32 %v5132_v20, %v6876_v35 }
 0xc66   : > { %v3581_v27 = vadd.f32 %v6876_v35, %v3580_v24  ;;  %4412 = vmatmul.mubr.msk.f32.gmra.mrb[140].mxu1 %vm1298_vm2, %v3610_v23 }
 0xc67   : > { %3821 = vmatprep.mubr.f32.mxu1 %v5658_v14  ;;  %v3612_v41 = vmax.f32 %v3586_v53, 0.0 }
 0xc68   : > { %v3611_v37 = vmax.f32 %v3581_v27, 0.0 }
 0xc6a   : > { %4413 = vmatmul.mubr.msk.f32.gmra.mrb[142].mxu1 %vm1298_vm2, %v3611_v37 }
 0xc6b   : > { %3827 = vmatprep.mubr.f32.mxu1 %v5658_v14 }
 0xc6c   : > { %v5135_v30 = vpop.f32.mrb[152].mxu0 }
 0xc6d   : > { %v3590_v31 = vpop.f32.mrb[153].mxu0  ;;  %v3596_v32 = vadd.f32 %v5135_v30, %v6876_v35 }
 0xc6e   : > { %v3591_v57 = vadd.f32 %v6876_v35, %v3590_v31  ;;  %4414 = vmatmul.mubr.msk.f32.gmra.mrb[144].mxu1 %vm1298_vm2, %v3612_v41 }
 0xc6f   : > { %3833 = vmatprep.mubr.f32.mxu1 %v5658_v14  ;;  %v3614_v40 = vmax.f32 %v3596_v32, 0.0 }
 0xc70   : > { %v3613_v36 = vmax.f32 %v3591_v57, 0.0 }
 0xc72   : > { %4415 = vmatmul.mubr.msk.f32.gmra.mrb[146].mxu1 %vm1298_vm2, %v3613_v36 }
 0xc73   : > { %3839 = vmatprep.mubr.f32.mxu1 %v5658_v14 }
 0xc76   : > { %4416 = vmatmul.mubr.msk.f32.gmra.mrb[148].mxu1 %vm1298_vm2, %v3614_v40 }
 0xd0d   : > { %v3751_v42 = vpop.f32.mrb[118].mxu1 }
 0xd0e   : > { %v3753_v44 = vpop.f32.mrb[119].mxu1  ;;  %v3752_v12 = vadd.f32 %v3751_v42, %v6935_v58 }
 0xd0f   : > { %v3754_v63 = vadd.f32 %v3753_v44, %v6929_v51 }
 0xd11   : > { %v3846_v35 = vmul.f32 1.442695, %v3754_v63  ;;  %v3757_v54 = vpop.f32.mrb[120].mxu1 }
 0xd12   : > { %v3759_v50 = vpop.f32.mrb[121].mxu1  ;;  %v3758_v56 = vadd.f32 %v3757_v54, %v6935_v58 }
 0xd13   : > { %5498 = vpow2.f32 %v3846_v35  ;;  %v3760_v14 = vadd.f32 %v3759_v50, %v6929_v51 }
 0xd15   : > { %v3848_v34 = vmul.f32 1.442695, %v3760_v14  ;;  %v3763_v15 = vpop.f32.mrb[122].mxu1 }
 0xd16   : > { %v3765_v45 = vpop.f32.mrb[123].mxu1  ;;  %v3764_v53 = vadd.f32 %v3763_v15, %v6935_v58 }
 0xd17   : > { %5500 = vpow2.f32 %v3848_v34  ;;  %v3766_v1 = vadd.f32 %v3765_v45, %v6929_v51 }
 0xd19   : > { %v3850_v3 = vmul.f32 1.442695, %v3766_v1  ;;  %v3769_v52 = vpop.f32.mrb[124].mxu1 }
 0xd1a   : > { %v3771_v38 = vpop.f32.mrb[125].mxu1  ;;  %v3770_v61 = vadd.f32 %v3769_v52, %v6935_v58 }
 0xd1b   : > { %5502 = vpow2.f32 %v3850_v3  ;;  %v3772_v5 = vadd.f32 %v3771_v38, %v6929_v51 }
 0xd1d   : > { %v5499_v0 = vpop.eup %5498  ;;  %v3852_v7 = vmul.f32 1.442695, %v3772_v5  ;;  %v3775_v39 = vpop.f32.mrb[126].mxu1 }
 0xd1e   : > { %v3878_v13 = vmul.f32 %v5499_v0, %v6735_v6  ;;  %v3777_v49 = vpop.f32.mrb[127].mxu1  ;;  %v3776_v15 = vadd.f32 %v3775_v39, %v6935_v58 }
 0xd1f   : > { %5504 = vpow2.f32 %v3852_v7  ;;  %v3778_v17 = vadd.f32 %v3777_v49, %v6929_v51 }
 0xd20   : > { %v6941_v9 = vadd.f32 %v3878_v13, %v3752_v12 }
 0xd21   : > { %v5501_v16 = vpop.eup %5500  ;;  %v3854_v10 = vmul.f32 1.442695, %v3778_v17  ;;  %v3781_v47 = vpop.f32.mrb[128].mxu1 }
 0xd22   : > { %v3926_v26 = vmin.f32 %v6941_v9, 20.0  ;;  %v3879_v21 = vmul.f32 %v5501_v16, %v6747_v8  ;;  %v3783_v28 = vpop.f32.mrb[129].mxu1  ;;  %v3782_v39 = vadd.f32 %v3781_v47, %v6935_v58  ;;  %vm3910_vm3 = vcmp.gt.f32.partialorder %v6941_v9, 20.0 }
 0xd23   : > { %5506 = vpow2.f32 %v3854_v10  ;;  %v3784_v22 = vadd.f32 %v3783_v28, %v6929_v51 }
 0xd24   : > { %v3942_v6 = vmul.f32 1.442695, %v3926_v26  ;;  %v6947_v55 = vadd.f32 %v3879_v21, %v3758_v56 }
 0xd25   : > { %v5503_v23 = vpop.eup %5502  ;;  %v3856_v20 = vmul.f32 1.442695, %v3784_v22  ;;  %v3787_v24 = vpop.f32.mrb[130].mxu1 }
 0xd26   : > { %5508 = vpow2.f32 %v3942_v6  ;;  %v3927_v27 = vmin.f32 %v6947_v55, 20.0  ;;  %v3880_v37 = vmul.f32 %v5503_v23, %v6753_v25  ;;  %v3789_v41 = vpop.f32.mrb[131].mxu1  ;;  %vm3911_vm4 = vcmp.gt.f32.partialorder %v6947_v55, 20.0 }
 0xd27   : > { %5510 = vpow2.f32 %v3856_v20  ;;  %v3790_v8 = vadd.f32 %v3789_v41, %v6929_v51 }
 0xd28   : > { %v3944_v30 = vmul.f32 1.442695, %v3927_v27  ;;  %v6953_v31 = vadd.f32 %v3880_v37, %v3764_v53 }
 0xd29   : > { %v5505_v57 = vpop.eup %5504  ;;  %v3858_v32 = vmul.f32 1.442695, %v3790_v8  ;;  %v3793_v36 = vpop.f32.mrb[132].mxu1 }
 0xd2a   : > { %5512 = vpow2.f32 %v3944_v30  ;;  %v3928_v40 = vmin.f32 %v6953_v31, 20.0  ;;  %v3881_v42 = vmul.f32 %v5505_v57, %v6759_v33  ;;  %v3795_v44 = vpop.f32.mrb[133].mxu1  ;;  %vm3912_vm5 = vcmp.gt.f32.partialorder %v6953_v31, 20.0 }
 0xd2b   : > { %5514 = vpow2.f32 %v3858_v32  ;;  %v3796_v25 = vadd.f32 %v3795_v44, %v6929_v51 }
 0xd2c   : > { %v3946_v63 = vmul.f32 1.442695, %v3928_v40  ;;  %v6959_v35 = vadd.f32 %v3881_v42, %v3770_v61 }
 0xd2d   : > { %v5507_v54 = vpop.eup %5506  ;;  %v3860_v50 = vmul.f32 1.442695, %v3796_v25  ;;  %v6961_v14 = vpop.f32.mrb[134].mxu1 }
 0xd2e   : > { %5516 = vpow2.f32 %v3946_v63  ;;  %v3929_v34 = vmin.f32 %v6959_v35, 20.0  ;;  %v3882_v45 = vmul.f32 %v5507_v54, %v6765_v48  ;;  %v3801_v1 = vpop.f32.mrb[135].mxu1  ;;  %vm3913_vm6 = vcmp.gt.f32.partialorder %v6959_v35, 20.0 }
 0xd2f   : > { %5518 = vpow2.f32 %v3860_v50  ;;  %v3802_v33 = vadd.f32 %v3801_v1, %v6929_v51  ;;  %v3800_v1 = vadd.f32 %v6961_v14, %v6935_v58 }
 0xd30   : > { %v5509_v3 = vpop.eup %5508  ;;  %v3948_v52 = vmul.f32 1.442695, %v3929_v34  ;;  %v6967_v38 = vadd.f32 %v3882_v45, %v3776_v15 }
 0xd31   : > { %v5511_v5 = vpop.eup %5510  ;;  %v3974_v0 = vadd.f32 1.0, %v5509_v3  ;;  %v3862_v7 = vmul.f32 1.442695, %v3802_v33  ;;  %v6969_v12 = vpop.f32.mrb[136].mxu1 }
 0xd32   : > { %5520 = vpow2.f32 %v3948_v52  ;;  %v3930_v13 = vmin.f32 %v6967_v38, 20.0  ;;  %v3883_v48 = vmul.f32 %v5511_v5, %v6771_v2  ;;  %v3807_v49 = vpop.f32.mrb[137].mxu1  ;;  %v3788_v2 = vadd.f32 %v3787_v24, %v6935_v58 }
 0xd33   : > { %5522 = vlog2.f32 %v3974_v0  ;;  %v3808_v17 = vadd.f32 %v3807_v49, %v6929_v51  ;;  %vm3914_vm7 = vcmp.gt.f32.partialorder %v6967_v38, 20.0 }
 0xd34   : > { %v5513_v16 = vpop.eup %5512  ;;  %v3950_v10 = vmul.f32 1.442695, %v3930_v13  ;;  %v6975_v26 = vadd.f32 %v3883_v48, %v3782_v39  ;;  %5524 = vpow2.f32 %v3862_v7 }
 0xd35   : > { %v5515_v56 = vpop.eup %5514  ;;  %v3975_v21 = vadd.f32 1.0, %v5513_v16  ;;  %v3864_v28 = vmul.f32 1.442695, %v3808_v17  ;;  %v6977_v22 = vpop.f32.mrb[138].mxu1  ;;  %v3806_v16 = vadd.f32 %v6969_v12, %v6935_v58 }
 0xd36   : > { %5526 = vpow2.f32 %v3950_v10  ;;  %v3931_v47 = vmin.f32 %v6975_v26, 20.0  ;;  %v3884_v6 = vmul.f32 %v5515_v56, %v6777_v11  ;;  %v3813_v23 = vpop.f32.mrb[139].mxu1  ;;  %v3794_v11 = vadd.f32 %v3793_v36, %v6935_v58 }
 0xd37   : > { %5528 = vlog2.f32 %v3975_v21  ;;  %v3814_v20 = vadd.f32 %v3813_v23, %v6929_v51  ;;  %vm3915_vm8 = vcmp.gt.f32.partialorder %v6975_v26, 20.0 }
 0xd38   : > { %v5517_v27 = vpop.eup %5516  ;;  %v3952_v53 = vmul.f32 1.442695, %v3931_v47  ;;  %v6984_v37 = vadd.f32 %v3884_v6, %v3788_v2  ;;  %5530 = vpow2.f32 %v3864_v28 }
 0xd39   : > { %v5519_v41 = vpop.eup %5518  ;;  %v3976_v8 = vadd.f32 1.0, %v5517_v27  ;;  %v3866_v30 = vmul.f32 1.442695, %v3814_v20  ;;  %v6986_v57 = vpop.f32.mrb[140].mxu1 }
 0xd3a   : > { %5532 = vpow2.f32 %v3952_v53  ;;  %v3932_v24 = vmin.f32 %v6984_v37, 20.0  ;;  %v3885_v32 = vmul.f32 %v5519_v41, %v6783_v43  ;;  %v3819_v40 = vpop.f32.mrb[141].mxu1  ;;  %v3812_v41 = vadd.f32 %v6977_v22, %v6935_v58 }
 0xd3b   : > { %5534 = vlog2.f32 %v3976_v8  ;;  %v3820_v61 = vadd.f32 %v3819_v40, %v6929_v51  ;;  %vm3916_vm9 = vcmp.gt.f32.partialorder %v6984_v37, 20.0 }
 0xd3c   : > { %v5521_v42 = vpop.eup %5520  ;;  %v3954_v44 = vmul.f32 1.442695, %v3932_v24  ;;  %v6994_v25 = vadd.f32 %v3885_v32, %v3794_v11  ;;  %5536 = vpow2.f32 %v3866_v30 }
 0xd3d   : > { %v5523_v63 = vpop.eup %5522  ;;  %v3977_v54 = vadd.f32 1.0, %v5521_v42  ;;  %v3868_v50 = vmul.f32 1.442695, %v3820_v61  ;;  %v6996_v34 = vpop.f32.mrb[142].mxu1 }
 0xd3e   : > { %v5525_v15 = vpop.eup %5524  ;;  %v3991_v43 = vmul.f32 0.6931472, %v5523_v63  ;;  %5538 = vpow2.f32 %v3954_v44  ;;  %v3933_v36 = vmin.f32 %v6994_v25, 20.0  ;;  %v3825_v45 = vpop.f32.mrb[143].mxu1  ;;  %vm3917_vm10 = vcmp.gt.f32.partialorder %v6994_v25, 20.0 }
 0xd3f   : > { %5540 = vlog2.f32 %v3977_v54  ;;  %v3886_v33 = vmul.f32 %v5525_v15, %v6789_v62  ;;  %v3826_v3 = vadd.f32 %v3825_v45, %v6929_v51  ;;  %v3818_v15 = vadd.f32 %v6986_v57, %v6935_v58 }
 0xd40   : > { %v5527_v52 = vpop.eup %5526  ;;  %v4022_v5 = vsel %vm3910_vm3, %v6941_v9, %v3991_v43  ;;  %v3956_v0 = vmul.f32 1.442695, %v3933_v36  ;;  %5542 = vpow2.f32 %v3868_v50 }
 0xd41   : > { %v5529_v7 = vpop.eup %5528  ;;  %4038 = vst [vmem:[%s7005_s30] sm:$0xff] %v4022_v5  ;;  %v3978_v13 = vadd.f32 1.0, %v5527_v52  ;;  %v7008_v39 = vadd.f32 %v3886_v33, %v3800_v1  ;;  %v3870_v48 = vmul.f32 1.442695, %v3826_v3  ;;  %v7010_v14 = vpop.f32.mrb[144].mxu1 }
 0xd42   : > { %v5531_v62 = vpop.eup %5530  ;;  %v3993_v49 = vmul.f32 0.6931472, %v5529_v7  ;;  %5544 = vpow2.f32 %v3956_v0  ;;  %v3831_v9 = vpop.f32.mrb[145].mxu1 }
 0xd43   : > { %5546 = vlog2.f32 %v3978_v13  ;;  %v3934_v17 = vmin.f32 %v7008_v39, 20.0  ;;  %v3887_v10 = vmul.f32 %v5531_v62, %v6795_v59  ;;  %v3832_v28 = vadd.f32 %v3831_v9, %v6929_v51 }
 0xd44   : > { %v5533_v56 = vpop.eup %5532  ;;  %v4023_v21 = vsel %vm3911_vm4, %v6947_v55, %v3993_v49  ;;  %5548 = vpow2.f32 %v3870_v48  ;;  %vm3918_vm11 = vcmp.gt.f32.partialorder %v7008_v39, 20.0 }
 0xd45   : > { %v5535_v47 = vpop.eup %5534  ;;  %4039 = vst [vmem:[%s7005_s30 + $0x8] sm:$0xff] %v4023_v21  ;;  %v3979_v2 = vadd.f32 1.0, %v5533_v56  ;;  %v3958_v6 = vmul.f32 1.442695, %v3934_v17  ;;  %v7020_v23 = vadd.f32 %v3887_v10, %v3806_v16  ;;  %v7022_v20 = vpop.f32.mrb[146].mxu1 }
 0xd46   : > { %v5537_v27 = vpop.eup %5536  ;;  %v3995_v12 = vmul.f32 0.6931472, %v5535_v47  ;;  %v3872_v59 = vmul.f32 1.442695, %v3832_v28  ;;  %v3837_v53 = vpop.f32.mrb[147].mxu1 }
 0xd47   : > { %5550 = vlog2.f32 %v3979_v2  ;;  %v3935_v55 = vmin.f32 %v7020_v23, 20.0  ;;  %v3888_v8 = vmul.f32 %v5537_v27, %v6801_v46  ;;  %v3838_v11 = vadd.f32 %v3837_v53, %v6929_v51 }
 0xd48   : > { %v5539_v30 = vpop.eup %5538  ;;  %v4024_v24 = vsel %vm3912_vm5, %v6953_v31, %v3995_v12  ;;  %5552 = vpow2.f32 %v3958_v6  ;;  %vm3919_vm12 = vcmp.gt.f32.partialorder %v7020_v23, 20.0 }
 0xd49   : > { %v5541_v32 = vpop.eup %5540  ;;  %4040 = vst [vmem:[%s7005_s30 + $0x10] sm:$0xff] %v4024_v24  ;;  %v3980_v40 = vadd.f32 1.0, %v5539_v30  ;;  %v3960_v61 = vmul.f32 1.442695, %v3935_v55  ;;  %v7032_v42 = vadd.f32 %v3888_v8, %v3812_v41  ;;  %5554 = vpow2.f32 %v3872_v59  ;;  %v3841_v44 = vpop.f32.mrb[148].mxu1 }
 0xd4a   : > { %v5543_v63 = vpop.eup %5542  ;;  %v3997_v22 = vmul.f32 0.6931472, %v5541_v32  ;;  %v3874_v46 = vmul.f32 1.442695, %v3838_v11  ;;  %v7036_v54 = vadd.f32 %v3841_v44, %v6935_v58  ;;  %v3843_v31 = vpop.f32.mrb[149].mxu1 }
 0xd4b   : > { %5556 = vlog2.f32 %v3980_v40  ;;  %v3936_v50 = vmin.f32 %v7032_v42, 20.0  ;;  %v3889_v43 = vmul.f32 %v5543_v63, %v6807_v4  ;;  %v3844_v1 = vadd.f32 %v3843_v31, %v6929_v51 }
 0xd4c   : > { %v5545_v36 = vpop.eup %5544  ;;  %v4025_v45 = vsel %vm3913_vm6, %v6959_v35, %v3997_v22  ;;  %5558 = vpow2.f32 %v3960_v61  ;;  %v3824_v35 = vadd.f32 %v6996_v34, %v6935_v58  ;;  %vm3920_vm13 = vcmp.gt.f32.partialorder %v7032_v42, 20.0 }
 0xd4d   : > { %v5547_v33 = vpop.eup %5546  ;;  %4041 = vst [vmem:[%s7005_s30 + $0x18] sm:$0xff] %v4025_v45  ;;  %v3981_v3 = vadd.f32 1.0, %v5545_v36  ;;  %v3962_v52 = vmul.f32 1.442695, %v3936_v50  ;;  %v7045_v5 = vadd.f32 %v3889_v43, %v3818_v15  ;;  %5560 = vpow2.f32 %v3874_v46 }
 0xd4e   : > { %v5549_v0 = vpop.eup %5548  ;;  %v3999_v57 = vmul.f32 0.6931472, %v5547_v33  ;;  %v3876_v7 = vmul.f32 1.442695, %v3844_v1 }
 0xd4f   : > { %5562 = vlog2.f32 %v3981_v3  ;;  %v3937_v4 = vmin.f32 %v7045_v5, 20.0  ;;  %v3890_v51 = vmul.f32 %v5549_v0, %v6812_v60  ;;  %vm3921_vm14 = vcmp.gt.f32.partialorder %v7045_v5, 20.0 }
 0xd50   : > { %v4026_v13 = vsel %vm3914_vm7, %v6967_v38, %v3999_v57  ;;  %5564 = vpow2.f32 %v3962_v52  ;;  %v3830_v38 = vadd.f32 %v7010_v14, %v6935_v58 }
 0xd51   : > { %v5551_v48 = vpop.eup %5550  ;;  %4042 = vst [vmem:[%s7005_s30 + $0x20] sm:$0xff] %v4026_v13  ;;  %v3964_v62 = vmul.f32 1.442695, %v3937_v4  ;;  %v7054_v49 = vadd.f32 %v3890_v51, %v3824_v35  ;;  %5566 = vpow2.f32 %v3876_v7 }
 0xd52   : > { %v5553_v9 = vpop.eup %5552  ;;  %v4001_v17 = vmul.f32 0.6931472, %v5551_v48 }
 0xd53   : > { %v5555_v16 = vpop.eup %5554  ;;  %v3982_v10 = vadd.f32 1.0, %v5553_v9  ;;  %5568 = vpow2.f32 %v3964_v62  ;;  %v3938_v34 = vmin.f32 %v7054_v49, 20.0  ;;  %vm3922_vm15 = vcmp.gt.f32.partialorder %v7054_v49, 20.0 }
 0xd54   : > { %v4027_v60 = vsel %vm3915_vm8, %v6975_v26, %v4001_v17  ;;  %v3891_v56 = vmul.f32 %v5555_v16, %v6817_v29  ;;  %v3836_v29 = vadd.f32 %v7022_v20, %v6935_v58 }
 0xd55   : > { %v5557_v21 = vpop.eup %5556  ;;  %4043 = vst [vmem:[%s7005_s30 + $0x28] sm:$0xff] %v4027_v60  ;;  %5570 = vlog2.f32 %v3982_v10  ;;  %v3966_v28 = vmul.f32 1.442695, %v3938_v34 }
 0xd56   : > { %v5559_v47 = vpop.eup %5558  ;;  %v4003_v2 = vmul.f32 0.6931472, %v5557_v21  ;;  %v7063_v6 = vadd.f32 %v3891_v56, %v3830_v38 }
 0xd57   : > { %v5561_v27 = vpop.eup %5560  ;;  %v3983_v12 = vadd.f32 1.0, %v5559_v47  ;;  %5572 = vpow2.f32 %v3966_v28 }
 0xd58   : > { %v4028_v26 = vsel %vm3916_vm9, %v6984_v37, %v4003_v2  ;;  %v3939_v14 = vmin.f32 %v7063_v6, 20.0  ;;  %v3892_v59 = vmul.f32 %v5561_v27, %v6822_v18  ;;  %vm3923_vm0 = vcmp.gt.f32.partialorder %v7063_v6, 20.0 }
 0xd59   : > { %v5563_v53 = vpop.eup %5562  ;;  %4044 = vst [vmem:[%s7005_s30 + $0x30] sm:$0xff] %v4028_v26  ;;  %5574 = vlog2.f32 %v3983_v12 }
 0xd5a   : > { %v5565_v55 = vpop.eup %5564  ;;  %v4005_v41 = vmul.f32 0.6931472, %v5563_v53  ;;  %v3968_v8 = vmul.f32 1.442695, %v3939_v14  ;;  %v7072_v30 = vadd.f32 %v3892_v59, %v3836_v29 }
 0xd5b   : > { %v5567_v24 = vpop.eup %5566  ;;  %v3984_v37 = vadd.f32 1.0, %v5565_v55 }
 0xd5c   : > { %v4029_v11 = vsel %vm3917_vm10, %v6994_v25, %v4005_v41  ;;  %5576 = vpow2.f32 %v3968_v8  ;;  %v3940_v58 = vmin.f32 %v7072_v30, 20.0  ;;  %v3893_v18 = vmul.f32 %v5567_v24, %v6827_v19 }
 0xd5d   : > { %v5569_v20 = vpop.eup %5568  ;;  %4045 = vst [vmem:[%s7005_s30 + $0x38] sm:$0xff] %v4029_v11  ;;  %5578 = vlog2.f32 %v3984_v37  ;;  %vm3924_vm1 = vcmp.gt.f32.partialorder %v7072_v30, 20.0 }
 0xd5e   : > { %v3985_v32 = vadd.f32 1.0, %v5569_v20  ;;  %v3970_v40 = vmul.f32 1.442695, %v3940_v58  ;;  %v3909_v44 = vadd.f32 %v3893_v18, %v7036_v54 }
 0xd5f   : > { %v5571_v61 = vpop.eup %5570 }
 0xd60   : > { %v4007_v63 = vmul.f32 0.6931472, %v5571_v61  ;;  %5580 = vlog2.f32 %v3985_v32  ;;  %v3941_v25 = vmin.f32 %v3909_v44, 20.0  ;;  %vm3925_vm2 = vcmp.gt.f32.partialorder %v3909_v44, 20.0 }
 0xd61   : > { %v5573_v22 = vpop.eup %5572  ;;  %5582 = vpow2.f32 %v3970_v40 }
 0xd62   : > { %v4030_v46 = vsel %vm3918_vm11, %v7008_v39, %v4007_v63  ;;  %v3986_v31 = vadd.f32 1.0, %v5573_v22  ;;  %v3972_v15 = vmul.f32 1.442695, %v3941_v25 }
 0xd63   : > { %v5575_v50 = vpop.eup %5574  ;;  %4046 = vst [vmem:[%s7005_s30 + $0x40] sm:$0xff] %v4030_v46 }
 0xd64   : > { %v4009_v19 = vmul.f32 0.6931472, %v5575_v50  ;;  %5584 = vlog2.f32 %v3986_v31 }
 0xd65   : > { %5586 = vpow2.f32 %v3972_v15 }
 0xd66   : > { %v5577_v54 = vpop.eup %5576  ;;  %v4031_v43 = vsel %vm3919_vm12, %v7020_v23, %v4009_v19 }
 0xd67   : > { %v5579_v36 = vpop.eup %5578  ;;  %4047 = vst [vmem:[%s7005_s30 + $0x48] sm:$0xff] %v4031_v43  ;;  %v3987_v45 = vadd.f32 1.0, %v5577_v54 }
 0xd68   : > { %v4011_v1 = vmul.f32 0.6931472, %v5579_v36 }
 0xd69   : > { %5588 = vlog2.f32 %v3987_v45 }
 0xd6a   : > { %v5581_v39 = vpop.eup %5580  ;;  %v4032_v33 = vsel %vm3920_vm13, %v7032_v42, %v4011_v1 }
 0xd6b   : > { %v5583_v3 = vpop.eup %5582  ;;  %4048 = vst [vmem:[%s7005_s30 + $0x50] sm:$0xff] %v4032_v33  ;;  %v4013_v52 = vmul.f32 0.6931472, %v5581_v39 }
 0xd6c   : > { %v3988_v0 = vadd.f32 1.0, %v5583_v3 }
 0xd6d   : > { %v4033_v23 = vsel %vm3921_vm14, %v7045_v5, %v4013_v52 }
 0xd6e   : > { %v5585_v57 = vpop.eup %5584  ;;  %4049 = vst [vmem:[%s7005_s30 + $0x58] sm:$0xff] %v4033_v23  ;;  %5590 = vlog2.f32 %v3988_v0 }
 0xd6f   : > { %v5587_v7 = vpop.eup %5586  ;;  %v4015_v4 = vmul.f32 0.6931472, %v5585_v57 }
 0xd70   : > { %v3989_v35 = vadd.f32 1.0, %v5587_v7 }
 0xd71   : > { %v4034_v42 = vsel %vm3922_vm15, %v7054_v49, %v4015_v4 }
 0xd72   : > { %4050 = vst [vmem:[%s7005_s30 + $0x60] sm:$0xff] %v4034_v42  ;;  %5592 = vlog2.f32 %v3989_v35 }
 0xd73   : > { %v5589_v51 = vpop.eup %5588 }
 0xd74   : > { %v4017_v13 = vmul.f32 0.6931472, %v5589_v51 }
 0xd76   : > { %v4035_v5 = vsel %vm3923_vm0, %v7063_v6, %v4017_v13 }
 0xd77   : > { %4051 = vst [vmem:[%s7005_s30 + $0x68] sm:$0xff] %v4035_v5 }
 0xd78   : > { %v5591_v48 = vpop.eup %5590 }
 0xd79   : > { %v4019_v62 = vmul.f32 0.6931472, %v5591_v48 }
 0xd7b   : > { %v4036_v49 = vsel %vm3924_vm1, %v7072_v30, %v4019_v62 }
 0xd7c   : > { %v5593_v9 = vpop.eup %5592  ;;  %4052 = vst [vmem:[%s7005_s30 + $0x70] sm:$0xff] %v4036_v49 }
 0xd7d   : > { %v4021_v17 = vmul.f32 0.6931472, %v5593_v9 }
 0xd7f   : > { %v4037_v16 = vsel %vm3925_vm2, %v3909_v44, %v4021_v17 }
 0xd80   : > { %4053 = vst [vmem:[%s7005_s30 + $0x78] sm:$0xff] %v4037_v16 }
 0xd81   : > { %5607 = shalt.err (!%p5604_p3)
}
 0xd82   : > { %s5608_s23 = scalar_lea.hbm %s7106_s20, 2048  ;;  %s5612_s16 = scalar_lea.hbm %s7167_s13, 4096 }
 0xd83   : > { %p5609_p4 = scmp.ne.s32.totalorder %s7106_s20, %s5608_s23  ;;  %p5613_p9 = scmp.lt.u32.totalorder %s7106_s20, %s7167_s13 }
 0xd84   : > { %p5614_p10 = scmp.lt.u32.totalorder %s5612_s16, %s5608_s23  ;;  %p5616_p12 = scmp.lt.u32.totalorder %s5608_s23, %s7106_s20 }
 0xd85   : > { %p5610_p7 = pnand %p5609_p4, %p5770_p5 }
 0xd86   : > { %p5615_p11 = por %p5614_p10, %p5613_p9 }
 0xd87   : > { %p5611_p8 = pneg %p5610_p7 }
 0xd88   : > { %p5617_p13 = por %p5616_p12, %p5615_p11 }
 0xd8a   : > { %p5618_p0 = pnand %p5617_p13, %p5611_p8 }
 0xd8c   : > { %5621 = shalt.err (!%p5618_p0)
}
 0xd8d   : > { %s5660_s0 = smov 128   ;;  %s5661_s22 = smov 8  }
 0xd8e   : > { %5360 = dma.vmem_to_hbm [thread:$0]  (%p5770_p5), %s7108_s2, 2048, %s7106_s20, %s7113_s29, %s5660_s0, %s5660_s0, %s5661_s22  }
 0xd8f PF: > { %p5366_p1 = scmp.ge.s32.totalorder %s5656_s28, 2  ;;  %s4083_s24 = sand.u32 1, %s5644_s25  }
 0xd90   : > { %s4084_s23 = scalar_lea.sflag [#allocation3], %s4083_s24 }
 0xd91   : > { %p5363_p2 = pnand %p5366_p1, %p5774_p6 }
 0xd93   : > { %5639 = dma.done.wait (!%p5363_p2), %s4084_s23, 2048  }
 0xd94   : > { %5641 = vsyncadd (!%p5363_p2), %s4084_s23, 4294965248  ;;  %p23_p3 = scmp.ge.s32.totalorder %s5757_s14, 4   ;;  %s7176_s25 = smov %s5648_s26 }
 0xd95   : > { %s7177_s26 = smov %s5652_s27  ;;  %s7178_s27 = smov %s5768_s17 }
 0xd96   : > { %s7179_s28 = smov %s5757_s14  ;;  %25 = sbr.rel (!%p23_p3) target bundleno = 7 (0x7), region = 125 }
 0xd9d   :  { %4089 = vsyncpa [#allocation3], 1 }
 0xd9e   :  { %4091 = vsyncpa [#allocation3 + $0x1], 1 }

</bundles_post_ra>
